<compile_context>
chip_gen: v7x
topology: tpu7x:2x2x1
jax: 0.10.0
libtpu: 0.0.40
codegen_flags: <defaults>
</compile_context>

<pallas_src>
import jax
import jax.numpy as jnp
from jax.experimental import pallas as pl
from jax.experimental.pallas import tpu as pltpu


def _round_up(v, m):
    return (v + m - 1) // m * m


# ----------------------------- fused kernel ---------------------------------

def _make_kernel(H, W):
    HW = H * W

    def kernel(x_ref, wstem_ref, bstem_ref, b1_ref, wf1_ref, bf1_ref,
               w4c_ref, b4c_ref, o_ref, pad_pool, pad_34, pad_t4):
        # x_ref:     (1, HW, 384)   one image, NHWC flattened
        # wstem_ref: (384, 384)     128-aligned packed [w1|0, w2|0, w3a w4a]
        # bstem_ref: (1, 384)       matching biases (b1 excluded, added post-pool)
        # wf1_ref:   (9, 128, 224)  per-tap block-diag weight for fused br3/br4 conv
        # w4c_ref:   (9, 128, 96)   per-tap weight for br4 second conv (rows 96:128 zero)
        # pad_*:     (H+2, Wp8, 128) VMEM halo scratches
        Wp8 = pad_pool.shape[1]

        # ---- fused stem: four 1x1 convs as one 128-aligned (384->384) matmul ----
        x = x_ref[0]                                                    # (HW, 384)
        stem = jnp.dot(x, wstem_ref[...], preferred_element_type=jnp.float32)
        stem = stem + bstem_ref[...]                                    # (HW, 384)

        # ---- zero only the halo borders (interiors are always rewritten) --------
        zrow = jnp.zeros((1, Wp8, 128), jnp.float32)
        zcol = jnp.zeros((H, 1, 128), jnp.float32)

        def zero_border(pad):
            pad[0:1, :, :] = zrow
            pad[H + 1:H + 2, :, :] = zrow
            pad[1:H + 1, 0:1, :] = zcol
            pad[1:H + 1, W + 1:W + 2, :] = zcol

        zero_border(pad_pool)
        zero_border(pad_34)
        zero_border(pad_t4)

        def conv3x3(pad, w_ref, b_ref):
            # 9 accumulating per-tap dots (K = 128, f32 accumulate); no im2col concat.
            acc = None
            for dy in range(3):
                for dx in range(3):
                    lhs = pad[dy:dy + H, dx:dx + W, :].reshape(HW, 128)
                    y = jnp.dot(lhs, w_ref[dy * 3 + dx],
                                preferred_element_type=jnp.float32)
                    acc = y if acc is None else acc + y
            return acc + b_ref[...]

        # ---- branch 2: plain 1x1 (stem group 1), stored immediately -------------
        o_ref[0, :, 96:192] = stem[:, 128:224].astype(o_ref.dtype)

        # ---- branch 1: 1x1 then separable 3x3 avg-pool (count_include_pad, /9) --
        pad_pool[1:H + 1, 1:W + 1, :] = stem[:, 0:128].reshape(H, W, 128)
        pv = (pad_pool[0:H, 0:W + 2, :]
              + pad_pool[1:H + 1, 0:W + 2, :]
              + pad_pool[2:H + 2, 0:W + 2, :])                          # (H, W+2, 128)
        pooled = pv[:, 0:W, :] + pv[:, 1:W + 1, :] + pv[:, 2:W + 2, :]  # (H, W, 128)
        br1 = pooled.reshape(HW, 128)[:, 0:96] * (1.0 / 9.0) + b1_ref[...]
        o_ref[0, :, 0:96] = br1.astype(o_ref.dtype)

        # ---- branches 3 & 4, first 3x3 fused: 128-lane input, block-diag weight --
        # input ch 0:64 = branch-3 stem, 64:128 = branch-4 stem
        # output cols 0:96 = t4 (branch-4), 96:128 = zero pad, 128:224 = branch-3
        pad_34[1:H + 1, 1:W + 1, :] = stem[:, 256:384].reshape(H, W, 128)
        acc1 = conv3x3(pad_34, wf1_ref, bf1_ref)                        # (HW, 224)
        o_ref[0, :, 192:288] = acc1[:, 128:224].astype(o_ref.dtype)     # branch 3

        # ---- branch 4, second 3x3 (t4 zero-padded to 128 channels) --------------
        pad_t4[1:H + 1, 1:W + 1, :] = acc1[:, 0:128].reshape(H, W, 128)
        br4 = conv3x3(pad_t4, w4c_ref, b4c_ref)                         # (HW, 96)
        o_ref[0, :, 288:384] = br4.astype(o_ref.dtype)

    return kernel


# ----------------------------- wrapper ---------------------------------------

def inception_a(x_nchw, p):
    N, C, H, W = x_nchw.shape
    assert C == 384, "InceptionA input channels are fixed at 384"
    HW = H * W
    x = jnp.transpose(x_nchw, (0, 2, 3, 1)).reshape(N, HW, C)

    f32 = jnp.float32
    # --- 128-aligned stem packing: cols [0:96]=w1, [128:224]=w2, [256:320]=w3a,
    #     [320:384]=w4a (w3a/w4a adjacent -> one dense 128-wide branch-3/4 slice).
    w_stem = jnp.zeros((384, 384), f32)
    w_stem = w_stem.at[:, 0:96].set(p["w1"])
    w_stem = w_stem.at[:, 128:224].set(p["w2"])
    w_stem = w_stem.at[:, 256:320].set(p["w3a"])
    w_stem = w_stem.at[:, 320:384].set(p["w4a"])
    b_stem = jnp.zeros((1, 384), f32)
    b_stem = b_stem.at[0, 128:224].set(p["b2"])      # b1 added after pooling
    b_stem = b_stem.at[0, 256:320].set(p["b3a"])
    b_stem = b_stem.at[0, 320:384].set(p["b4a"])
    b1 = p["b1"].reshape(1, 96)

    # --- fused first 3x3 (branches 3+4), per-tap block-diagonal (128, 224) ----
    w_f1 = jnp.zeros((9, 128, 224), f32)
    w_f1 = w_f1.at[:, 64:128, 0:96].set(p["w4b"].reshape(9, 64, 96))    # t4
    w_f1 = w_f1.at[:, 0:64, 128:224].set(p["w3b"].reshape(9, 64, 96))   # branch 3
    b_f1 = jnp.zeros((1, 224), f32)
    b_f1 = b_f1.at[0, 0:96].set(p["b4b"])
    b_f1 = b_f1.at[0, 128:224].set(p["b3b"])

    # --- branch-4 second 3x3: input zero-padded 96 -> 128 channels ------------
    w_4c = jnp.zeros((9, 128, 96), f32)
    w_4c = w_4c.at[:, 0:96, :].set(p["w4c"].reshape(9, 96, 96))
    b_4c = p["b4c"].reshape(1, 96)

    Wp8 = _round_up(W + 2, 8)           # sublane-aligned halo row pitch
    kernel = _make_kernel(H, W)

    out = pl.pallas_call(
        kernel,
        out_shape=jax.ShapeDtypeStruct((N, HW, 384), x.dtype),
        grid_spec=pltpu.PrefetchScalarGridSpec(
            num_scalar_prefetch=0,
            grid=(N,),
            in_specs=[
                pl.BlockSpec((1, HW, 384), lambda n: (n, 0, 0)),     # x (per image)
                pl.BlockSpec((384, 384), lambda n: (0, 0)),          # w_stem
                pl.BlockSpec((1, 384), lambda n: (0, 0)),            # b_stem
                pl.BlockSpec((1, 96), lambda n: (0, 0)),             # b1
                pl.BlockSpec((9, 128, 224), lambda n: (0, 0, 0)),    # fused 3x3 weight
                pl.BlockSpec((1, 224), lambda n: (0, 0)),            # fused 3x3 bias
                pl.BlockSpec((9, 128, 96), lambda n: (0, 0, 0)),     # w4c (padded)
                pl.BlockSpec((1, 96), lambda n: (0, 0)),             # b4c
            ],
            out_specs=pl.BlockSpec((1, HW, 384), lambda n: (n, 0, 0)),
            scratch_shapes=[
                pltpu.VMEM((H + 2, Wp8, 128), jnp.float32),          # pool halo
                pltpu.VMEM((H + 2, Wp8, 128), jnp.float32),          # br3/4 first-conv halo
                pltpu.VMEM((H + 2, Wp8, 128), jnp.float32),          # br4 second-conv halo
            ],
        ),
        compiler_params=pltpu.CompilerParams(
            dimension_semantics=("parallel",),          # one image per TensorCore on v7x
            vmem_limit_bytes=32 * 1024 * 1024,          # sized for 35x35 feature maps
        ),
    )(x, w_stem, b_stem, b1, w_f1, b_f1, w_4c, b_4c)

    return jnp.transpose(out.reshape(N, H, W, 384), (0, 3, 1, 2))    # -> NCHW


# ----------------------------- params & reference ----------------------------

def make_params(key):
    ks = jax.random.split(key, 14)

    def w(k, shape, scale=0.05):
        return scale * jax.random.normal(k, shape, dtype=jnp.float32)

    return {
        "w1":  w(ks[0], (384, 96)),       "b1":  w(ks[1], (96,)),
        "w2":  w(ks[2], (384, 96)),       "b2":  w(ks[3], (96,)),
        "w3a": w(ks[4], (384, 64)),       "b3a": w(ks[5], (64,)),
        "w3b": w(ks[6], (3, 3, 64, 96)),  "b3b": w(ks[7], (96,)),
        "w4a": w(ks[8], (384, 64)),       "b4a": w(ks[9], (64,)),
        "w4b": w(ks[10], (3, 3, 64, 96)), "b4b": w(ks[11], (96,)),
        "w4c": w(ks[12], (3, 3, 96, 96)), "b4c": w(ks[13], (96,)),
    }


def reference(x_nchw, p):
    """Pure-JAX reference (matches PyTorch semantics, incl. count_include_pad)."""
    hi = jax.lax.Precision.HIGHEST
    x = jnp.transpose(x_nchw, (0, 2, 3, 1))

    def c1(x, w, b):
        return jnp.einsum("nhwc,co->nhwo", x, w, precision=hi) + b

    def c3(x, w, b):
        return jax.lax.conv_general_dilated(
            x, w, (1, 1), "SAME",
            dimension_numbers=("NHWC", "HWIO", "NHWC"), precision=hi) + b

    pooled = jax.lax.reduce_window(
        x, jnp.float32(0), jax.lax.add, (1, 3, 3, 1), (1, 1, 1, 1),
        ((0, 0), (1, 1), (1, 1), (0, 0))) / 9.0
    b1 = c1(pooled, p["w1"], p["b1"])
    b2 = c1(x, p["w2"], p["b2"])
    b3 = c3(c1(x, p["w3a"], p["b3a"]), p["w3b"], p["b3b"])
    t4 = c3(c1(x, p["w4a"], p["b4a"]), p["w4b"], p["b4b"])
    b4 = c3(t4, p["w4c"], p["b4c"])
    return jnp.transpose(jnp.concatenate([b1, b2, b3, b4], -1), (0, 3, 1, 2))


if __name__ == "__main__":
    key = jax.random.PRNGKey(0)
    kx, kp = jax.random.split(key)
    N, C, H, W = 2, 384, 8, 8                     # in_channels fixed at 384 by the module
    x = jax.random.normal(kx, (N, C, H, W), dtype=jnp.float32)
    params = make_params(kp)

    out = jax.jit(inception_a)(x, params)
    out = jax.block_until_ready(out)
    assert out.shape == (N, 384, H, W), out.shape  # 96 * 4 = 384 output channels

    ref = reference(x, params)
    assert jnp.allclose(out, ref, rtol=1e-3, atol=1e-3), float(jnp.max(jnp.abs(out - ref)))

    print("KERNEL_OK")
</pallas_src>

<mosaic_0001>
module attributes {stable_mosaic.version = 11 : i64} {
  func.func @kernel(%arg0: i32, %arg1: memref<1x64x384xf32, #tpu.memory_space<vmem>>, %arg2: memref<384x384xf32, #tpu.memory_space<vmem>>, %arg3: memref<1x384xf32, #tpu.memory_space<vmem>>, %arg4: memref<1x96xf32, #tpu.memory_space<vmem>>, %arg5: memref<9x128x224xf32, #tpu.memory_space<vmem>>, %arg6: memref<1x224xf32, #tpu.memory_space<vmem>>, %arg7: memref<9x128x96xf32, #tpu.memory_space<vmem>>, %arg8: memref<1x96xf32, #tpu.memory_space<vmem>>, %arg9: memref<1x64x384xf32, #tpu.memory_space<vmem>>, %arg10: memref<10x16x128xf32, #tpu.memory_space<vmem>>, %arg11: memref<10x16x128xf32, #tpu.memory_space<vmem>>, %arg12: memref<10x16x128xf32, #tpu.memory_space<vmem>>) attributes {dimension_semantics = [#tpu.dimension_semantics<parallel>], iteration_bounds = array<i64: 2>, scalar_prefetch = 0 : i64, scratch_operands = 3 : i64, tpu.core_type = #tpu.core_type<tc>, window_params = [{transform_indices = @transform_0, window_bounds = array<i64: 1, 64, 384>}, {pipeline_mode = #tpu.pipeline_mode<synchronous>, transform_indices = @transform_1, window_bounds = array<i64: 384, 384>}, {pipeline_mode = #tpu.pipeline_mode<synchronous>, transform_indices = @transform_2, window_bounds = array<i64: 1, 384>}, {pipeline_mode = #tpu.pipeline_mode<synchronous>, transform_indices = @transform_3, window_bounds = array<i64: 1, 96>}, {pipeline_mode = #tpu.pipeline_mode<synchronous>, transform_indices = @transform_4, window_bounds = array<i64: 9, 128, 224>}, {pipeline_mode = #tpu.pipeline_mode<synchronous>, transform_indices = @transform_5, window_bounds = array<i64: 1, 224>}, {pipeline_mode = #tpu.pipeline_mode<synchronous>, transform_indices = @transform_6, window_bounds = array<i64: 9, 128, 96>}, {pipeline_mode = #tpu.pipeline_mode<synchronous>, transform_indices = @transform_7, window_bounds = array<i64: 1, 96>}, {transform_indices = @transform_8, window_bounds = array<i64: 1, 64, 384>}]} {
    %c0 = arith.constant 0 : index
    %c0_0 = arith.constant 0 : index
    %c0_1 = arith.constant 0 : index
    %0 = vector.load %arg1[%c0, %c0_0, %c0_1] : memref<1x64x384xf32, #tpu.memory_space<vmem>>, vector<1x64x384xf32>
    %1 = vector.shape_cast %0 : vector<1x64x384xf32> to vector<64x384xf32>
    %c0_2 = arith.constant 0 : index
    %c0_3 = arith.constant 0 : index
    %2 = vector.load %arg2[%c0_2, %c0_3] : memref<384x384xf32, #tpu.memory_space<vmem>>, vector<384x384xf32>
    %cst = arith.constant dense<0.000000e+00> : vector<64x384xf32>
    %3 = tpu.matmul %1, %2, %cst {dimension_numbers = #tpu.dot_dimension_numbers<[1], [0], [0], [1], [0, 0, 1, 1], [], []>} : vector<64x384xf32>, vector<384x384xf32>, vector<64x384xf32> -> vector<64x384xf32>
    %c0_4 = arith.constant 0 : index
    %c0_5 = arith.constant 0 : index
    %4 = vector.load %arg3[%c0_4, %c0_5] : memref<1x384xf32, #tpu.memory_space<vmem>>, vector<1x384xf32>
    %5 = vector.broadcast %4 : vector<1x384xf32> to vector<64x384xf32>
    %6 = arith.addf %3, %5 : vector<64x384xf32>
    %cst_6 = arith.constant 0.000000e+00 : f32
    %7 = vector.broadcast %cst_6 : f32 to vector<1x16x128xf32>
    %cst_7 = arith.constant 0.000000e+00 : f32
    %8 = vector.broadcast %cst_7 : f32 to vector<8x1x128xf32>
    %c0_8 = arith.constant 0 : index
    %c0_9 = arith.constant 0 : index
    %c0_10 = arith.constant 0 : index
    %9 = vector.load %arg10[%c0_8, %c0_9, %c0_10] : memref<10x16x128xf32, #tpu.memory_space<vmem>>, vector<1x16x128xf32>
    tpu.vector_store %arg10[%c0_8, %c0_9, %c0_10], %7 {strides = array<i32>} : memref<10x16x128xf32, #tpu.memory_space<vmem>>, vector<1x16x128xf32>,
    %c9 = arith.constant 9 : index
    %c0_11 = arith.constant 0 : index
    %c0_12 = arith.constant 0 : index
    %10 = vector.load %arg10[%c9, %c0_11, %c0_12] : memref<10x16x128xf32, #tpu.memory_space<vmem>>, vector<1x16x128xf32>
    tpu.vector_store %arg10[%c9, %c0_11, %c0_12], %7 {strides = array<i32>} : memref<10x16x128xf32, #tpu.memory_space<vmem>>, vector<1x16x128xf32>,
    %c1 = arith.constant 1 : index
    %c0_13 = arith.constant 0 : index
    %c0_14 = arith.constant 0 : index
    %11 = vector.load %arg10[%c1, %c0_13, %c0_14] : memref<10x16x128xf32, #tpu.memory_space<vmem>>, vector<8x1x128xf32>
    tpu.vector_store %arg10[%c1, %c0_13, %c0_14], %8 {strides = array<i32>} : memref<10x16x128xf32, #tpu.memory_space<vmem>>, vector<8x1x128xf32>,
    %c1_15 = arith.constant 1 : index
    %c9_16 = arith.constant 9 : index
    %c0_17 = arith.constant 0 : index
    %12 = vector.load %arg10[%c1_15, %c9_16, %c0_17] : memref<10x16x128xf32, #tpu.memory_space<vmem>>, vector<8x1x128xf32>
    tpu.vector_store %arg10[%c1_15, %c9_16, %c0_17], %8 {strides = array<i32>} : memref<10x16x128xf32, #tpu.memory_space<vmem>>, vector<8x1x128xf32>,
    %c0_18 = arith.constant 0 : index
    %c0_19 = arith.constant 0 : index
    %c0_20 = arith.constant 0 : index
    %13 = vector.load %arg11[%c0_18, %c0_19, %c0_20] : memref<10x16x128xf32, #tpu.memory_space<vmem>>, vector<1x16x128xf32>
    tpu.vector_store %arg11[%c0_18, %c0_19, %c0_20], %7 {strides = array<i32>} : memref<10x16x128xf32, #tpu.memory_space<vmem>>, vector<1x16x128xf32>,
    %c9_21 = arith.constant 9 : index
    %c0_22 = arith.constant 0 : index
    %c0_23 = arith.constant 0 : index
    %14 = vector.load %arg11[%c9_21, %c0_22, %c0_23] : memref<10x16x128xf32, #tpu.memory_space<vmem>>, vector<1x16x128xf32>
    tpu.vector_store %arg11[%c9_21, %c0_22, %c0_23], %7 {strides = array<i32>} : memref<10x16x128xf32, #tpu.memory_space<vmem>>, vector<1x16x128xf32>,
    %c1_24 = arith.constant 1 : index
    %c0_25 = arith.constant 0 : index
    %c0_26 = arith.constant 0 : index
    %15 = vector.load %arg11[%c1_24, %c0_25, %c0_26] : memref<10x16x128xf32, #tpu.memory_space<vmem>>, vector<8x1x128xf32>
    tpu.vector_store %arg11[%c1_24, %c0_25, %c0_26], %8 {strides = array<i32>} : memref<10x16x128xf32, #tpu.memory_space<vmem>>, vector<8x1x128xf32>,
    %c1_27 = arith.constant 1 : index
    %c9_28 = arith.constant 9 : index
    %c0_29 = arith.constant 0 : index
    %16 = vector.load %arg11[%c1_27, %c9_28, %c0_29] : memref<10x16x128xf32, #tpu.memory_space<vmem>>, vector<8x1x128xf32>
    tpu.vector_store %arg11[%c1_27, %c9_28, %c0_29], %8 {strides = array<i32>} : memref<10x16x128xf32, #tpu.memory_space<vmem>>, vector<8x1x128xf32>,
    %c0_30 = arith.constant 0 : index
    %c0_31 = arith.constant 0 : index
    %c0_32 = arith.constant 0 : index
    %17 = vector.load %arg12[%c0_30, %c0_31, %c0_32] : memref<10x16x128xf32, #tpu.memory_space<vmem>>, vector<1x16x128xf32>
    tpu.vector_store %arg12[%c0_30, %c0_31, %c0_32], %7 {strides = array<i32>} : memref<10x16x128xf32, #tpu.memory_space<vmem>>, vector<1x16x128xf32>,
    %c9_33 = arith.constant 9 : index
    %c0_34 = arith.constant 0 : index
    %c0_35 = arith.constant 0 : index
    %18 = vector.load %arg12[%c9_33, %c0_34, %c0_35] : memref<10x16x128xf32, #tpu.memory_space<vmem>>, vector<1x16x128xf32>
    tpu.vector_store %arg12[%c9_33, %c0_34, %c0_35], %7 {strides = array<i32>} : memref<10x16x128xf32, #tpu.memory_space<vmem>>, vector<1x16x128xf32>,
    %c1_36 = arith.constant 1 : index
    %c0_37 = arith.constant 0 : index
    %c0_38 = arith.constant 0 : index
    %19 = vector.load %arg12[%c1_36, %c0_37, %c0_38] : memref<10x16x128xf32, #tpu.memory_space<vmem>>, vector<8x1x128xf32>
    tpu.vector_store %arg12[%c1_36, %c0_37, %c0_38], %8 {strides = array<i32>} : memref<10x16x128xf32, #tpu.memory_space<vmem>>, vector<8x1x128xf32>,
    %c1_39 = arith.constant 1 : index
    %c9_40 = arith.constant 9 : index
    %c0_41 = arith.constant 0 : index
    %20 = vector.load %arg12[%c1_39, %c9_40, %c0_41] : memref<10x16x128xf32, #tpu.memory_space<vmem>>, vector<8x1x128xf32>
    tpu.vector_store %arg12[%c1_39, %c9_40, %c0_41], %8 {strides = array<i32>} : memref<10x16x128xf32, #tpu.memory_space<vmem>>, vector<8x1x128xf32>,
    %21 = vector.extract_strided_slice %6 {offsets = [0, 128], sizes = [64, 96], strides = [1, 1]} : vector<64x384xf32> to vector<64x96xf32>
    %c0_42 = arith.constant 0 : index
    %c0_43 = arith.constant 0 : index
    %c96 = arith.constant 96 : index
    %22 = vector.load %arg9[%c0_42, %c0_43, %c96] : memref<1x64x384xf32, #tpu.memory_space<vmem>>, vector<1x64x96xf32>
    %23 = vector.shape_cast %22 : vector<1x64x96xf32> to vector<64x96xf32>
    %24 = vector.shape_cast %21 : vector<64x96xf32> to vector<1x64x96xf32>
    tpu.vector_store %arg9[%c0_42, %c0_43, %c96], %24 {strides = array<i32>} : memref<1x64x384xf32, #tpu.memory_space<vmem>>, vector<1x64x96xf32>,
    %25 = vector.extract_strided_slice %6 {offsets = [0, 0], sizes = [64, 128], strides = [1, 1]} : vector<64x384xf32> to vector<64x128xf32>
    %26 = vector.shape_cast %25 : vector<64x128xf32> to vector<8x8x128xf32>
    %c1_44 = arith.constant 1 : index
    %c1_45 = arith.constant 1 : index
    %c0_46 = arith.constant 0 : index
    %27 = vector.load %arg10[%c1_44, %c1_45, %c0_46] : memref<10x16x128xf32, #tpu.memory_space<vmem>>, vector<8x8x128xf32>
    tpu.vector_store %arg10[%c1_44, %c1_45, %c0_46], %26 {strides = array<i32>} : memref<10x16x128xf32, #tpu.memory_space<vmem>>, vector<8x8x128xf32>,
    %c0_47 = arith.constant 0 : index
    %c0_48 = arith.constant 0 : index
    %c0_49 = arith.constant 0 : index
    %28 = vector.load %arg10[%c0_47, %c0_48, %c0_49] : memref<10x16x128xf32, #tpu.memory_space<vmem>>, vector<8x10x128xf32>
    %c1_50 = arith.constant 1 : index
    %c0_51 = arith.constant 0 : index
    %c0_52 = arith.constant 0 : index
    %29 = vector.load %arg10[%c1_50, %c0_51, %c0_52] : memref<10x16x128xf32, #tpu.memory_space<vmem>>, vector<8x10x128xf32>
    %30 = arith.addf %28, %29 : vector<8x10x128xf32>
    %c2 = arith.constant 2 : index
    %c0_53 = arith.constant 0 : index
    %c0_54 = arith.constant 0 : index
    %31 = vector.load %arg10[%c2, %c0_53, %c0_54] : memref<10x16x128xf32, #tpu.memory_space<vmem>>, vector<8x10x128xf32>
    %32 = arith.addf %30, %31 : vector<8x10x128xf32>
    %33 = vector.extract_strided_slice %32 {offsets = [0, 0, 0], sizes = [8, 8, 128], strides = [1, 1, 1]} : vector<8x10x128xf32> to vector<8x8x128xf32>
    %34 = vector.extract_strided_slice %32 {offsets = [0, 1, 0], sizes = [8, 8, 128], strides = [1, 1, 1]} : vector<8x10x128xf32> to vector<8x8x128xf32>
    %35 = arith.addf %33, %34 : vector<8x8x128xf32>
    %36 = vector.extract_strided_slice %32 {offsets = [0, 2, 0], sizes = [8, 8, 128], strides = [1, 1, 1]} : vector<8x10x128xf32> to vector<8x8x128xf32>
    %37 = arith.addf %35, %36 : vector<8x8x128xf32>
    %38 = vector.shape_cast %37 : vector<8x8x128xf32> to vector<64x128xf32>
    %39 = vector.extract_strided_slice %38 {offsets = [0, 0], sizes = [64, 96], strides = [1, 1]} : vector<64x128xf32> to vector<64x96xf32>
    %cst_55 = arith.constant 0.111111112 : f32
    %40 = vector.broadcast %cst_55 : f32 to vector<64x96xf32>
    %41 = arith.mulf %39, %40 : vector<64x96xf32>
    %c0_56 = arith.constant 0 : index
    %c0_57 = arith.constant 0 : index
    %42 = vector.load %arg4[%c0_56, %c0_57] : memref<1x96xf32, #tpu.memory_space<vmem>>, vector<1x96xf32>
    %43 = vector.broadcast %42 : vector<1x96xf32> to vector<64x96xf32>
    %44 = arith.addf %41, %43 : vector<64x96xf32>
    %c0_58 = arith.constant 0 : index
    %c0_59 = arith.constant 0 : index
    %c0_60 = arith.constant 0 : index
    %45 = vector.load %arg9[%c0_58, %c0_59, %c0_60] : memref<1x64x384xf32, #tpu.memory_space<vmem>>, vector<1x64x96xf32>
    %46 = vector.shape_cast %45 : vector<1x64x96xf32> to vector<64x96xf32>
    %47 = vector.shape_cast %44 : vector<64x96xf32> to vector<1x64x96xf32>
    tpu.vector_store %arg9[%c0_58, %c0_59, %c0_60], %47 {strides = array<i32>} : memref<1x64x384xf32, #tpu.memory_space<vmem>>, vector<1x64x96xf32>,
    %48 = vector.extract_strided_slice %6 {offsets = [0, 256], sizes = [64, 128], strides = [1, 1]} : vector<64x384xf32> to vector<64x128xf32>
    %49 = vector.shape_cast %48 : vector<64x128xf32> to vector<8x8x128xf32>
    %c1_61 = arith.constant 1 : index
    %c1_62 = arith.constant 1 : index
    %c0_63 = arith.constant 0 : index
    %50 = vector.load %arg11[%c1_61, %c1_62, %c0_63] : memref<10x16x128xf32, #tpu.memory_space<vmem>>, vector<8x8x128xf32>
    tpu.vector_store %arg11[%c1_61, %c1_62, %c0_63], %49 {strides = array<i32>} : memref<10x16x128xf32, #tpu.memory_space<vmem>>, vector<8x8x128xf32>,
    %c0_64 = arith.constant 0 : index
    %c0_65 = arith.constant 0 : index
    %c0_66 = arith.constant 0 : index
    %51 = vector.load %arg11[%c0_64, %c0_65, %c0_66] : memref<10x16x128xf32, #tpu.memory_space<vmem>>, vector<8x8x128xf32>
    %52 = vector.shape_cast %51 : vector<8x8x128xf32> to vector<64x128xf32>
    %c0_67 = arith.constant 0 : index
    %c0_68 = arith.constant 0 : index
    %c0_69 = arith.constant 0 : index
    %53 = vector.load %arg5[%c0_67, %c0_68, %c0_69] : memref<9x128x224xf32, #tpu.memory_space<vmem>>, vector<1x128x224xf32>
    %54 = vector.shape_cast %53 : vector<1x128x224xf32> to vector<128x224xf32>
    %cst_70 = arith.constant dense<0.000000e+00> : vector<64x224xf32>
    %55 = tpu.matmul %52, %54, %cst_70 {dimension_numbers = #tpu.dot_dimension_numbers<[1], [0], [0], [1], [0, 0, 1, 1], [], []>} : vector<64x128xf32>, vector<128x224xf32>, vector<64x224xf32> -> vector<64x224xf32>
    %c0_71 = arith.constant 0 : index
    %c1_72 = arith.constant 1 : index
    %c0_73 = arith.constant 0 : index
    %56 = vector.load %arg11[%c0_71, %c1_72, %c0_73] : memref<10x16x128xf32, #tpu.memory_space<vmem>>, vector<8x8x128xf32>
    %57 = vector.shape_cast %56 : vector<8x8x128xf32> to vector<64x128xf32>
    %c1_74 = arith.constant 1 : index
    %c0_75 = arith.constant 0 : index
    %c0_76 = arith.constant 0 : index
    %58 = vector.load %arg5[%c1_74, %c0_75, %c0_76] : memref<9x128x224xf32, #tpu.memory_space<vmem>>, vector<1x128x224xf32>
    %59 = vector.shape_cast %58 : vector<1x128x224xf32> to vector<128x224xf32>
    %cst_77 = arith.constant dense<0.000000e+00> : vector<64x224xf32>
    %60 = tpu.matmul %57, %59, %cst_77 {dimension_numbers = #tpu.dot_dimension_numbers<[1], [0], [0], [1], [0, 0, 1, 1], [], []>} : vector<64x128xf32>, vector<128x224xf32>, vector<64x224xf32> -> vector<64x224xf32>
    %61 = arith.addf %55, %60 : vector<64x224xf32>
    %c0_78 = arith.constant 0 : index
    %c2_79 = arith.constant 2 : index
    %c0_80 = arith.constant 0 : index
    %62 = vector.load %arg11[%c0_78, %c2_79, %c0_80] : memref<10x16x128xf32, #tpu.memory_space<vmem>>, vector<8x8x128xf32>
    %63 = vector.shape_cast %62 : vector<8x8x128xf32> to vector<64x128xf32>
    %c2_81 = arith.constant 2 : index
    %c0_82 = arith.constant 0 : index
    %c0_83 = arith.constant 0 : index
    %64 = vector.load %arg5[%c2_81, %c0_82, %c0_83] : memref<9x128x224xf32, #tpu.memory_space<vmem>>, vector<1x128x224xf32>
    %65 = vector.shape_cast %64 : vector<1x128x224xf32> to vector<128x224xf32>
    %cst_84 = arith.constant dense<0.000000e+00> : vector<64x224xf32>
    %66 = tpu.matmul %63, %65, %cst_84 {dimension_numbers = #tpu.dot_dimension_numbers<[1], [0], [0], [1], [0, 0, 1, 1], [], []>} : vector<64x128xf32>, vector<128x224xf32>, vector<64x224xf32> -> vector<64x224xf32>
    %67 = arith.addf %61, %66 : vector<64x224xf32>
    %c1_85 = arith.constant 1 : index
    %c0_86 = arith.constant 0 : index
    %c0_87 = arith.constant 0 : index
    %68 = vector.load %arg11[%c1_85, %c0_86, %c0_87] : memref<10x16x128xf32, #tpu.memory_space<vmem>>, vector<8x8x128xf32>
    %69 = vector.shape_cast %68 : vector<8x8x128xf32> to vector<64x128xf32>
    %c3 = arith.constant 3 : index
    %c0_88 = arith.constant 0 : index
    %c0_89 = arith.constant 0 : index
    %70 = vector.load %arg5[%c3, %c0_88, %c0_89] : memref<9x128x224xf32, #tpu.memory_space<vmem>>, vector<1x128x224xf32>
    %71 = vector.shape_cast %70 : vector<1x128x224xf32> to vector<128x224xf32>
    %cst_90 = arith.constant dense<0.000000e+00> : vector<64x224xf32>
    %72 = tpu.matmul %69, %71, %cst_90 {dimension_numbers = #tpu.dot_dimension_numbers<[1], [0], [0], [1], [0, 0, 1, 1], [], []>} : vector<64x128xf32>, vector<128x224xf32>, vector<64x224xf32> -> vector<64x224xf32>
    %73 = arith.addf %67, %72 : vector<64x224xf32>
    %c1_91 = arith.constant 1 : index
    %c1_92 = arith.constant 1 : index
    %c0_93 = arith.constant 0 : index
    %74 = vector.load %arg11[%c1_91, %c1_92, %c0_93] : memref<10x16x128xf32, #tpu.memory_space<vmem>>, vector<8x8x128xf32>
    %75 = vector.shape_cast %74 : vector<8x8x128xf32> to vector<64x128xf32>
    %c4 = arith.constant 4 : index
    %c0_94 = arith.constant 0 : index
    %c0_95 = arith.constant 0 : index
    %76 = vector.load %arg5[%c4, %c0_94, %c0_95] : memref<9x128x224xf32, #tpu.memory_space<vmem>>, vector<1x128x224xf32>
    %77 = vector.shape_cast %76 : vector<1x128x224xf32> to vector<128x224xf32>
    %cst_96 = arith.constant dense<0.000000e+00> : vector<64x224xf32>
    %78 = tpu.matmul %75, %77, %cst_96 {dimension_numbers = #tpu.dot_dimension_numbers<[1], [0], [0], [1], [0, 0, 1, 1], [], []>} : vector<64x128xf32>, vector<128x224xf32>, vector<64x224xf32> -> vector<64x224xf32>
    %79 = arith.addf %73, %78 : vector<64x224xf32>
    %c1_97 = arith.constant 1 : index
    %c2_98 = arith.constant 2 : index
    %c0_99 = arith.constant 0 : index
    %80 = vector.load %arg11[%c1_97, %c2_98, %c0_99] : memref<10x16x128xf32, #tpu.memory_space<vmem>>, vector<8x8x128xf32>
    %81 = vector.shape_cast %80 : vector<8x8x128xf32> to vector<64x128xf32>
    %c5 = arith.constant 5 : index
    %c0_100 = arith.constant 0 : index
    %c0_101 = arith.constant 0 : index
    %82 = vector.load %arg5[%c5, %c0_100, %c0_101] : memref<9x128x224xf32, #tpu.memory_space<vmem>>, vector<1x128x224xf32>
    %83 = vector.shape_cast %82 : vector<1x128x224xf32> to vector<128x224xf32>
    %cst_102 = arith.constant dense<0.000000e+00> : vector<64x224xf32>
    %84 = tpu.matmul %81, %83, %cst_102 {dimension_numbers = #tpu.dot_dimension_numbers<[1], [0], [0], [1], [0, 0, 1, 1], [], []>} : vector<64x128xf32>, vector<128x224xf32>, vector<64x224xf32> -> vector<64x224xf32>
    %85 = arith.addf %79, %84 : vector<64x224xf32>
    %c2_103 = arith.constant 2 : index
    %c0_104 = arith.constant 0 : index
    %c0_105 = arith.constant 0 : index
    %86 = vector.load %arg11[%c2_103, %c0_104, %c0_105] : memref<10x16x128xf32, #tpu.memory_space<vmem>>, vector<8x8x128xf32>
    %87 = vector.shape_cast %86 : vector<8x8x128xf32> to vector<64x128xf32>
    %c6 = arith.constant 6 : index
    %c0_106 = arith.constant 0 : index
    %c0_107 = arith.constant 0 : index
    %88 = vector.load %arg5[%c6, %c0_106, %c0_107] : memref<9x128x224xf32, #tpu.memory_space<vmem>>, vector<1x128x224xf32>
    %89 = vector.shape_cast %88 : vector<1x128x224xf32> to vector<128x224xf32>
    %cst_108 = arith.constant dense<0.000000e+00> : vector<64x224xf32>
    %90 = tpu.matmul %87, %89, %cst_108 {dimension_numbers = #tpu.dot_dimension_numbers<[1], [0], [0], [1], [0, 0, 1, 1], [], []>} : vector<64x128xf32>, vector<128x224xf32>, vector<64x224xf32> -> vector<64x224xf32>
    %91 = arith.addf %85, %90 : vector<64x224xf32>
    %c2_109 = arith.constant 2 : index
    %c1_110 = arith.constant 1 : index
    %c0_111 = arith.constant 0 : index
    %92 = vector.load %arg11[%c2_109, %c1_110, %c0_111] : memref<10x16x128xf32, #tpu.memory_space<vmem>>, vector<8x8x128xf32>
    %93 = vector.shape_cast %92 : vector<8x8x128xf32> to vector<64x128xf32>
    %c7 = arith.constant 7 : index
    %c0_112 = arith.constant 0 : index
    %c0_113 = arith.constant 0 : index
    %94 = vector.load %arg5[%c7, %c0_112, %c0_113] : memref<9x128x224xf32, #tpu.memory_space<vmem>>, vector<1x128x224xf32>
    %95 = vector.shape_cast %94 : vector<1x128x224xf32> to vector<128x224xf32>
    %cst_114 = arith.constant dense<0.000000e+00> : vector<64x224xf32>
    %96 = tpu.matmul %93, %95, %cst_114 {dimension_numbers = #tpu.dot_dimension_numbers<[1], [0], [0], [1], [0, 0, 1, 1], [], []>} : vector<64x128xf32>, vector<128x224xf32>, vector<64x224xf32> -> vector<64x224xf32>
    %97 = arith.addf %91, %96 : vector<64x224xf32>
    %c2_115 = arith.constant 2 : index
    %c2_116 = arith.constant 2 : index
    %c0_117 = arith.constant 0 : index
    %98 = vector.load %arg11[%c2_115, %c2_116, %c0_117] : memref<10x16x128xf32, #tpu.memory_space<vmem>>, vector<8x8x128xf32>
    %99 = vector.shape_cast %98 : vector<8x8x128xf32> to vector<64x128xf32>
    %c8 = arith.constant 8 : index
    %c0_118 = arith.constant 0 : index
    %c0_119 = arith.constant 0 : index
    %100 = vector.load %arg5[%c8, %c0_118, %c0_119] : memref<9x128x224xf32, #tpu.memory_space<vmem>>, vector<1x128x224xf32>
    %101 = vector.shape_cast %100 : vector<1x128x224xf32> to vector<128x224xf32>
    %cst_120 = arith.constant dense<0.000000e+00> : vector<64x224xf32>
    %102 = tpu.matmul %99, %101, %cst_120 {dimension_numbers = #tpu.dot_dimension_numbers<[1], [0], [0], [1], [0, 0, 1, 1], [], []>} : vector<64x128xf32>, vector<128x224xf32>, vector<64x224xf32> -> vector<64x224xf32>
    %103 = arith.addf %97, %102 : vector<64x224xf32>
    %c0_121 = arith.constant 0 : index
    %c0_122 = arith.constant 0 : index
    %104 = vector.load %arg6[%c0_121, %c0_122] : memref<1x224xf32, #tpu.memory_space<vmem>>, vector<1x224xf32>
    %105 = vector.broadcast %104 : vector<1x224xf32> to vector<64x224xf32>
    %106 = arith.addf %103, %105 : vector<64x224xf32>
    %107 = vector.extract_strided_slice %106 {offsets = [0, 128], sizes = [64, 96], strides = [1, 1]} : vector<64x224xf32> to vector<64x96xf32>
    %c0_123 = arith.constant 0 : index
    %c0_124 = arith.constant 0 : index
    %c192 = arith.constant 192 : index
    %108 = vector.load %arg9[%c0_123, %c0_124, %c192] : memref<1x64x384xf32, #tpu.memory_space<vmem>>, vector<1x64x96xf32>
    %109 = vector.shape_cast %108 : vector<1x64x96xf32> to vector<64x96xf32>
    %110 = vector.shape_cast %107 : vector<64x96xf32> to vector<1x64x96xf32>
    tpu.vector_store %arg9[%c0_123, %c0_124, %c192], %110 {strides = array<i32>} : memref<1x64x384xf32, #tpu.memory_space<vmem>>, vector<1x64x96xf32>,
    %111 = vector.extract_strided_slice %106 {offsets = [0, 0], sizes = [64, 128], strides = [1, 1]} : vector<64x224xf32> to vector<64x128xf32>
    %112 = vector.shape_cast %111 : vector<64x128xf32> to vector<8x8x128xf32>
    %c1_125 = arith.constant 1 : index
    %c1_126 = arith.constant 1 : index
    %c0_127 = arith.constant 0 : index
    %113 = vector.load %arg12[%c1_125, %c1_126, %c0_127] : memref<10x16x128xf32, #tpu.memory_space<vmem>>, vector<8x8x128xf32>
    tpu.vector_store %arg12[%c1_125, %c1_126, %c0_127], %112 {strides = array<i32>} : memref<10x16x128xf32, #tpu.memory_space<vmem>>, vector<8x8x128xf32>,
    %c0_128 = arith.constant 0 : index
    %c0_129 = arith.constant 0 : index
    %c0_130 = arith.constant 0 : index
    %114 = vector.load %arg12[%c0_128, %c0_129, %c0_130] : memref<10x16x128xf32, #tpu.memory_space<vmem>>, vector<8x8x128xf32>
    %115 = vector.shape_cast %114 : vector<8x8x128xf32> to vector<64x128xf32>
    %c0_131 = arith.constant 0 : index
    %c0_132 = arith.constant 0 : index
    %c0_133 = arith.constant 0 : index
    %116 = vector.load %arg7[%c0_131, %c0_132, %c0_133] : memref<9x128x96xf32, #tpu.memory_space<vmem>>, vector<1x128x96xf32>
    %117 = vector.shape_cast %116 : vector<1x128x96xf32> to vector<128x96xf32>
    %cst_134 = arith.constant dense<0.000000e+00> : vector<64x96xf32>
    %118 = tpu.matmul %115, %117, %cst_134 {dimension_numbers = #tpu.dot_dimension_numbers<[1], [0], [0], [1], [0, 0, 1, 1], [], []>} : vector<64x128xf32>, vector<128x96xf32>, vector<64x96xf32> -> vector<64x96xf32>
    %c0_135 = arith.constant 0 : index
    %c1_136 = arith.constant 1 : index
    %c0_137 = arith.constant 0 : index
    %119 = vector.load %arg12[%c0_135, %c1_136, %c0_137] : memref<10x16x128xf32, #tpu.memory_space<vmem>>, vector<8x8x128xf32>
    %120 = vector.shape_cast %119 : vector<8x8x128xf32> to vector<64x128xf32>
    %c1_138 = arith.constant 1 : index
    %c0_139 = arith.constant 0 : index
    %c0_140 = arith.constant 0 : index
    %121 = vector.load %arg7[%c1_138, %c0_139, %c0_140] : memref<9x128x96xf32, #tpu.memory_space<vmem>>, vector<1x128x96xf32>
    %122 = vector.shape_cast %121 : vector<1x128x96xf32> to vector<128x96xf32>
    %cst_141 = arith.constant dense<0.000000e+00> : vector<64x96xf32>
    %123 = tpu.matmul %120, %122, %cst_141 {dimension_numbers = #tpu.dot_dimension_numbers<[1], [0], [0], [1], [0, 0, 1, 1], [], []>} : vector<64x128xf32>, vector<128x96xf32>, vector<64x96xf32> -> vector<64x96xf32>
    %124 = arith.addf %118, %123 : vector<64x96xf32>
    %c0_142 = arith.constant 0 : index
    %c2_143 = arith.constant 2 : index
    %c0_144 = arith.constant 0 : index
    %125 = vector.load %arg12[%c0_142, %c2_143, %c0_144] : memref<10x16x128xf32, #tpu.memory_space<vmem>>, vector<8x8x128xf32>
    %126 = vector.shape_cast %125 : vector<8x8x128xf32> to vector<64x128xf32>
    %c2_145 = arith.constant 2 : index
    %c0_146 = arith.constant 0 : index
    %c0_147 = arith.constant 0 : index
    %127 = vector.load %arg7[%c2_145, %c0_146, %c0_147] : memref<9x128x96xf32, #tpu.memory_space<vmem>>, vector<1x128x96xf32>
    %128 = vector.shape_cast %127 : vector<1x128x96xf32> to vector<128x96xf32>
    %cst_148 = arith.constant dense<0.000000e+00> : vector<64x96xf32>
    %129 = tpu.matmul %126, %128, %cst_148 {dimension_numbers = #tpu.dot_dimension_numbers<[1], [0], [0], [1], [0, 0, 1, 1], [], []>} : vector<64x128xf32>, vector<128x96xf32>, vector<64x96xf32> -> vector<64x96xf32>
    %130 = arith.addf %124, %129 : vector<64x96xf32>
    %c1_149 = arith.constant 1 : index
    %c0_150 = arith.constant 0 : index
    %c0_151 = arith.constant 0 : index
    %131 = vector.load %arg12[%c1_149, %c0_150, %c0_151] : memref<10x16x128xf32, #tpu.memory_space<vmem>>, vector<8x8x128xf32>
    %132 = vector.shape_cast %131 : vector<8x8x128xf32> to vector<64x128xf32>
    %c3_152 = arith.constant 3 : index
    %c0_153 = arith.constant 0 : index
    %c0_154 = arith.constant 0 : index
    %133 = vector.load %arg7[%c3_152, %c0_153, %c0_154] : memref<9x128x96xf32, #tpu.memory_space<vmem>>, vector<1x128x96xf32>
    %134 = vector.shape_cast %133 : vector<1x128x96xf32> to vector<128x96xf32>
    %cst_155 = arith.constant dense<0.000000e+00> : vector<64x96xf32>
    %135 = tpu.matmul %132, %134, %cst_155 {dimension_numbers = #tpu.dot_dimension_numbers<[1], [0], [0], [1], [0, 0, 1, 1], [], []>} : vector<64x128xf32>, vector<128x96xf32>, vector<64x96xf32> -> vector<64x96xf32>
    %136 = arith.addf %130, %135 : vector<64x96xf32>
    %c1_156 = arith.constant 1 : index
    %c1_157 = arith.constant 1 : index
    %c0_158 = arith.constant 0 : index
    %137 = vector.load %arg12[%c1_156, %c1_157, %c0_158] : memref<10x16x128xf32, #tpu.memory_space<vmem>>, vector<8x8x128xf32>
    %138 = vector.shape_cast %137 : vector<8x8x128xf32> to vector<64x128xf32>
    %c4_159 = arith.constant 4 : index
    %c0_160 = arith.constant 0 : index
    %c0_161 = arith.constant 0 : index
    %139 = vector.load %arg7[%c4_159, %c0_160, %c0_161] : memref<9x128x96xf32, #tpu.memory_space<vmem>>, vector<1x128x96xf32>
    %140 = vector.shape_cast %139 : vector<1x128x96xf32> to vector<128x96xf32>
    %cst_162 = arith.constant dense<0.000000e+00> : vector<64x96xf32>
    %141 = tpu.matmul %138, %140, %cst_162 {dimension_numbers = #tpu.dot_dimension_numbers<[1], [0], [0], [1], [0, 0, 1, 1], [], []>} : vector<64x128xf32>, vector<128x96xf32>, vector<64x96xf32> -> vector<64x96xf32>
    %142 = arith.addf %136, %141 : vector<64x96xf32>
    %c1_163 = arith.constant 1 : index
    %c2_164 = arith.constant 2 : index
    %c0_165 = arith.constant 0 : index
    %143 = vector.load %arg12[%c1_163, %c2_164, %c0_165] : memref<10x16x128xf32, #tpu.memory_space<vmem>>, vector<8x8x128xf32>
    %144 = vector.shape_cast %143 : vector<8x8x128xf32> to vector<64x128xf32>
    %c5_166 = arith.constant 5 : index
    %c0_167 = arith.constant 0 : index
    %c0_168 = arith.constant 0 : index
    %145 = vector.load %arg7[%c5_166, %c0_167, %c0_168] : memref<9x128x96xf32, #tpu.memory_space<vmem>>, vector<1x128x96xf32>
    %146 = vector.shape_cast %145 : vector<1x128x96xf32> to vector<128x96xf32>
    %cst_169 = arith.constant dense<0.000000e+00> : vector<64x96xf32>
    %147 = tpu.matmul %144, %146, %cst_169 {dimension_numbers = #tpu.dot_dimension_numbers<[1], [0], [0], [1], [0, 0, 1, 1], [], []>} : vector<64x128xf32>, vector<128x96xf32>, vector<64x96xf32> -> vector<64x96xf32>
    %148 = arith.addf %142, %147 : vector<64x96xf32>
    %c2_170 = arith.constant 2 : index
    %c0_171 = arith.constant 0 : index
    %c0_172 = arith.constant 0 : index
    %149 = vector.load %arg12[%c2_170, %c0_171, %c0_172] : memref<10x16x128xf32, #tpu.memory_space<vmem>>, vector<8x8x128xf32>
    %150 = vector.shape_cast %149 : vector<8x8x128xf32> to vector<64x128xf32>
    %c6_173 = arith.constant 6 : index
    %c0_174 = arith.constant 0 : index
    %c0_175 = arith.constant 0 : index
    %151 = vector.load %arg7[%c6_173, %c0_174, %c0_175] : memref<9x128x96xf32, #tpu.memory_space<vmem>>, vector<1x128x96xf32>
    %152 = vector.shape_cast %151 : vector<1x128x96xf32> to vector<128x96xf32>
    %cst_176 = arith.constant dense<0.000000e+00> : vector<64x96xf32>
    %153 = tpu.matmul %150, %152, %cst_176 {dimension_numbers = #tpu.dot_dimension_numbers<[1], [0], [0], [1], [0, 0, 1, 1], [], []>} : vector<64x128xf32>, vector<128x96xf32>, vector<64x96xf32> -> vector<64x96xf32>
    %154 = arith.addf %148, %153 : vector<64x96xf32>
    %c2_177 = arith.constant 2 : index
    %c1_178 = arith.constant 1 : index
    %c0_179 = arith.constant 0 : index
    %155 = vector.load %arg12[%c2_177, %c1_178, %c0_179] : memref<10x16x128xf32, #tpu.memory_space<vmem>>, vector<8x8x128xf32>
    %156 = vector.shape_cast %155 : vector<8x8x128xf32> to vector<64x128xf32>
    %c7_180 = arith.constant 7 : index
    %c0_181 = arith.constant 0 : index
    %c0_182 = arith.constant 0 : index
    %157 = vector.load %arg7[%c7_180, %c0_181, %c0_182] : memref<9x128x96xf32, #tpu.memory_space<vmem>>, vector<1x128x96xf32>
    %158 = vector.shape_cast %157 : vector<1x128x96xf32> to vector<128x96xf32>
    %cst_183 = arith.constant dense<0.000000e+00> : vector<64x96xf32>
    %159 = tpu.matmul %156, %158, %cst_183 {dimension_numbers = #tpu.dot_dimension_numbers<[1], [0], [0], [1], [0, 0, 1, 1], [], []>} : vector<64x128xf32>, vector<128x96xf32>, vector<64x96xf32> -> vector<64x96xf32>
    %160 = arith.addf %154, %159 : vector<64x96xf32>
    %c2_184 = arith.constant 2 : index
    %c2_185 = arith.constant 2 : index
    %c0_186 = arith.constant 0 : index
    %161 = vector.load %arg12[%c2_184, %c2_185, %c0_186] : memref<10x16x128xf32, #tpu.memory_space<vmem>>, vector<8x8x128xf32>
    %162 = vector.shape_cast %161 : vector<8x8x128xf32> to vector<64x128xf32>
    %c8_187 = arith.constant 8 : index
    %c0_188 = arith.constant 0 : index
    %c0_189 = arith.constant 0 : index
    %163 = vector.load %arg7[%c8_187, %c0_188, %c0_189] : memref<9x128x96xf32, #tpu.memory_space<vmem>>, vector<1x128x96xf32>
    %164 = vector.shape_cast %163 : vector<1x128x96xf32> to vector<128x96xf32>
    %cst_190 = arith.constant dense<0.000000e+00> : vector<64x96xf32>
    %165 = tpu.matmul %162, %164, %cst_190 {dimension_numbers = #tpu.dot_dimension_numbers<[1], [0], [0], [1], [0, 0, 1, 1], [], []>} : vector<64x128xf32>, vector<128x96xf32>, vector<64x96xf32> -> vector<64x96xf32>
    %166 = arith.addf %160, %165 : vector<64x96xf32>
    %c0_191 = arith.constant 0 : index
    %c0_192 = arith.constant 0 : index
    %167 = vector.load %arg8[%c0_191, %c0_192] : memref<1x96xf32, #tpu.memory_space<vmem>>, vector<1x96xf32>
    %168 = vector.broadcast %167 : vector<1x96xf32> to vector<64x96xf32>
    %169 = arith.addf %166, %168 : vector<64x96xf32>
    %c0_193 = arith.constant 0 : index
    %c0_194 = arith.constant 0 : index
    %c288 = arith.constant 288 : index
    %170 = vector.load %arg9[%c0_193, %c0_194, %c288] : memref<1x64x384xf32, #tpu.memory_space<vmem>>, vector<1x64x96xf32>
    %171 = vector.shape_cast %170 : vector<1x64x96xf32> to vector<64x96xf32>
    %172 = vector.shape_cast %169 : vector<64x96xf32> to vector<1x64x96xf32>
    tpu.vector_store %arg9[%c0_193, %c0_194, %c288], %172 {strides = array<i32>} : memref<1x64x384xf32, #tpu.memory_space<vmem>>, vector<1x64x96xf32>,
    return
  }
  func.func @transform_0(%arg0: i32) -> (i32, i32, i32) {
    %c0_i32 = arith.constant 0 : i32
    %c0_i32_0 = arith.constant 0 : i32
    %c0_i32_1 = arith.constant 0 : i32
    return %arg0, %c0_i32, %c0_i32_0 : i32, i32, i32
  }
  func.func @transform_1(%arg0: i32) -> (i32, i32) {
    %c0_i32 = arith.constant 0 : i32
    %c0_i32_0 = arith.constant 0 : i32
    %c0_i32_1 = arith.constant 0 : i32
    return %c0_i32, %c0_i32_0 : i32, i32
  }
  func.func @transform_2(%arg0: i32) -> (i32, i32) {
    %c0_i32 = arith.constant 0 : i32
    %c0_i32_0 = arith.constant 0 : i32
    %c0_i32_1 = arith.constant 0 : i32
    return %c0_i32, %c0_i32_0 : i32, i32
  }
  func.func @transform_3(%arg0: i32) -> (i32, i32) {
    %c0_i32 = arith.constant 0 : i32
    %c0_i32_0 = arith.constant 0 : i32
    %c0_i32_1 = arith.constant 0 : i32
    return %c0_i32, %c0_i32_0 : i32, i32
  }
  func.func @transform_4(%arg0: i32) -> (i32, i32, i32) {
    %c0_i32 = arith.constant 0 : i32
    %c0_i32_0 = arith.constant 0 : i32
    %c0_i32_1 = arith.constant 0 : i32
    %c0_i32_2 = arith.constant 0 : i32
    return %c0_i32, %c0_i32_0, %c0_i32_1 : i32, i32, i32
  }
  func.func @transform_5(%arg0: i32) -> (i32, i32) {
    %c0_i32 = arith.constant 0 : i32
    %c0_i32_0 = arith.constant 0 : i32
    %c0_i32_1 = arith.constant 0 : i32
    return %c0_i32, %c0_i32_0 : i32, i32
  }
  func.func @transform_6(%arg0: i32) -> (i32, i32, i32) {
    %c0_i32 = arith.constant 0 : i32
    %c0_i32_0 = arith.constant 0 : i32
    %c0_i32_1 = arith.constant 0 : i32
    %c0_i32_2 = arith.constant 0 : i32
    return %c0_i32, %c0_i32_0, %c0_i32_1 : i32, i32, i32
  }
  func.func @transform_7(%arg0: i32) -> (i32, i32) {
    %c0_i32 = arith.constant 0 : i32
    %c0_i32_0 = arith.constant 0 : i32
    %c0_i32_1 = arith.constant 0 : i32
    return %c0_i32, %c0_i32_0 : i32, i32
  }
  func.func @transform_8(%arg0: i32) -> (i32, i32, i32) {
    %c0_i32 = arith.constant 0 : i32
    %c0_i32_0 = arith.constant 0 : i32
    %c0_i32_1 = arith.constant 0 : i32
    return %arg0, %c0_i32, %c0_i32_0 : i32, i32, i32
  }
}

</mosaic_0001>

<bundles_post_ra>
// kernel: inception_a.1
= control target key start
LH: loop header
LB: loop body
LE: loop exit
PB: predicated region body
PF: predicated region fallthrough
CT: control target
= control target key end

     0   :  { %13 = vsyncpa [#allocation6], 0  ;;  %s8962_s0 = inlined_call_operand.vmem [shape: f32[2,64,384], index: 0, kind: input, shape index: {}]   ;;  %s8963_s1 = inlined_call_operand.vmem [shape: f32[384,384], index: 1, kind: input, shape index: {}]   ;;  %s8964_s2 = inlined_call_operand.vmem [shape: f32[1,384], index: 2, kind: input, shape index: {}]   ;;  %s8965_s3 = inlined_call_operand.vmem [shape: f32[1,96], index: 3, kind: input, shape index: {}]   ;;  %s8966_s4 = inlined_call_operand.vmem [shape: f32[9,128,224], index: 4, kind: input, shape index: {}]   ;;  %s8967_s5 = inlined_call_operand.vmem [shape: f32[1,224], index: 5, kind: input, shape index: {}]   ;;  %s8968_s6 = inlined_call_operand.vmem [shape: f32[9,128,96], index: 6, kind: input, shape index: {}]   ;;  %s8969_s7 = inlined_call_operand.vmem [shape: f32[1,96], index: 7, kind: input, shape index: {}]   ;;  %s8970_s8 = inlined_call_operand.hbm [shape: f32[2,64,384], index: 8, kind: output, shape index: {}]  }
   0x1   :  { %15 = vsyncpa [#allocation6 + $0x1], 0  ;;  %s6515_s27 = smov 0   ;;  %s6517_s28 = smov 0  }
   0x2   :  { %s6519_s29 = smov 0   ;;  %s6521_s30 = smov 0  }
   0x3 LB: > { %s6536_s9 = sadd.s32 4294967295, %s6461_s30   ;;  %s4210_s10 = sadd.s32 4294967294, %s6461_s30   ;;  %s6461_s30 = sphi %s6521_s30, %s8976_s30   ;;  %s6457_s29 = sphi %s6519_s29, %s8975_s29   ;;  %s6453_s28 = sphi %s6517_s28, %s8974_s28   ;;  %s6449_s27 = sphi %s6515_s27, %s8973_s27  }
   0x4   : > { %s6540_s11 = sadd.s32 1, %s6461_s30   ;;  %s201_s12 = sadd.s32 1, %s6457_s29 }
   0x5   : > { %s198_s13 = ssub.s32 %s6461_s30, %s6540_s11  ;;  %p211_p0 = scmp.ne.s32.totalorder %s6457_s29, %s6453_s28 }
   0x6   : > { %p199_p1 = scmp.eq.s32.totalorder %s198_s13, 0  ;;  %p212_p2 = scmp.eq.s32.totalorder %s6536_s9, 1 }
   0x7   : > { %p217_p3 = scmp.ne.s32.totalorder %s6453_s28, %s6449_s27  ;;  %p218_p4 = scmp.eq.s32.totalorder %s4210_s10, 1 }
   0x8   : > { %s6551_s14 = scalar_select %p199_p1, %s6457_s29, %s201_s12  }
   0x9   : > { %p6553_p5 = por %p212_p2, %p211_p0  ;;  %p6557_p6 = por %p218_p4, %p217_p3 }
   0xa   : > { %p4213_p7 = scmp.ge.s32.totalorder %s6461_s30, 1  ;;  %p265_p8 = scmp.lt.s32.totalorder %s6461_s30, 3 }
   0xc   : > { %p266_p9 = pnand %p4213_p7, %p265_p8 }
   0xd   : > { %v378_v0 = vld [vmem:[%s8963_s1 + $0x190] sm:$0xff] (!%p266_p9)  ;;  %v381_v1 = vld [vmem:[%s8963_s1 + $0x1a8] sm:$0xff] (!%p266_p9)  ;;  %p299_p10 = scmp.lt.s32.totalorder (!%p266_p9), %s6536_s9, 1  ;;  %v384_v5 = vld [vmem:[%s8963_s1 + $0x1c0] sm:$0xff] (!%p266_p9)  ;;  %s6464_s13 = smov (!%p266_p9), 96   ;;  %vm1023_vm0 = vcmask (!%p266_p9), 1048320  }
   0xe   : > { %269 = sbr.rel (%p266_p9) target bundleno = 1370 (0x55a), region = 52  ;;  %v330_v2 = vld [vmem:[%s8963_s1 + $0x10] sm:$0xff] (!%p266_p9)  ;;  %v5436_v3 = vpack.c.bf16 (!%p266_p9), %v381_v1, %v378_v0  ;;  %v333_v4 = vld [vmem:[%s8963_s1 + $0x28] sm:$0xff] (!%p266_p9)  ;;  %v387_v6 = vld [vmem:[%s8963_s1 + $0x1d8] sm:$0xff] (!%p266_p9)  ;;  %vm1025_vm1 = vcmask (!%p266_p9), 523264   ;;  %vm1146_vm2 = vcmask (!%p266_p9), 1046528  }
   0xf   : > { %v5438_v7 = vpack.c.bf16 (!%p266_p9), %v333_v4, %v330_v2  ;;  %v5440_v8 = vpack.c.bf16 (!%p266_p9), %v387_v6, %v384_v5  ;;  %v336_v9 = vld [vmem:[%s8963_s1 + $0x40] sm:$0xff] (!%p266_p9)  ;;  %v339_v10 = vld [vmem:[%s8963_s1 + $0x58] sm:$0xff] (!%p266_p9)  ;;  %v390_v11 = vld [vmem:[%s8963_s1 + $0x1f0] sm:$0xff] (!%p266_p9)  ;;  %vm1187_vm3 = vcmask (!%p266_p9), 1045504   ;;  %vm1251_vm4 = vcmask (!%p266_p9), 785408   ;;  %s6465_s10 = smov (!%p266_p9), 64  }
  0x10   : > { %5437 = vmatprep.subr.bf16.mxu1 (!%p266_p9), %v5436_v3  ;;  %v393_v12 = vld [vmem:[%s8963_s1 + $0x208] sm:$0xff] (!%p266_p9)  ;;  %v5442_v13 = vpack.c.bf16 (!%p266_p9), %v339_v10, %v336_v9  ;;  %v342_v15 = vld [vmem:[%s8963_s1 + $0x70] sm:$0xff] (!%p266_p9)  ;;  %v396_v17 = vld [vmem:[%s8963_s1 + $0x220] sm:$0xff] (!%p266_p9)  ;;  %vm2826_vm5 = vcmask (!%p266_p9), 1048064   ;;  %vm2828_vm6 = vcmask (!%p266_p9), 261120   ;;  %s6466_s21 = smov (!%p266_p9), 32  }
  0x11   : > { %5439 = vmatpush3.bf16.msra.mxu1 (!%p266_p9), %v5438_v7  ;;  %v5444_v14 = vpack.c.bf16 (!%p266_p9), %v393_v12, %v390_v11  ;;  %v345_v16 = vld [vmem:[%s8963_s1 + $0x88] sm:$0xff] (!%p266_p9)  ;;  %v399_v18 = vld [vmem:[%s8963_s1 + $0x238] sm:$0xff] (!%p266_p9)  ;;  %v348_v21 = vld [vmem:[%s8963_s1 + $0xa0] sm:$0xff] (!%p266_p9)  ;;  %vm4125_vm7 = vcmask (!%p266_p9), 1047808   ;;  %s6467_s18 = smov (!%p266_p9), [#allocation5]  }
  0x12   : > { %5441 = vmatprep.subr.bf16.mxu1 (!%p266_p9), %v5440_v8  ;;  %v5446_v19 = vpack.c.bf16 (!%p266_p9), %v345_v16, %v342_v15  ;;  %v5448_v20 = vpack.c.bf16 (!%p266_p9), %v399_v18, %v396_v17  ;;  %v351_v22 = vld [vmem:[%s8963_s1 + $0xb8] sm:$0xff] (!%p266_p9)  ;;  %v402_v23 = vld [vmem:[%s8963_s1 + $0x250] sm:$0xff] (!%p266_p9)  ;;  %v405_v24 = vld [vmem:[%s8963_s1 + $0x268] sm:$0xff] (!%p266_p9) }
  0x13   : > { %v5450_v26 = vpack.c.bf16 (!%p266_p9), %v351_v22, %v348_v21  ;;  %v5452_v27 = vpack.c.bf16 (!%p266_p9), %v405_v24, %v402_v23  ;;  %v354_v28 = vld [vmem:[%s8963_s1 + $0xd0] sm:$0xff] (!%p266_p9)  ;;  %v357_v29 = vld [vmem:[%s8963_s1 + $0xe8] sm:$0xff] (!%p266_p9)  ;;  %v408_v30 = vld [vmem:[%s8963_s1 + $0x280] sm:$0xff] (!%p266_p9) }
  0x14   : > { %v411_v31 = vld [vmem:[%s8963_s1 + $0x298] sm:$0xff] (!%p266_p9)  ;;  %v5454_v32 = vpack.c.bf16 (!%p266_p9), %v357_v29, %v354_v28  ;;  %v360_v34 = vld [vmem:[%s8963_s1 + $0x100] sm:$0xff] (!%p266_p9)  ;;  %v414_v36 = vld [vmem:[%s8963_s1 + $0x2b0] sm:$0xff] (!%p266_p9) }
  0x15   : > { %s300_s22 = scalar_select %p299_p10, %s6536_s9, 1  ;;  %5443 = vmatpush3.bf16.msra.mxu1 %v5442_v13  ;;  %v5456_v33 = vpack.c.bf16 %v411_v31, %v408_v30  ;;  %v363_v35 = vld [vmem:[%s8963_s1 + $0x118] sm:$0xff]  ;;  %v417_v37 = vld [vmem:[%s8963_s1 + $0x2c8] sm:$0xff]  ;;  %v366_v40 = vld [vmem:[%s8963_s1 + $0x130] sm:$0xff] }
  0x16   : > { %5445 = vmatprep.subr.bf16.mxu1 %v5444_v14  ;;  %v5458_v38 = vpack.c.bf16 %v363_v35, %v360_v34  ;;  %v5460_v39 = vpack.c.bf16 %v417_v37, %v414_v36  ;;  %v369_v41 = vld [vmem:[%s8963_s1 + $0x148] sm:$0xff]  ;;  %v420_v42 = vld [vmem:[%s8963_s1 + $0x2e0] sm:$0xff]  ;;  %v423_v43 = vld [vmem:[%s8963_s1 + $0x2f8] sm:$0xff] }
  0x17   : > { %s6317_s25 = smul.u32 192, %s300_s22  ;;  %v5462_v44 = vpack.c.bf16 %v369_v41, %v366_v40  ;;  %v5464_v45 = vpack.c.bf16 %v423_v43, %v420_v42  ;;  %v372_v46 = vld [vmem:[%s8963_s1 + $0x160] sm:$0xff]  ;;  %v375_v47 = vld [vmem:[%s8963_s1 + $0x178] sm:$0xff]  ;;  %v426_v48 = vld [vmem:[%s8963_s1 + $0x310] sm:$0xff]  ;;  %s296_s22 = sand.u32 1, %s6453_s28  }
  0x18   : > { %v429_v49 = vld [vmem:[%s8963_s1 + $0x328] sm:$0xff]  ;;  %v5466_v50 = vpack.c.bf16 %v375_v47, %v372_v46  ;;  %v432_v52 = vld [vmem:[%s8963_s1 + $0x340] sm:$0xff]  ;;  %v435_v53 = vld [vmem:[%s8963_s1 + $0x358] sm:$0xff]  ;;  %s6316_s24 = smul.u32 192, %s296_s22 }
  0x19   : > { %s6610_s23 = scalar_lea.vmem %s8962_s0, %s6317_s25  ;;  %5447 = vmatpush3.bf16.msra.mxu1 %v5446_v19  ;;  %v5468_v51 = vpack.c.bf16 %v429_v49, %v426_v48  ;;  %v5472_v56 = vpack.c.bf16 %v435_v53, %v432_v52  ;;  %v438_v57 = vld [vmem:[%s8963_s1 + $0x370] sm:$0xff]  ;;  %v441_v58 = vld [vmem:[%s8963_s1 + $0x388] sm:$0xff]  ;;  %v444_v62 = vld [vmem:[%s8963_s1 + $0x3a0] sm:$0xff]  ;;  %s6403_s25 = sshll.u32 %s6467_s18, 4  ;;  %s6404_s25 = int_to_ptr.vmem [resolvable:$false] %s6403_s25 }
  0x1a   : > { %v305_v25 = vld [vmem:[%s6610_s23 + $0x8] sm:$0xff]  ;;  %5449 = vmatprep.subr.bf16.mxu1 %v5448_v20  ;;  %v304_v54 = vld [vmem:[%s6610_s23] sm:$0xff]  ;;  %v307_v59 = vld [vmem:[%s6610_s23 + $0x18] sm:$0xff]  ;;  %v5476_v61 = vpack.c.bf16 %v441_v58, %v438_v57  ;;  %s6405_s19 = scalar_lea.vmem %s6404_s25, 6144 }
  0x1b   : > { %779 = vmatprep.mubr.f32.mxu1 %v305_v25  ;;  %553 = vmatprep.mubr.f32.mxu0 %v305_v25  ;;  %v308_v55 = vld [vmem:[%s6610_s23 + $0x20] sm:$0xff]  ;;  %v311_v60 = vld [vmem:[%s6610_s23 + $0x38] sm:$0xff]  ;;  %v310_v0 = vld [vmem:[%s6610_s23 + $0x30] sm:$0xff] }
  0x1c   : > { %v447_v63 = vld [vmem:[%s8963_s1 + $0x3b8] sm:$0xff]  ;;  %v314_v1 = vld [vmem:[%s6610_s23 + $0x50] sm:$0xff]  ;;  %v453_v4 = vld [vmem:[%s8963_s1 + $0x3e8] sm:$0xff] }
  0x1d   : > { %5451 = vmatpush3.bf16.msra.mxu1 %v5450_v26  ;;  %v5480_v2 = vpack.c.bf16 %v447_v63, %v444_v62  ;;  %v450_v3 = vld [vmem:[%s8963_s1 + $0x3d0] sm:$0xff]  ;;  %v313_v5 = vld [vmem:[%s6610_s23 + $0x48] sm:$0xff]  ;;  %v456_v8 = vld [vmem:[%s8963_s1 + $0x400] sm:$0xff] }
  0x1e   : > { %5453 = vmatprep.subr.bf16.mxu1 %v5452_v27  ;;  %v317_v6 = vld [vmem:[%s6610_s23 + $0x68] sm:$0xff]  ;;  %v5484_v7 = vpack.c.bf16 %v453_v4, %v450_v3  ;;  %v459_v9 = vld [vmem:[%s8963_s1 + $0x418] sm:$0xff]  ;;  %v316_v10 = vld [vmem:[%s6610_s23 + $0x60] sm:$0xff] }
  0x1f   : > { %v320_v11 = vld [vmem:[%s6610_s23 + $0x80] sm:$0xff]  ;;  %v5488_v12 = vpack.c.bf16 %v459_v9, %v456_v8  ;;  %v462_v13 = vld [vmem:[%s8963_s1 + $0x430] sm:$0xff]  ;;  %v465_v14 = vld [vmem:[%s8963_s1 + $0x448] sm:$0xff] }
  0x20   : > { %v319_v15 = vld [vmem:[%s6610_s23 + $0x78] sm:$0xff]  ;;  %v5492_v17 = vpack.c.bf16 %v465_v14, %v462_v13  ;;  %v468_v18 = vld [vmem:[%s8963_s1 + $0x460] sm:$0xff]  ;;  %v322_v20 = vld [vmem:[%s6610_s23 + $0x90] sm:$0xff] }
  0x21   : > { %5455 = vmatpush3.bf16.msra.mxu1 %v5454_v32  ;;  %v323_v16 = vld [vmem:[%s6610_s23 + $0x98] sm:$0xff]  ;;  %v326_v21 = vld [vmem:[%s6610_s23 + $0xb0] sm:$0xff]  ;;  %v325_v23 = vld [vmem:[%s6610_s23 + $0xa8] sm:$0xff] }
  0x22   : > { %5457 = vmatprep.subr.bf16.mxu1 %v5456_v33  ;;  %v471_v19 = vld [vmem:[%s8963_s1 + $0x478] sm:$0xff]  ;;  %v306_v24 = vld [vmem:[%s6610_s23 + $0x10] sm:$0xff]  ;;  %v309_v25 = vld [vmem:[%s6610_s23 + $0x28] sm:$0xff] }
  0x23   : > { %v5496_v22 = vpack.c.bf16 %v471_v19, %v468_v18  ;;  %v312_v26 = vld [vmem:[%s6610_s23 + $0x40] sm:$0xff]  ;;  %v315_v27 = vld [vmem:[%s6610_s23 + $0x58] sm:$0xff]  ;;  %v318_v28 = vld [vmem:[%s6610_s23 + $0x70] sm:$0xff] }
  0x24   : > { %v321_v29 = vld [vmem:[%s6610_s23 + $0x88] sm:$0xff]  ;;  %v324_v30 = vld [vmem:[%s6610_s23 + $0xa0] sm:$0xff]  ;;  %v327_v31 = vld [vmem:[%s6610_s23 + $0xb8] sm:$0xff] }
  0x25   : > { %5459 = vmatpush3.bf16.msra.mxu1 %v5458_v38  ;;  %v4217_v32 = vld [vmem:[%s8966_s4 + $0x108] sm:$0xff]  ;;  %v4219_v33 = vld [vmem:[%s8966_s4 + $0x118] sm:$0xff]  ;;  %v4216_v35 = vld [vmem:[%s8966_s4 + $0x100] sm:$0xff] }
  0x26   : > { %5461 = vmatprep.subr.bf16.mxu1 %v5460_v39  ;;  %v5500_v34 = vpack.c.bf16 %v4219_v33, %v4217_v32  ;;  %v4218_v36 = vld [vmem:[%s8966_s4 + $0x110] sm:$0xff]  ;;  %v4221_v38 = vld [vmem:[%s8966_s4 + $0x128] sm:$0xff]  ;;  %v4223_v39 = vld [vmem:[%s8966_s4 + $0x138] sm:$0xff] }
  0x27   : > { %v5502_v37 = vpack.c.bf16 %v4218_v36, %v4216_v35  ;;  %v5504_v40 = vpack.c.bf16 %v4223_v39, %v4221_v38  ;;  %v4220_v41 = vld [vmem:[%s8966_s4 + $0x120] sm:$0xff]  ;;  %v4222_v42 = vld [vmem:[%s8966_s4 + $0x130] sm:$0xff]  ;;  %v4235_v57 = vld [vmem:[%s8966_s4 + $0x198] sm:$0xff] }
  0x28   : > { %v5506_v43 = vpack.c.bf16 %v4222_v42, %v4220_v41  ;;  %v4224_v47 = vld [vmem:[%s8966_s4 + $0x140] sm:$0xff]  ;;  %v4226_v48 = vld [vmem:[%s8966_s4 + $0x150] sm:$0xff]  ;;  %v4237_v62 = vld [vmem:[%s8966_s4 + $0x1a8] sm:$0xff] }
  0x29   : > { %5463 = vmatpush3.bf16.msra.mxu1 %v5462_v44  ;;  %v4225_v44 = vld [vmem:[%s8966_s4 + $0x148] sm:$0xff]  ;;  %v5510_v49 = vpack.c.bf16 %v4226_v48, %v4224_v47  ;;  %v4228_v53 = vld [vmem:[%s8966_s4 + $0x160] sm:$0xff]  ;;  %v4239_v63 = vld [vmem:[%s8966_s4 + $0x1b8] sm:$0xff] }
  0x2a   : > { %5465 = vmatprep.subr.bf16.mxu1 %v5464_v45  ;;  %v4227_v45 = vld [vmem:[%s8966_s4 + $0x158] sm:$0xff]  ;;  %v4241_v4 = vld [vmem:[%s8966_s4 + $0x1c8] sm:$0xff]  ;;  %v6824_v8 = vld [vmem:[%s8966_s4 + $0x1d0] sm:$0xff] }
  0x2b   : > { %v5508_v46 = vpack.c.bf16 %v4227_v45, %v4225_v44  ;;  %v4244_v14 = vld [vmem:[%s8966_s4 + $0x1e0] sm:$0xff]  ;;  %v1279_v18 = vld [vmem:[%s8966_s4 + $0x18] sm:$0xff]  ;;  %v1289_v36 = vld [vmem:[%s8966_s4 + $0x68] sm:$0xff] }
  0x2c   : > { %v1284_v33 = vld [vmem:[%s8966_s4 + $0x40] sm:$0xff]  ;;  %v1293_v42 = vld [vmem:[%s8966_s4 + $0x88] sm:$0xff] }
  0x2d   : > { %5467 = vmatpush3.bf16.msra.mxu1 %v5466_v50  ;;  %v4229_v50 = vld [vmem:[%s8966_s4 + $0x168] sm:$0xff]  ;;  %v1288_v39 = vld [vmem:[%s8966_s4 + $0x60] sm:$0xff] }
  0x2e   : > { %5469 = vmatprep.subr.bf16.mxu1 %v5468_v51  ;;  %v1292_v45 = vld [vmem:[%s8966_s4 + $0x80] sm:$0xff]  ;;  %v1297_v48 = vld [vmem:[%s8966_s4 + $0xa8] sm:$0xff] }
  0x30   : > { %780 = vmatmul.mubr.f32.vlgmr.msra.gmra.mrb[0].mxu1 %v304_v54  ;;  %v4230_v54 = vld [vmem:[%s8966_s4 + $0x170] sm:$0xff] }
  0x31   : > { %5471 = vmatpush3.bf16.msra.mxu1 %v5468_v51  ;;  %784 = vmatprep.mubr.f32.mxu1 %v308_v55  ;;  %v4231_v51 = vld [vmem:[%s8966_s4 + $0x178] sm:$0xff]  ;;  %v5514_v55 = vpack.c.bf16 %v4230_v54, %v4228_v53  ;;  %v1301_v54 = vld [vmem:[%s8966_s4 + $0xc8] sm:$0xff] }
  0x32   : > { %5473 = vmatprep.subr.bf16.mxu1 %v5472_v56  ;;  %v5512_v52 = vpack.c.bf16 %v4231_v51, %v4229_v50  ;;  %v1296_v51 = vld [vmem:[%s8966_s4 + $0xa0] sm:$0xff] }
  0x34   : > { %785 = vmatmul.mubr.f32.gmra.mrb[2].mxu1 %v307_v59  ;;  %v4232_v59 = vld [vmem:[%s8966_s4 + $0x180] sm:$0xff] }
  0x35   : > { %5475 = vmatpush3.bf16.msra.mxu1 %v5472_v56  ;;  %789 = vmatprep.mubr.f32.mxu1 %v311_v60  ;;  %v4233_v56 = vld [vmem:[%s8966_s4 + $0x188] sm:$0xff]  ;;  %v4234_v60 = vld [vmem:[%s8966_s4 + $0x190] sm:$0xff] }
  0x36   : > { %5477 = vmatprep.subr.bf16.mxu1 %v5476_v61  ;;  %v5516_v58 = vpack.c.bf16 %v4235_v57, %v4233_v56  ;;  %v1300_v57 = vld [vmem:[%s8966_s4 + $0xc0] sm:$0xff] }
  0x38   : > { %790 = vmatmul.mubr.f32.gmra.mrb[4].mxu1 %v310_v0  ;;  %v5520_v0 = vpack.c.bf16 %v4239_v63, %v4237_v62  ;;  %v1304_v63 = vld [vmem:[%s8966_s4 + $0xe0] sm:$0xff] }
  0x39   : > { %5479 = vmatpush3.bf16.msra.mxu1 %v5476_v61  ;;  %794 = vmatprep.mubr.f32.mxu1 %v314_v1  ;;  %v5518_v61 = vpack.c.bf16 %v4234_v60, %v4232_v59  ;;  %v4236_v1 = vld [vmem:[%s8966_s4 + $0x1a0] sm:$0xff]  ;;  %v1305_v60 = vld [vmem:[%s8966_s4 + $0xe8] sm:$0xff] }
  0x3a   : > { %5481 = vmatprep.subr.bf16.mxu1 %v5480_v2 }
  0x3c   : > { %795 = vmatmul.mubr.f32.gmra.mrb[6].mxu1 %v313_v5  ;;  %v4243_v5 = vld [vmem:[%s8966_s4 + $0x1d8] sm:$0xff] }
  0x3d   : > { %5483 = vmatpush3.bf16.msra.mxu1 %v5480_v2  ;;  %799 = vmatprep.mubr.f32.mxu1 %v317_v6  ;;  %v4238_v2 = vld [vmem:[%s8966_s4 + $0x1b0] sm:$0xff]  ;;  %v5524_v6 = vpack.c.bf16 %v4243_v5, %v4241_v4 }
  0x3e   : > { %5485 = vmatprep.subr.bf16.mxu1 %v5484_v7  ;;  %v5522_v3 = vpack.c.bf16 %v4238_v2, %v4236_v1  ;;  %v4249_v2 = vld [vmem:[%s8966_s4 + $0x208] sm:$0xff] }
  0x40   : > { %800 = vmatmul.mubr.f32.gmra.mrb[8].mxu1 %v316_v10  ;;  %v6463_v10 = vmov 0.0  }
  0x41   : > { %5487 = vmatpush3.bf16.msra.mxu1 %v5484_v7  ;;  %804 = vmatprep.mubr.f32.mxu1 %v320_v11  ;;  %v6819_v7 = vld [vmem:[%s8966_s4 + $0x1c0] sm:$0xff]  ;;  %925 = vst [vmem:[#allocation2] sm:$0xff] %v6463_v10  ;;  %926 = vst [vmem:[#allocation2 + $0x8] sm:$0xff] %v6463_v10  ;;  %v4245_v11 = vld [vmem:[%s8966_s4 + $0x1e8] sm:$0xff] }
  0x42   : > { %5489 = vmatprep.subr.bf16.mxu1 %v5488_v12  ;;  %v5526_v9 = vpack.c.bf16 %v6824_v8, %v6819_v7  ;;  %929 = vst [vmem:[#allocation2 + $0x98] sm:$0xff] %v6463_v10  ;;  %931 = vst [vmem:[#allocation2 + $0x10] sm:$0x1] %v6463_v10 }
  0x43   : > { %932 = vst [vmem:[#allocation2 + $0x20] sm:$0x1] %v6463_v10  ;;  %933 = vst [vmem:[#allocation2 + $0x30] sm:$0x1] %v6463_v10 }
  0x44   : > { %805 = vmatmul.mubr.f32.gmra.mrb[10].mxu1 %v319_v15  ;;  %934 = vst [vmem:[#allocation2 + $0x40] sm:$0x1] %v6463_v10  ;;  %935 = vst [vmem:[#allocation2 + $0x50] sm:$0x1] %v6463_v10  ;;  %v4246_v15 = vld [vmem:[%s8966_s4 + $0x1f0] sm:$0xff] }
  0x45   : > { %5491 = vmatpush3.bf16.msra.mxu1 %v5488_v12  ;;  %809 = vmatprep.mubr.f32.mxu1 %v323_v16  ;;  %936 = vst [vmem:[#allocation2 + $0x60] sm:$0x1] %v6463_v10  ;;  %937 = vst [vmem:[#allocation2 + $0x70] sm:$0x1] %v6463_v10  ;;  %v4247_v12 = vld [vmem:[%s8966_s4 + $0x1f8] sm:$0xff]  ;;  %v5530_v16 = vpack.c.bf16 %v4246_v15, %v4244_v14 }
  0x46   : > { %5493 = vmatprep.subr.bf16.mxu1 %v5492_v17  ;;  %938 = vst [vmem:[#allocation2 + $0x80] sm:$0x1] %v6463_v10  ;;  %939 = vst [vmem:[#allocation2 + $0x19] sm:$0x1] %v6463_v10  ;;  %v5528_v13 = vpack.c.bf16 %v4247_v12, %v4245_v11 }
  0x47   : > { %940 = vst [vmem:[#allocation2 + $0x29] sm:$0x1] %v6463_v10  ;;  %941 = vst [vmem:[#allocation2 + $0x39] sm:$0x1] %v6463_v10 }
  0x48   : > { %810 = vmatmul.mubr.f32.gmra.mrb[12].mxu1 %v322_v20  ;;  %942 = vst [vmem:[#allocation2 + $0x49] sm:$0x1] %v6463_v10  ;;  %943 = vst [vmem:[#allocation2 + $0x59] sm:$0x1] %v6463_v10  ;;  %v1276_v20 = vld [vmem:[%s8966_s4] sm:$0xff] }
  0x49   : > { %5495 = vmatpush3.bf16.msra.mxu1 %v5492_v17  ;;  %814 = vmatprep.mubr.f32.mxu1 %v326_v21  ;;  %944 = vst [vmem:[#allocation2 + $0x69] sm:$0x1] %v6463_v10  ;;  %945 = vst [vmem:[#allocation2 + $0x79] sm:$0x1] %v6463_v10  ;;  %v1277_v17 = vld [vmem:[%s8966_s4 + $0x8] sm:$0xff]  ;;  %v1278_v21 = vld [vmem:[%s8966_s4 + $0x10] sm:$0xff] }
  0x4a   : > { %5497 = vmatprep.subr.bf16.mxu1 %v5496_v22  ;;  %946 = vst [vmem:[#allocation2 + $0x89] sm:$0x1] %v6463_v10  ;;  %947 = vst [vmem:[#allocation3] sm:$0xff] %v6463_v10  ;;  %v5532_v19 = vpack.c.bf16 %v1279_v18, %v1277_v17 }
  0x4b   : > { %948 = vst [vmem:[#allocation3 + $0x8] sm:$0xff] %v6463_v10  ;;  %950 = vst [vmem:[#allocation3 + $0x90] sm:$0xff] %v6463_v10 }
  0x4c   : > { %815 = vmatmul.mubr.f32.gmra.mrb[14].mxu1 %v325_v23  ;;  %951 = vst [vmem:[#allocation3 + $0x98] sm:$0xff] %v6463_v10  ;;  %953 = vst [vmem:[#allocation3 + $0x10] sm:$0x1] %v6463_v10  ;;  %v5534_v23 = vpack.c.bf16 %v1278_v21, %v1276_v20 }
  0x4d   : > { %5499 = vmatpush3.bf16.msra.mxu1 %v5496_v22  ;;  %4932 = vmatprep.mubr.f32.mxu1 %v306_v24  ;;  %954 = vst [vmem:[#allocation3 + $0x20] sm:$0x1] %v6463_v10  ;;  %955 = vst [vmem:[#allocation3 + $0x30] sm:$0x1] %v6463_v10  ;;  %v1281_v24 = vld [vmem:[%s8966_s4 + $0x28] sm:$0xff] }
  0x4e   : > { %5501 = vmatprep.subr.bf16.mxu1 %v5500_v34  ;;  %956 = vst [vmem:[#allocation3 + $0x40] sm:$0x1] %v6463_v10  ;;  %957 = vst [vmem:[#allocation3 + $0x50] sm:$0x1] %v6463_v10  ;;  %v1286_v34 = vld [vmem:[%s8966_s4 + $0x50] sm:$0xff] }
  0x4f   : > { %958 = vst [vmem:[#allocation3 + $0x60] sm:$0x1] %v6463_v10  ;;  %959 = vst [vmem:[#allocation3 + $0x70] sm:$0x1] %v6463_v10  ;;  %v5542_v35 = vpack.c.bf16 %v1286_v34, %v1284_v33 }
  0x50   : > { %4933 = vmatmul.mubr.f32.vlgmr.msra.gmra.mrb[16].mxu1 %v309_v25  ;;  %960 = vst [vmem:[#allocation3 + $0x80] sm:$0x1] %v6463_v10  ;;  %961 = vst [vmem:[#allocation3 + $0x19] sm:$0x1] %v6463_v10  ;;  %v1283_v25 = vld [vmem:[%s8966_s4 + $0x38] sm:$0xff] }
  0x51   : > { %4935 = vmatprep.mubr.f32.mxu1 %v312_v26  ;;  %5503 = vmatpush1.bf16.msra.mxu1 %v5502_v37  ;;  %962 = vst [vmem:[#allocation3 + $0x29] sm:$0x1] %v6463_v10  ;;  %963 = vst [vmem:[#allocation3 + $0x39] sm:$0x1] %v6463_v10  ;;  %v5536_v26 = vpack.c.bf16 %v1283_v25, %v1281_v24  ;;  %v1291_v37 = vld [vmem:[%s8966_s4 + $0x78] sm:$0xff] }
  0x52   : > { %5505 = vmatprep.subr.bf16.mxu1 %v5504_v40  ;;  %964 = vst [vmem:[#allocation3 + $0x49] sm:$0x1] %v6463_v10  ;;  %965 = vst [vmem:[#allocation3 + $0x59] sm:$0x1] %v6463_v10  ;;  %v1308_v22 = vld [vmem:[#allocation3 + $0x1] sm:$0xff]  ;;  %v5544_v38 = vpack.c.bf16 %v1291_v37, %v1289_v36  ;;  %v1290_v40 = vld [vmem:[%s8966_s4 + $0x70] sm:$0xff] }
  0x53   : > { %966 = vst [vmem:[#allocation3 + $0x69] sm:$0x1] %v6463_v10  ;;  %967 = vst [vmem:[#allocation3 + $0x79] sm:$0x1] %v6463_v10  ;;  %v5546_v41 = vpack.c.bf16 %v1290_v40, %v1288_v39  ;;  %v329_v40 = vld [vmem:[%s8963_s1 + $0x8] sm:$0xff] }
  0x54   : > { %4936 = vmatmul.mubr.f32.gmra.mrb[18].mxu1 %v315_v27  ;;  %968 = vst [vmem:[#allocation3 + $0x89] sm:$0x1] %v6463_v10  ;;  %969 = vst [vmem:[#allocation4] sm:$0xff] %v6463_v10  ;;  %v1280_v27 = vld [vmem:[%s8966_s4 + $0x20] sm:$0xff] }
  0x55   : > { %4938 = vmatprep.mubr.f32.mxu1 %v318_v28  ;;  %5507 = vmatpush1.bf16.msra.mxu1 %v5506_v43  ;;  %970 = vst [vmem:[#allocation4 + $0x8] sm:$0xff] %v6463_v10  ;;  %972 = vst [vmem:[#allocation4 + $0x90] sm:$0xff] %v6463_v10  ;;  %v1282_v28 = vld [vmem:[%s8966_s4 + $0x30] sm:$0xff]  ;;  %v1295_v43 = vld [vmem:[%s8966_s4 + $0x98] sm:$0xff] }
  0x56   : > { %5509 = vmatprep.subr.bf16.mxu1 %v5508_v46  ;;  %973 = vst [vmem:[#allocation4 + $0x98] sm:$0xff] %v6463_v10  ;;  %975 = vst [vmem:[#allocation4 + $0x10] sm:$0x1] %v6463_v10  ;;  %v5548_v44 = vpack.c.bf16 %v1295_v43, %v1293_v42  ;;  %v1294_v46 = vld [vmem:[%s8966_s4 + $0x90] sm:$0xff] }
  0x57   : > { %976 = vst [vmem:[#allocation4 + $0x20] sm:$0x1] %v6463_v10  ;;  %977 = vst [vmem:[#allocation4 + $0x30] sm:$0x1] %v6463_v10  ;;  %v5550_v47 = vpack.c.bf16 %v1294_v46, %v1292_v45  ;;  %v331_v45 = vld [vmem:[%s8963_s1 + $0x18] sm:$0xff] }
  0x58   : > { %4939 = vmatmul.mubr.f32.gmra.mrb[20].mxu1 %v321_v29  ;;  %978 = vst [vmem:[#allocation4 + $0x40] sm:$0x1] %v6463_v10  ;;  %979 = vst [vmem:[#allocation4 + $0x50] sm:$0x1] %v6463_v10  ;;  %v5538_v29 = vpack.c.bf16 %v1282_v28, %v1280_v27 }
  0x59   : > { %4941 = vmatprep.mubr.f32.mxu1 %v324_v30  ;;  %5511 = vmatpush1.bf16.msra.mxu1 %v5510_v49  ;;  %980 = vst [vmem:[#allocation4 + $0x60] sm:$0x1] %v6463_v10  ;;  %981 = vst [vmem:[#allocation4 + $0x70] sm:$0x1] %v6463_v10  ;;  %v1285_v30 = vld [vmem:[%s8966_s4 + $0x48] sm:$0xff]  ;;  %v1299_v49 = vld [vmem:[%s8966_s4 + $0xb8] sm:$0xff] }
  0x5a   : > { %5513 = vmatprep.subr.bf16.mxu1 %v5512_v52  ;;  %982 = vst [vmem:[#allocation4 + $0x80] sm:$0x1] %v6463_v10  ;;  %983 = vst [vmem:[#allocation4 + $0x19] sm:$0x1] %v6463_v10  ;;  %v5552_v50 = vpack.c.bf16 %v1299_v49, %v1297_v48  ;;  %v1298_v52 = vld [vmem:[%s8966_s4 + $0xb0] sm:$0xff] }
  0x5b   : > { %984 = vst [vmem:[#allocation4 + $0x29] sm:$0x1] %v6463_v10  ;;  %985 = vst [vmem:[#allocation4 + $0x39] sm:$0x1] %v6463_v10  ;;  %v5554_v53 = vpack.c.bf16 %v1298_v52, %v1296_v51  ;;  %v335_v52 = vld [vmem:[%s8963_s1 + $0x38] sm:$0xff] }
  0x5c   : > { %4942 = vmatmul.mubr.f32.gmra.mrb[22].mxu1 %v327_v31  ;;  %986 = vst [vmem:[#allocation4 + $0x49] sm:$0x1] %v6463_v10  ;;  %987 = vst [vmem:[#allocation4 + $0x59] sm:$0x1] %v6463_v10  ;;  %v1287_v31 = vld [vmem:[%s8966_s4 + $0x58] sm:$0xff] }
  0x5d   : > { %5515 = vmatpush1.bf16.msra.mxu1 %v5514_v55  ;;  %1413 = vmatprep.mubr.f32.mxu1 %v6463_v10  ;;  %988 = vst [vmem:[#allocation4 + $0x69] sm:$0x1] %v6463_v10  ;;  %989 = vst [vmem:[#allocation4 + $0x79] sm:$0x1] %v6463_v10  ;;  %v5540_v32 = vpack.c.bf16 %v1287_v31, %v1285_v30  ;;  %v1303_v55 = vld [vmem:[%s8966_s4 + $0xd8] sm:$0xff] }
  0x5e   : > { %5517 = vmatprep.subr.bf16.mxu1 %v5516_v58  ;;  %990 = vst [vmem:[#allocation4 + $0x89] sm:$0x1] %v6463_v10  ;;  %v5556_v56 = vpack.c.bf16 %v1303_v55, %v1301_v54  ;;  %v1302_v58 = vld [vmem:[%s8966_s4 + $0xd0] sm:$0xff] }
  0x5f   : > { %v5558_v59 = vpack.c.bf16 %v1302_v58, %v1300_v57  ;;  %v337_v57 = vld [vmem:[%s8963_s1 + $0x48] sm:$0xff] }
  0x61   : > { %5519 = vmatpush1.bf16.msra.mxu1 %v5518_v61  ;;  %v1307_v61 = vld [vmem:[%s8966_s4 + $0xf8] sm:$0xff] }
  0x62   : > { %5521 = vmatprep.subr.bf16.mxu1 %v5520_v0  ;;  %v5560_v62 = vpack.c.bf16 %v1307_v61, %v1305_v60  ;;  %v1306_v0 = vld [vmem:[%s8966_s4 + $0xf0] sm:$0xff] }
  0x63   : > { %v5562_v1 = vpack.c.bf16 %v1306_v0, %v1304_v63  ;;  %v341_v0 = vld [vmem:[%s8963_s1 + $0x68] sm:$0xff] }
  0x65   : > { %5523 = vmatpush1.bf16.msra.mxu1 %v5522_v3  ;;  %v4251_v3 = vld [vmem:[%s8966_s4 + $0x218] sm:$0xff] }
  0x66   : > { %5525 = vmatprep.subr.bf16.mxu1 %v5524_v6  ;;  %v5564_v4 = vpack.c.bf16 %v4251_v3, %v4249_v2 }
  0x69   : > { %5527 = vmatpush1.bf16.msra.mxu1 %v5526_v9 }
  0x6a   : > { %5529 = vmatprep.subr.bf16.mxu1 %v5528_v13 }
  0x6d   : > { %5531 = vmatpush1.bf16.msra.mxu1 %v5530_v16 }
  0x6e   : > { %5533 = vmatprep.subr.bf16.mxu1 %v5532_v19  ;;  %v474_v19 = vlaneseq }
  0x70   : > { %1414 = vmatmul.mubr.f32.vlgmr.msra.gmra.mrb[24].mxu1 %v1308_v22 }
  0x71   : > { %5535 = vmatpush1.bf16.msra.mxu1 %v5534_v23  ;;  %1419 = vmatprep.mubr.f32.mxu1 %v6463_v10  ;;  %v7003_v23 = vshrl.u32 %v474_v19, 7 }
  0x72   : > { %5537 = vmatprep.subr.bf16.mxu1 %v5536_v26 }
  0x73   : > { %v484_v27 = vsub.s32 2, %v7003_v23 }
  0x75   : > { %5539 = vmatpush1.bf16.msra.mxu1 %v5538_v29  ;;  %v472_v29 = vld [vmem:[%s8964_s2] sm:$0x7] }
  0x76   : > { %5541 = vmatprep.subr.bf16.mxu1 %v5540_v32  ;;  %v485_v32 = vrot.slane %v472_v29, %v484_v27  ;;  %v359_v27 = vld [vmem:[%s8963_s1 + $0xf8] sm:$0xff] }
  0x79   : > { %5543 = vmatpush1.bf16.msra.mxu1 %v5542_v35 }
  0x7a   : > { %5545 = vmatprep.subr.bf16.mxu1 %v5544_v38 }
  0x7d   : > { %5547 = vmatpush1.bf16.msra.mxu1 %v5546_v41  ;;  %v332_v41 = vld [vmem:[%s8963_s1 + $0x20] sm:$0xff] }
  0x7e   : > { %5549 = vmatprep.subr.bf16.mxu1 %v5548_v44  ;;  %v5340_v43 = vpack.c.bf16 %v332_v41, %v329_v40  ;;  %v328_v44 = vld [vmem:[%s8963_s1] sm:$0xff]  ;;  %v4253_v40 = vld [vmem:[%s8966_s4 + $0x228] sm:$0xff]  ;;  %v4255_v41 = vld [vmem:[%s8966_s4 + $0x238] sm:$0xff] }
  0x80   : > { %5341 = vmatprep.subr.bf16.mxu0 %v5340_v43 }
  0x81   : > { %5551 = vmatpush1.bf16.msra.mxu1 %v5550_v47  ;;  %v5342_v47 = vpack.c.bf16 %v331_v45, %v328_v44  ;;  %v4252_v44 = vld [vmem:[%s8966_s4 + $0x220] sm:$0xff]  ;;  %v371_v45 = vld [vmem:[%s8963_s1 + $0x158] sm:$0xff] }
  0x82   : > { %5553 = vmatprep.subr.bf16.mxu1 %v5552_v50 }
  0x83   : > { %5343 = vmatpush1.bf16.msra.mxu0 %v5342_v47  ;;  %v5568_v47 = vpack.c.bf16 %v4255_v41, %v4253_v40  ;;  %v397_v40 = vld [vmem:[%s8963_s1 + $0x228] sm:$0xff] }
  0x85   : > { %5555 = vmatpush1.bf16.msra.mxu1 %v5554_v53  ;;  %v338_v53 = vld [vmem:[%s8963_s1 + $0x50] sm:$0xff] }
  0x86   : > { %5557 = vmatprep.subr.bf16.mxu1 %v5556_v56  ;;  %v5344_v55 = vpack.c.bf16 %v338_v53, %v335_v52  ;;  %v334_v56 = vld [vmem:[%s8963_s1 + $0x30] sm:$0xff]  ;;  %v4257_v52 = vld [vmem:[%s8966_s4 + $0x248] sm:$0xff]  ;;  %v4259_v53 = vld [vmem:[%s8966_s4 + $0x258] sm:$0xff] }
  0x88   : > { %5345 = vmatprep.subr.bf16.mxu0 %v5344_v55 }
  0x89   : > { %5559 = vmatpush1.bf16.msra.mxu1 %v5558_v59  ;;  %v5346_v59 = vpack.c.bf16 %v337_v57, %v334_v56  ;;  %v4256_v56 = vld [vmem:[%s8966_s4 + $0x240] sm:$0xff]  ;;  %v377_v57 = vld [vmem:[%s8963_s1 + $0x188] sm:$0xff] }
  0x8a   : > { %5561 = vmatprep.subr.bf16.mxu1 %v5560_v62 }
  0x8b   : > { %5347 = vmatpush1.bf16.msra.mxu0 %v5346_v59  ;;  %v5572_v59 = vpack.c.bf16 %v4259_v53, %v4257_v52  ;;  %v400_v52 = vld [vmem:[%s8963_s1 + $0x240] sm:$0xff]  ;;  %v403_v53 = vld [vmem:[%s8963_s1 + $0x258] sm:$0xff] }
  0x8d   : > { %5563 = vmatpush1.bf16.msra.mxu1 %v5562_v1  ;;  %v344_v1 = vld [vmem:[%s8963_s1 + $0x80] sm:$0xff] }
  0x8e   : > { %5565 = vmatprep.subr.bf16.mxu1 %v5564_v4  ;;  %v5348_v3 = vpack.c.bf16 %v344_v1, %v341_v0  ;;  %v4261_v1 = vld [vmem:[%s8966_s4 + $0x268] sm:$0xff] }
  0x90   : > { %5349 = vmatprep.subr.bf16.mxu0 %v5348_v3 }
 0x103   : > { %v4636_v5 = vpop.f32.mrb[0].mxu1 }
 0x104   : > { %v4637_v6 = vpop.f32.mrb[1].mxu1 }
 0x105   : > { %v4638_v7 = vadd.f32 %v4637_v6, %v4636_v5  ;;  %v340_v5 = vld [vmem:[%s8963_s1 + $0x60] sm:$0xff] }
 0x107   : > { %v4639_v8 = vpop.f32.mrb[2].mxu1  ;;  %v782_v37 = vadd.f32 %v4638_v7, %v485_v32 }
 0x108   : > { %v4640_v9 = vpop.f32.mrb[3].mxu1 }
 0x109   : > { %v4641_v11 = vadd.f32 %v4640_v9, %v4639_v8  ;;  %v343_v8 = vld [vmem:[%s8963_s1 + $0x78] sm:$0xff] }
 0x10b   : > { %v4642_v12 = vpop.f32.mrb[4].mxu1  ;;  %v787_v35 = vadd.f32 %v4641_v11, %v485_v32 }
 0x10c   : > { %v4643_v13 = vpop.f32.mrb[5].mxu1 }
 0x10d   : > { %v4644_v14 = vadd.f32 %v4643_v13, %v4642_v12  ;;  %v5350_v12 = vpack.c.bf16 %v343_v8, %v340_v5  ;;  %v347_v13 = vld [vmem:[%s8963_s1 + $0x98] sm:$0xff]  ;;  %v4260_v5 = vld [vmem:[%s8966_s4 + $0x260] sm:$0xff] }
 0x10f   : > { %v4645_v15 = vpop.f32.mrb[6].mxu1  ;;  %v792_v49 = vadd.f32 %v4644_v14, %v485_v32  ;;  %v350_v14 = vld [vmem:[%s8963_s1 + $0xb0] sm:$0xff]  ;;  %5351 = vmatpush1.bf16.msra.mxu0 %v5350_v12 }
 0x110   : > { %v4646_v16 = vpop.f32.mrb[7].mxu1  ;;  %v382_v12 = vld [vmem:[%s8963_s1 + $0x1b0] sm:$0xff] }
 0x111   : > { %v4647_v17 = vadd.f32 %v4646_v16, %v4645_v15  ;;  %v5352_v16 = vpack.c.bf16 %v350_v14, %v347_v13  ;;  %v385_v13 = vld [vmem:[%s8963_s1 + $0x1c8] sm:$0xff] }
 0x113   : > { %v4648_v18 = vpop.f32.mrb[8].mxu1  ;;  %v797_v46 = vadd.f32 %v4647_v17, %v485_v32  ;;  %v346_v17 = vld [vmem:[%s8963_s1 + $0x90] sm:$0xff]  ;;  %5353 = vmatprep.subr.bf16.mxu0 %v5352_v16  ;;  %v4267_v16 = vld [vmem:[%s8966_s4 + $0x298] sm:$0xff] }
 0x114   : > { %v4649_v20 = vpop.f32.mrb[9].mxu1 }
 0x115   : > { %v4650_v21 = vadd.f32 %v4649_v20, %v4648_v18  ;;  %v349_v18 = vld [vmem:[%s8963_s1 + $0xa8] sm:$0xff] }
 0x116   : > { %v5354_v19 = vpack.c.bf16 %v349_v18, %v346_v17  ;;  %v353_v20 = vld [vmem:[%s8963_s1 + $0xc8] sm:$0xff]  ;;  %v5378_v17 = vpack.c.bf16 %v385_v13, %v382_v12  ;;  %v4280_v13 = vld [vmem:[%s8966_s4 + $0x300] sm:$0xff] }
 0x117   : > { %v4651_v22 = vpop.f32.mrb[10].mxu1  ;;  %v802_v61 = vadd.f32 %v4650_v21, %v485_v32  ;;  %v356_v21 = vld [vmem:[%s8963_s1 + $0xe0] sm:$0xff] }
 0x118   : > { %v4652_v24 = vpop.f32.mrb[11].mxu1  ;;  %5355 = vmatpush1.bf16.msra.mxu0 %v5354_v19  ;;  %v4264_v19 = vld [vmem:[%s8966_s4 + $0x280] sm:$0xff] }
 0x119   : > { %v4653_v25 = vadd.f32 %v4652_v24, %v4651_v22  ;;  %v5356_v22 = vpack.c.bf16 %v356_v21, %v353_v20  ;;  %v352_v24 = vld [vmem:[%s8963_s1 + $0xc0] sm:$0xff]  ;;  %v389_v20 = vld [vmem:[%s8963_s1 + $0x1e8] sm:$0xff] }
 0x11a   : > { %v392_v21 = vld [vmem:[%s8963_s1 + $0x200] sm:$0xff] }
 0x11b   : > { %v4654_v26 = vpop.f32.mrb[12].mxu1  ;;  %v807_v58 = vadd.f32 %v4653_v25, %v485_v32  ;;  %5357 = vmatprep.subr.bf16.mxu0 %v5356_v22  ;;  %v355_v25 = vld [vmem:[%s8963_s1 + $0xd8] sm:$0xff] }
 0x11c   : > { %v4655_v28 = vpop.f32.mrb[13].mxu1 }
 0x11d   : > { %v4656_v30 = vadd.f32 %v4655_v28, %v4654_v26  ;;  %v5358_v26 = vpack.c.bf16 %v355_v25, %v352_v24  ;;  %v362_v28 = vld [vmem:[%s8963_s1 + $0x110] sm:$0xff]  ;;  %v5380_v25 = vpack.c.bf16 %v392_v21, %v389_v20  ;;  %v412_v20 = vld [vmem:[%s8963_s1 + $0x2a0] sm:$0xff]  ;;  %v415_v21 = vld [vmem:[%s8963_s1 + $0x2b8] sm:$0xff] }
 0x11e   : > { %v5360_v29 = vpack.c.bf16 %v362_v28, %v359_v27  ;;  %v4266_v24 = vld [vmem:[%s8966_s4 + $0x290] sm:$0xff]  ;;  %v391_v27 = vld [vmem:[%s8963_s1 + $0x1f8] sm:$0xff] }
 0x11f   : > { %v4657_v31 = vpop.f32.mrb[14].mxu1  ;;  %v812_v7 = vadd.f32 %v4656_v30, %v485_v32  ;;  %v358_v30 = vld [vmem:[%s8963_s1 + $0xf0] sm:$0xff]  ;;  %5359 = vmatpush1.bf16.msra.mxu0 %v5358_v26  ;;  %v388_v26 = vld [vmem:[%s8963_s1 + $0x1e0] sm:$0xff] }
 0x120   : > { %v4658_v33 = vpop.f32.mrb[15].mxu1  ;;  %5361 = vmatprep.subr.bf16.mxu0 %v5360_v29  ;;  %v4269_v29 = vld [vmem:[%s8966_s4 + $0x2a8] sm:$0xff] }
 0x121   : > { %v4659_v34 = vadd.f32 %v4658_v33, %v4657_v31  ;;  %v361_v31 = vld [vmem:[%s8963_s1 + $0x108] sm:$0xff]  ;;  %v4248_v33 = vld [vmem:[%s8966_s4 + $0x200] sm:$0xff] }
 0x123   : > { %v4934_v36 = vpop.f32.mrb[16].mxu1  ;;  %v817_v4 = vadd.f32 %v4659_v34, %v485_v32  ;;  %v5362_v32 = vpack.c.bf16 %v361_v31, %v358_v30  ;;  %v365_v34 = vld [vmem:[%s8963_s1 + $0x128] sm:$0xff]  ;;  %v4271_v30 = vld [vmem:[%s8966_s4 + $0x2b8] sm:$0xff]  ;;  %v5382_v31 = vpack.c.bf16 %v391_v27, %v388_v26  ;;  %v422_v27 = vld [vmem:[%s8963_s1 + $0x2f0] sm:$0xff] }
 0x124   : > { %v892_v38 = vadd.f32 %v4934_v36, %v787_v35  ;;  %v886_v39 = vpop.f32.mrb[17].mxu1  ;;  %v368_v35 = vld [vmem:[%s8963_s1 + $0x140] sm:$0xff]  ;;  %v4250_v36 = vld [vmem:[%s8966_s4 + $0x210] sm:$0xff]  ;;  %v419_v26 = vld [vmem:[%s8963_s1 + $0x2d8] sm:$0xff] }
 0x125   : > { %v887_v42 = vadd.f32 %v886_v39, %v782_v37  ;;  %v5364_v37 = vpack.c.bf16 %v368_v35, %v365_v34  ;;  %v367_v39 = vld [vmem:[%s8963_s1 + $0x138] sm:$0xff]  ;;  %5363 = vmatpush1.bf16.msra.mxu0 %v5362_v32  ;;  %v5566_v43 = vpack.c.bf16 %v4250_v36, %v4248_v33  ;;  %v5582_v32 = vpack.c.bf16 %v4266_v24, %v4264_v19  ;;  %v4268_v33 = vld [vmem:[%s8966_s4 + $0x2a0] sm:$0xff]  ;;  %v398_v35 = vld [vmem:[%s8963_s1 + $0x230] sm:$0xff] }
 0x126   : > { %1261 = vst [vmem:[#allocation3 + $0x21] sm:$0xff] %v892_v38  ;;  %v395_v34 = vld [vmem:[%s8963_s1 + $0x218] sm:$0xff]  ;;  %v5584_v36 = vpack.c.bf16 %v4271_v30, %v4269_v29  ;;  %v4284_v30 = vld [vmem:[%s8966_s4 + $0x320] sm:$0xff] }
 0x127   : > { %1260 = vst [vmem:[#allocation3 + $0x11] sm:$0xff] %v887_v42  ;;  %v4937_v48 = vpop.f32.mrb[18].mxu1  ;;  %1420 = vmatmul.mubr.f32.gmra.mrb[26].mxu1 %v887_v42  ;;  %5365 = vmatprep.subr.bf16.mxu0 %v5364_v37  ;;  %v4270_v37 = vld [vmem:[%s8966_s4 + $0x2b0] sm:$0xff]  ;;  %v4287_v19 = vld [vmem:[%s8966_s4 + $0x338] sm:$0xff] }
 0x128   : > { %v902_v50 = vadd.f32 %v4937_v48, %v797_v46  ;;  %v896_v51 = vpop.f32.mrb[19].mxu1  ;;  %1425 = vmatprep.mubr.f32.mxu1 %v6463_v10  ;;  %v374_v46 = vld [vmem:[%s8963_s1 + $0x170] sm:$0xff] }
 0x129   : > { %v897_v54 = vadd.f32 %v896_v51, %v792_v49  ;;  %v4254_v48 = vld [vmem:[%s8966_s4 + $0x230] sm:$0xff]  ;;  %v5368_v49 = vpack.c.bf16 %v374_v46, %v371_v45  ;;  %v373_v51 = vld [vmem:[%s8963_s1 + $0x168] sm:$0xff]  ;;  %v5586_v45 = vpack.c.bf16 %v4270_v37, %v4268_v33  ;;  %v4272_v46 = vld [vmem:[%s8966_s4 + $0x2c0] sm:$0xff] }
 0x12a   : > { %1263 = vst [vmem:[#allocation3 + $0x41] sm:$0xff] %v902_v50  ;;  %v5570_v55 = vpack.c.bf16 %v4254_v48, %v4252_v44  ;;  %v404_v48 = vld [vmem:[%s8963_s1 + $0x260] sm:$0xff]  ;;  %v4289_v33 = vld [vmem:[%s8966_s4 + $0x348] sm:$0xff] }
 0x12b   : > { %1262 = vst [vmem:[#allocation3 + $0x31] sm:$0xff] %v897_v54  ;;  %v4940_v60 = vpop.f32.mrb[20].mxu1  ;;  %1426 = vmatmul.mubr.f32.gmra.mrb[28].mxu1 %v892_v38  ;;  %v364_v38 = vld [vmem:[%s8963_s1 + $0x120] sm:$0xff] }
 0x12c   : > { %v912_v62 = vadd.f32 %v4940_v60, %v807_v58  ;;  %v906_v63 = vpop.f32.mrb[21].mxu1  ;;  %1431 = vmatprep.mubr.f32.mxu1 %v6463_v10  ;;  %v5366_v42 = vpack.c.bf16 %v367_v39, %v364_v38  ;;  %v380_v58 = vld [vmem:[%s8963_s1 + $0x1a0] sm:$0xff]  ;;  %v4258_v60 = vld [vmem:[%s8966_s4 + $0x250] sm:$0xff]  ;;  %v5384_v38 = vpack.c.bf16 %v398_v35, %v395_v34  ;;  %v4291_v34 = vld [vmem:[%s8966_s4 + $0x358] sm:$0xff] }
 0x12d   : > { %v907_v2 = vadd.f32 %v906_v63, %v802_v61  ;;  %v5372_v61 = vpack.c.bf16 %v380_v58, %v377_v57  ;;  %v379_v63 = vld [vmem:[%s8963_s1 + $0x198] sm:$0xff]  ;;  %v7184_v14 = vld [vmem:[#allocation3 + $0x20] sm:$0xff]  ;;  %v394_v39 = vld [vmem:[%s8963_s1 + $0x210] sm:$0xff]  ;;  %v5390_v57 = vpack.c.bf16 %v403_v53, %v400_v52 }
 0x12e   : > { %1265 = vst [vmem:[#allocation3 + $0x61] sm:$0xff] %v912_v62  ;;  %5367 = vmatpush1.bf16.msra.mxu0 %v5366_v42  ;;  %v7156_v0 = vld [vmem:[#allocation3 + $0x10] sm:$0xff]  ;;  %v4273_v42 = vld [vmem:[%s8966_s4 + $0x2c8] sm:$0xff]  ;;  %v5386_v44 = vpack.c.bf16 %v397_v40, %v394_v39  ;;  %v4288_v37 = vld [vmem:[%s8966_s4 + $0x340] sm:$0xff]  ;;  %v5604_v39 = vpack.c.bf16 %v4291_v34, %v4289_v33 }
 0x12f   : > { %1264 = vst [vmem:[#allocation3 + $0x51] sm:$0xff] %v907_v2  ;;  %v4943_v6 = vpop.f32.mrb[22].mxu1  ;;  %1432 = vmatmul.mubr.f32.gmra.mrb[30].mxu1 %v897_v54  ;;  %5369 = vmatprep.subr.bf16.mxu0 %v5368_v49  ;;  %v418_v35 = vld [vmem:[%s8963_s1 + $0x2d0] sm:$0xff]  ;;  %v427_v52 = vld [vmem:[%s8963_s1 + $0x318] sm:$0xff] }
 0x130   : > { %v922_v9 = vadd.f32 %v4943_v6, %v817_v4  ;;  %v916_v11 = vpop.f32.mrb[23].mxu1  ;;  %1437 = vmatprep.mubr.f32.mxu1 %v6463_v10  ;;  %v5574_v4 = vpack.c.bf16 %v4258_v60, %v4256_v56  ;;  %v383_v6 = vld [vmem:[%s8963_s1 + $0x1b8] sm:$0xff]  ;;  %v4290_v40 = vld [vmem:[%s8966_s4 + $0x350] sm:$0xff] }
 0x131   : > { %v917_v15 = vadd.f32 %v916_v11, %v812_v7  ;;  %v386_v7 = vld [vmem:[%s8963_s1 + $0x1d0] sm:$0xff]  ;;  %v7240_v41 = vld [vmem:[#allocation3 + $0x40] sm:$0xff]  ;;  %v4279_v56 = vld [vmem:[%s8966_s4 + $0x2f8] sm:$0xff] }
 0x132   : > { %1267 = vst [vmem:[#allocation3 + $0x81] sm:$0xff] %v922_v9  ;;  %v4262_v9 = vld [vmem:[%s8966_s4 + $0x270] sm:$0xff]  ;;  %v5376_v11 = vpack.c.bf16 %v386_v7, %v383_v6  ;;  %v407_v60 = vld [vmem:[%s8963_s1 + $0x278] sm:$0xff] }
 0x133   : > { %1266 = vst [vmem:[#allocation3 + $0x71] sm:$0xff] %v917_v15  ;;  %1438 = vmatmul.mubr.f32.gmra.mrb[32].mxu1 %v902_v50  ;;  %v370_v50 = vld [vmem:[%s8963_s1 + $0x150] sm:$0xff]  ;;  %v5578_v18 = vpack.c.bf16 %v4262_v9, %v4260_v5  ;;  %v4281_v5 = vld [vmem:[%s8966_s4 + $0x308] sm:$0xff]  ;;  %v4283_v6 = vld [vmem:[%s8966_s4 + $0x318] sm:$0xff] }
 0x134   : > { %1443 = vmatprep.mubr.f32.mxu1 %v6463_v10  ;;  %v5370_v54 = vpack.c.bf16 %v373_v51, %v370_v50  ;;  %v7212_v28 = vld [vmem:[#allocation3 + $0x30] sm:$0xff]  ;;  %v413_v9 = vld [vmem:[%s8963_s1 + $0x2a8] sm:$0xff]  ;;  %v5596_v12 = vpack.c.bf16 %v4283_v6, %v4281_v5  ;;  %v4307_v33 = vld [vmem:[%s8966_s4 + $0x3d8] sm:$0xff] }
 0x135   : > { %v4274_v50 = vld [vmem:[%s8966_s4 + $0x2d0] sm:$0xff]  ;;  %v433_v5 = vld [vmem:[%s8963_s1 + $0x348] sm:$0xff] }
 0x136   : > { %5371 = vmatpush1.bf16.msra.mxu0 %v5370_v54  ;;  %v7268_v54 = vld [vmem:[#allocation3 + $0x50] sm:$0xff]  ;;  %v5590_v58 = vpack.c.bf16 %v4274_v50, %v4272_v46  ;;  %v4293_v46 = vld [vmem:[%s8966_s4 + $0x368] sm:$0xff]  ;;  %v5606_v50 = vpack.c.bf16 %v4290_v40, %v4288_v37  ;;  %v7472_v37 = vld [vmem:[#allocation2] sm:$0xff] }
 0x137   : > { %1444 = vmatmul.mubr.f32.gmra.mrb[34].mxu1 %v907_v2  ;;  %v4263_v2 = vld [vmem:[%s8966_s4 + $0x278] sm:$0xff]  ;;  %5373 = vmatprep.subr.bf16.mxu0 %v5372_v61  ;;  %v410_v61 = vld [vmem:[%s8963_s1 + $0x290] sm:$0xff]  ;;  %v445_v40 = vld [vmem:[%s8963_s1 + $0x3a8] sm:$0xff] }
 0x138   : > { %1449 = vmatprep.mubr.f32.mxu1 %v6463_v10  ;;  %v5576_v8 = vpack.c.bf16 %v4263_v2, %v4261_v1  ;;  %v5392_v1 = vpack.c.bf16 %v410_v61, %v407_v60  ;;  %v406_v2 = vld [vmem:[%s8963_s1 + $0x270] sm:$0xff]  ;;  %v4297_v60 = vld [vmem:[%s8966_s4 + $0x388] sm:$0xff]  ;;  %v4299_v61 = vld [vmem:[%s8966_s4 + $0x398] sm:$0xff] }
 0x139   : > { %v5612_v6 = vpack.c.bf16 %v4299_v61, %v4297_v60  ;;  %v6368_v34 = vld [vmem:[%s6610_s23 + $0x30] sm:$0xff] }
 0x13a   : > { %v4310_v61 = vld [vmem:[%s8966_s4 + $0x3f0] sm:$0xff] }
 0x13b   : > { %1450 = vmatmul.mubr.f32.gmra.mrb[36].mxu1 %v912_v62  ;;  %v376_v62 = vld [vmem:[%s8963_s1 + $0x180] sm:$0xff] }
 0x13c   : > { %1455 = vmatprep.mubr.f32.mxu1 %v6463_v10  ;;  %v5374_v3 = vpack.c.bf16 %v379_v63, %v376_v62  ;;  %v4278_v63 = vld [vmem:[%s8966_s4 + $0x2f0] sm:$0xff] }
 0x13e   : > { %5375 = vmatpush1.bf16.msra.mxu0 %v5374_v3  ;;  %v409_v3 = vld [vmem:[%s8963_s1 + $0x288] sm:$0xff] }
 0x13f   : > { %1456 = vmatmul.mubr.f32.gmra.mrb[38].mxu1 %v917_v15  ;;  %v4265_v15 = vld [vmem:[%s8966_s4 + $0x288] sm:$0xff]  ;;  %5377 = vmatprep.subr.bf16.mxu0 %v5376_v11  ;;  %v5394_v7 = vpack.c.bf16 %v409_v3, %v406_v2  ;;  %v416_v11 = vld [vmem:[%s8963_s1 + $0x2c0] sm:$0xff] }
 0x140   : > { %1526 = vmatprep.mubr.f32.mxu1 %v6463_v10  ;;  %v5580_v22 = vpack.c.bf16 %v4267_v16, %v4265_v15  ;;  %v4282_v15 = vld [vmem:[%s8966_s4 + $0x310] sm:$0xff]  ;;  %v5396_v16 = vpack.c.bf16 %v416_v11, %v413_v9  ;;  %v4296_v3 = vld [vmem:[%s8966_s4 + $0x380] sm:$0xff]  ;;  %v437_v11 = vld [vmem:[%s8963_s1 + $0x368] sm:$0xff] }
 0x141   : > { %v5598_v24 = vpack.c.bf16 %v4282_v15, %v4280_v13  ;;  %v7429_v13 = vld [vmem:[#allocation3 + $0x32] sm:$0xff]  ;;  %v4301_v15 = vld [vmem:[%s8966_s4 + $0x3a8] sm:$0xff] }
 0x142   : > { %5379 = vmatpush1.bf16.msra.mxu0 %v5378_v17  ;;  %v7318_v17 = vld [vmem:[#allocation3 + $0x70] sm:$0xff] }
 0x143   : > { %1527 = vmatmul.mubr.f32.vlgmr.msra.gmra.mrb[24].mxu1 %v6463_v10  ;;  %5381 = vmatprep.subr.bf16.mxu0 %v5380_v25  ;;  %v5398_v25 = vpack.c.bf16 %v415_v21, %v412_v20  ;;  %v436_v20 = vld [vmem:[%s8963_s1 + $0x360] sm:$0xff] }
 0x144   : > { %5567 = vmatpush1.bf16.msra.mxu1 %v5566_v43  ;;  %1532 = vmatprep.mubr.f32.mxu1 %v6463_v10  ;;  %v4275_v43 = vld [vmem:[%s8966_s4 + $0x2d8] sm:$0xff] }
 0x145   : > { %5569 = vmatprep.subr.bf16.mxu1 %v5568_v47  ;;  %v401_v47 = vld [vmem:[%s8963_s1 + $0x248] sm:$0xff]  ;;  %v5588_v49 = vpack.c.bf16 %v4275_v43, %v4273_v42 }
 0x146   : > { %5383 = vmatpush1.bf16.msra.mxu0 %v5382_v31  ;;  %v5388_v51 = vpack.c.bf16 %v404_v48, %v401_v47  ;;  %v4286_v31 = vld [vmem:[%s8966_s4 + $0x330] sm:$0xff]  ;;  %v425_v43 = vld [vmem:[%s8963_s1 + $0x308] sm:$0xff]  ;;  %v4295_v47 = vld [vmem:[%s8966_s4 + $0x378] sm:$0xff] }
 0x147   : > { %1533 = vmatmul.mubr.f32.gmra.mrb[26].mxu1 %v7156_v0  ;;  %5385 = vmatprep.subr.bf16.mxu0 %v5384_v38  ;;  %v421_v38 = vld [vmem:[%s8963_s1 + $0x2e8] sm:$0xff]  ;;  %v5608_v53 = vpack.c.bf16 %v4295_v47, %v4293_v46 }
 0x148   : > { %5571 = vmatpush1.bf16.msra.mxu1 %v5570_v55  ;;  %1538 = vmatprep.mubr.f32.mxu1 %v6463_v10  ;;  %v4277_v55 = vld [vmem:[%s8966_s4 + $0x2e8] sm:$0xff]  ;;  %v5402_v42 = vpack.c.bf16 %v421_v38, %v418_v35 }
 0x149   : > { %5573 = vmatprep.subr.bf16.mxu1 %v5572_v59  ;;  %v4276_v59 = vld [vmem:[%s8966_s4 + $0x2e0] sm:$0xff]  ;;  %v5592_v62 = vpack.c.bf16 %v4279_v56, %v4277_v55  ;;  %v4294_v55 = vld [vmem:[%s8966_s4 + $0x370] sm:$0xff]  ;;  %v449_v47 = vld [vmem:[%s8963_s1 + $0x3c8] sm:$0xff] }
 0x14a   : > { %5387 = vmatpush1.bf16.msra.mxu0 %v5386_v44  ;;  %v428_v44 = vld [vmem:[%s8963_s1 + $0x320] sm:$0xff] }
 0x14b   : > { %1539 = vmatmul.mubr.f32.gmra.mrb[28].mxu1 %v7184_v14  ;;  %5389 = vmatprep.subr.bf16.mxu0 %v5388_v51  ;;  %v5404_v48 = vpack.c.bf16 %v428_v44, %v425_v43  ;;  %v4292_v51 = vld [vmem:[%s8966_s4 + $0x360] sm:$0xff]  ;;  %v4306_v43 = vld [vmem:[%s8966_s4 + $0x3d0] sm:$0xff] }
 0x14c   : > { %5575 = vmatpush1.bf16.msra.mxu1 %v5574_v4  ;;  %1544 = vmatprep.mubr.f32.mxu1 %v6463_v10  ;;  %v7296_v4 = vld [vmem:[#allocation3 + $0x60] sm:$0xff]  ;;  %v5610_v2 = vpack.c.bf16 %v4294_v55, %v4292_v51  ;;  %v6370_v44 = vld [vmem:[%s6610_s23 + $0x50] sm:$0xff]  ;;  %v4311_v51 = vld [vmem:[%s8966_s4 + $0x3f8] sm:$0xff] }
 0x14d   : > { %5577 = vmatprep.subr.bf16.mxu1 %v5576_v8  ;;  %v5594_v8 = vpack.c.bf16 %v4278_v63, %v4276_v59  ;;  %v7399_v59 = vld [vmem:[#allocation3 + $0x22] sm:$0xff] }
 0x14e   : > { %5391 = vmatpush1.bf16.msra.mxu0 %v5390_v57  ;;  %v431_v57 = vld [vmem:[%s8963_s1 + $0x338] sm:$0xff]  ;;  %v448_v55 = vld [vmem:[%s8963_s1 + $0x3c0] sm:$0xff] }
 0x14f   : > { %1545 = vmatmul.mubr.f32.gmra.mrb[30].mxu1 %v7212_v28  ;;  %5393 = vmatprep.subr.bf16.mxu0 %v5392_v1  ;;  %v430_v1 = vld [vmem:[%s8963_s1 + $0x330] sm:$0xff] }
 0x150   : > { %5579 = vmatpush1.bf16.msra.mxu1 %v5578_v18  ;;  %1550 = vmatprep.mubr.f32.mxu1 %v6463_v10  ;;  %v4285_v18 = vld [vmem:[%s8966_s4 + $0x328] sm:$0xff]  ;;  %v5410_v9 = vpack.c.bf16 %v433_v5, %v430_v1  ;;  %v455_v1 = vld [vmem:[%s8963_s1 + $0x3f8] sm:$0xff] }
 0x151   : > { %5581 = vmatprep.subr.bf16.mxu1 %v5580_v22  ;;  %v1575_v22 = vld [vmem:[#allocation3 + $0x2] sm:$0xff]  ;;  %v5600_v29 = vpack.c.bf16 %v4287_v19, %v4285_v18  ;;  %v6366_v18 = vld [vmem:[%s6610_s23 + $0x18] sm:$0xff] }
 0x152   : > { %5395 = vmatpush1.bf16.msra.mxu0 %v5394_v7  ;;  %v4298_v7 = vld [vmem:[%s8966_s4 + $0x390] sm:$0xff]  ;;  %v4313_v5 = vld [vmem:[%s8966_s4 + $0x408] sm:$0xff] }
 0x153   : > { %1551 = vmatmul.mubr.f32.gmra.mrb[32].mxu1 %v7240_v41  ;;  %5397 = vmatprep.subr.bf16.mxu0 %v5396_v16  ;;  %v4303_v16 = vld [vmem:[%s8966_s4 + $0x3b8] sm:$0xff]  ;;  %v5614_v21 = vpack.c.bf16 %v4298_v7, %v4296_v3  ;;  %v7521_v3 = vld [vmem:[#allocation3 + $0x62] sm:$0xff] }
 0x154   : > { %5583 = vmatpush1.bf16.msra.mxu1 %v5582_v32  ;;  %1556 = vmatprep.mubr.f32.mxu1 %v6463_v10  ;;  %v5400_v32 = vpack.c.bf16 %v422_v27, %v419_v26  ;;  %v4302_v26 = vld [vmem:[%s8966_s4 + $0x3b0] sm:$0xff]  ;;  %v6367_v27 = vld [vmem:[%s6610_s23 + $0x38] sm:$0xff]  ;;  %v6373_v7 = vld [vmem:[%s6610_s23 + $0x60] sm:$0xff] }
 0x155   : > { %5585 = vmatprep.subr.bf16.mxu1 %v5584_v36  ;;  %v5602_v36 = vpack.c.bf16 %v4286_v31, %v4284_v30  ;;  %v446_v30 = vld [vmem:[%s8963_s1 + $0x3b0] sm:$0xff]  ;;  %v7459_v31 = vld [vmem:[#allocation3 + $0x42] sm:$0xff] }
 0x156   : > { %5399 = vmatpush1.bf16.msra.mxu0 %v5398_v25  ;;  %v5616_v25 = vpack.c.bf16 %v4303_v16, %v4301_v15  ;;  %v457_v15 = vld [vmem:[%s8963_s1 + $0x408] sm:$0xff] }
 0x157   : > { %1557 = vmatmul.mubr.f32.gmra.mrb[34].mxu1 %v7268_v54  ;;  %5401 = vmatprep.subr.bf16.mxu0 %v5400_v32  ;;  %v4305_v32 = vld [vmem:[%s8966_s4 + $0x3c8] sm:$0xff] }
 0x158   : > { %5587 = vmatpush1.bf16.msra.mxu1 %v5586_v45  ;;  %1562 = vmatprep.mubr.f32.mxu1 %v6463_v10  ;;  %v7371_v45 = vld [vmem:[#allocation3 + $0x12] sm:$0xff] }
 0x159   : > { %5589 = vmatprep.subr.bf16.mxu1 %v5588_v49  ;;  %v424_v49 = vld [vmem:[%s8963_s1 + $0x300] sm:$0xff] }
 0x15a   : > { %5403 = vmatpush1.bf16.msra.mxu0 %v5402_v42  ;;  %v5406_v56 = vpack.c.bf16 %v427_v52, %v424_v49  ;;  %v5620_v42 = vpack.c.bf16 %v4307_v33, %v4305_v32  ;;  %v7491_v49 = vld [vmem:[#allocation3 + $0x52] sm:$0xff]  ;;  %v6371_v52 = vld [vmem:[%s6610_s23 + $0x48] sm:$0xff]  ;;  %v4316_v32 = vld [vmem:[%s8966_s4 + $0x420] sm:$0xff] }
 0x15b   : > { %1563 = vmatmul.mubr.f32.gmra.mrb[36].mxu1 %v7296_v4  ;;  %5405 = vmatprep.subr.bf16.mxu0 %v5404_v48  ;;  %v452_v48 = vld [vmem:[%s8963_s1 + $0x3e0] sm:$0xff]  ;;  %v463_v33 = vld [vmem:[%s8963_s1 + $0x438] sm:$0xff] }
 0x15c   : > { %5591 = vmatpush1.bf16.msra.mxu1 %v5590_v58  ;;  %1568 = vmatprep.mubr.f32.mxu1 %v6463_v10  ;;  %v434_v58 = vld [vmem:[%s8963_s1 + $0x350] sm:$0xff] }
 0x15d   : > { %5593 = vmatprep.subr.bf16.mxu1 %v5592_v62  ;;  %v6364_v62 = vld [vmem:[%s6610_s23] sm:$0xff]  ;;  %v5408_v63 = vpack.c.bf16 %v434_v58, %v431_v57  ;;  %v451_v58 = vld [vmem:[%s8963_s1 + $0x3d8] sm:$0xff] }
 0x15e   : > { %554 = vmatmul.mubr.f32.vlgmr.msra.gmra.mrb[0].mxu0 %v6364_v62  ;;  %v4308_v57 = vld [vmem:[%s8966_s4 + $0x3e0] sm:$0xff]  ;;  %v6372_v62 = vld [vmem:[%s6610_s23 + $0x68] sm:$0xff] }
 0x15f   : > { %1569 = vmatmul.mubr.f32.gmra.mrb[38].mxu1 %v7318_v17  ;;  %5407 = vmatpush1.bf16.msra.mxu0 %v5406_v56 }
 0x160   : > { %5595 = vmatpush1.bf16.msra.mxu1 %v5594_v8  ;;  %1680 = vmatprep.mubr.f32.mxu1 %v6463_v10  ;;  %v6365_v8 = vld [vmem:[%s6610_s23 + $0x20] sm:$0xff] }
 0x161   : > { %5597 = vmatprep.subr.bf16.mxu1 %v5596_v12  ;;  %559 = vmatprep.mubr.f32.mxu0 %v6365_v8  ;;  %v440_v12 = vld [vmem:[%s8963_s1 + $0x380] sm:$0xff] }
 0x162   : > { %560 = vmatmul.mubr.f32.gmra.mrb[2].mxu0 %v6366_v18  ;;  %5409 = vmatprep.subr.bf16.mxu0 %v5408_v63  ;;  %v5412_v19 = vpack.c.bf16 %v440_v12, %v437_v11  ;;  %v5422_v63 = vpack.c.bf16 %v451_v58, %v448_v55  ;;  %v5626_v11 = vpack.c.bf16 %v4310_v61, %v4308_v57  ;;  %v4312_v12 = vld [vmem:[%s8966_s4 + $0x400] sm:$0xff]  ;;  %v4314_v18 = vld [vmem:[%s8966_s4 + $0x410] sm:$0xff]  ;;  %v4327_v57 = vld [vmem:[%s8966_s4 + $0x478] sm:$0xff] }
 0x163   : > { %1681 = vmatmul.mubr.f32.vlgmr.msra.gmra.mrb[24].mxu1 %v1575_v22  ;;  %5411 = vmatpush1.bf16.msra.mxu0 %v5410_v9  ;;  %v4300_v22 = vld [vmem:[%s8966_s4 + $0x3a0] sm:$0xff]  ;;  %v454_v9 = vld [vmem:[%s8963_s1 + $0x3f0] sm:$0xff]  ;;  %v6379_v58 = vld [vmem:[%s6610_s23 + $0xa8] sm:$0xff] }
 0x164   : > { %5599 = vmatpush1.bf16.msra.mxu1 %v5598_v24  ;;  %1686 = vmatprep.mubr.f32.mxu1 %v6463_v10  ;;  %v439_v24 = vld [vmem:[%s8963_s1 + $0x378] sm:$0xff]  ;;  %v5618_v38 = vpack.c.bf16 %v4302_v26, %v4300_v22  ;;  %v464_v22 = vld [vmem:[%s8963_s1 + $0x440] sm:$0xff] }
 0x165   : > { %5601 = vmatprep.subr.bf16.mxu1 %v5600_v29  ;;  %565 = vmatprep.mubr.f32.mxu0 %v6367_v27  ;;  %v5414_v29 = vpack.c.bf16 %v439_v24, %v436_v20  ;;  %v5426_v20 = vpack.c.bf16 %v457_v15, %v454_v9  ;;  %v7551_v24 = vld [vmem:[#allocation3 + $0x72] sm:$0xff] }
 0x166   : > { %566 = vmatmul.mubr.f32.gmra.mrb[4].mxu0 %v6368_v34  ;;  %5413 = vmatprep.subr.bf16.mxu0 %v5412_v19  ;;  %v6374_v19 = vld [vmem:[%s6610_s23 + $0x80] sm:$0xff]  ;;  %v4319_v26 = vld [vmem:[%s8966_s4 + $0x438] sm:$0xff] }
 0x167   : > { %1687 = vmatmul.mubr.f32.gmra.mrb[26].mxu1 %v7371_v45  ;;  %5415 = vmatpush1.bf16.msra.mxu0 %v5414_v29  ;;  %v6375_v27 = vld [vmem:[%s6610_s23 + $0x78] sm:$0xff] }
 0x168   : > { %5603 = vmatpush1.bf16.msra.mxu1 %v5602_v36  ;;  %1692 = vmatprep.mubr.f32.mxu1 %v6463_v10  ;;  %v442_v36 = vld [vmem:[%s8963_s1 + $0x390] sm:$0xff]  ;;  %v4335_v9 = vld [vmem:[%s8966_s4 + $0x4b8] sm:$0xff] }
 0x169   : > { %5605 = vmatprep.subr.bf16.mxu1 %v5604_v39  ;;  %v4304_v39 = vld [vmem:[%s8966_s4 + $0x3c0] sm:$0xff]  ;;  %571 = vmatprep.mubr.f32.mxu0 %v6370_v44  ;;  %v5418_v46 = vpack.c.bf16 %v445_v40, %v442_v36  ;;  %v6376_v36 = vld [vmem:[%s6610_s23 + $0x98] sm:$0xff]  ;;  %v470_v40 = vld [vmem:[%s8963_s1 + $0x470] sm:$0xff] }
 0x16a   : > { %572 = vmatmul.mubr.f32.gmra.mrb[6].mxu0 %v6371_v52  ;;  %v5622_v56 = vpack.c.bf16 %v4306_v43, %v4304_v39  ;;  %v467_v39 = vld [vmem:[%s8963_s1 + $0x458] sm:$0xff]  ;;  %v6377_v44 = vld [vmem:[%s6610_s23 + $0x90] sm:$0xff] }
 0x16b   : > { %1693 = vmatmul.mubr.f32.gmra.mrb[28].mxu1 %v7399_v59  ;;  %577 = vmatprep.mubr.f32.mxu0 %v6372_v62  ;;  %v4323_v43 = vld [vmem:[%s8966_s4 + $0x458] sm:$0xff]  ;;  %v4322_v52 = vld [vmem:[%s8966_s4 + $0x450] sm:$0xff]  ;;  %v4324_v62 = vld [vmem:[%s8966_s4 + $0x460] sm:$0xff] }
 0x16c   : > { %5607 = vmatpush1.bf16.msra.mxu1 %v5606_v50  ;;  %1698 = vmatprep.mubr.f32.mxu1 %v6463_v10  ;;  %v4309_v50 = vld [vmem:[%s8966_s4 + $0x3e8] sm:$0xff] }
 0x16d   : > { %5609 = vmatprep.subr.bf16.mxu1 %v5608_v53  ;;  %v5420_v53 = vpack.c.bf16 %v452_v48, %v449_v47  ;;  %v5624_v60 = vpack.c.bf16 %v4311_v51, %v4309_v50  ;;  %v466_v47 = vld [vmem:[%s8963_s1 + $0x450] sm:$0xff]  ;;  %v469_v50 = vld [vmem:[%s8963_s1 + $0x468] sm:$0xff] }
 0x16e   : > { %578 = vmatmul.mubr.f32.gmra.mrb[8].mxu0 %v6373_v7  ;;  %v5434_v55 = vpack.c.bf16 %v469_v50, %v466_v47  ;;  %v4328_v7 = vld [vmem:[%s8966_s4 + $0x480] sm:$0xff]  ;;  %v4350_v50 = vld [vmem:[%s8966_s4 + $0x530] sm:$0xff] }
 0x16f   : > { %1699 = vmatmul.mubr.f32.gmra.mrb[30].mxu1 %v7429_v13  ;;  %583 = vmatprep.mubr.f32.mxu0 %v6374_v19  ;;  %v4339_v19 = vld [vmem:[%s8966_s4 + $0x4d8] sm:$0xff] }
 0x170   : > { %5611 = vmatpush1.bf16.msra.mxu1 %v5610_v2  ;;  %1704 = vmatprep.mubr.f32.mxu1 %v6463_v10  ;;  %v443_v10 = vld [vmem:[%s8963_s1 + $0x398] sm:$0xff]  ;;  %v458_v2 = vld [vmem:[%s8963_s1 + $0x410] sm:$0xff] }
 0x171   : > { %5613 = vmatprep.subr.bf16.mxu1 %v5612_v6  ;;  %v5416_v35 = vpack.c.bf16 %v446_v30, %v443_v10  ;;  %v4315_v6 = vld [vmem:[%s8966_s4 + $0x418] sm:$0xff]  ;;  %v5424_v8 = vpack.c.bf16 %v458_v2, %v455_v1  ;;  %v460_v10 = vld [vmem:[%s8963_s1 + $0x420] sm:$0xff]  ;;  %v5630_v30 = vpack.c.bf16 %v4314_v18, %v4312_v12  ;;  %v6380_v2 = vld [vmem:[%s6610_s23 + $0x10] sm:$0xff] }
 0x172   : > { %v5628_v16 = vpack.c.bf16 %v4315_v6, %v4313_v5  ;;  %584 = vmatmul.mubr.f32.gmra.mrb[10].mxu0 %v6375_v27  ;;  %v4331_v1 = vld [vmem:[%s8966_s4 + $0x498] sm:$0xff]  ;;  %v4334_v18 = vld [vmem:[%s8966_s4 + $0x4b0] sm:$0xff] }
 0x173   : > { %1705 = vmatmul.mubr.f32.gmra.mrb[32].mxu1 %v7459_v31  ;;  %5417 = vmatprep.subr.bf16.mxu0 %v5416_v35  ;;  %v4318_v35 = vld [vmem:[%s8966_s4 + $0x430] sm:$0xff]  ;;  %v4343_v27 = vld [vmem:[%s8966_s4 + $0x4f8] sm:$0xff] }
 0x174   : > { %5615 = vmatpush1.bf16.msra.mxu1 %v5614_v21  ;;  %1710 = vmatprep.mubr.f32.mxu1 %v7472_v37  ;;  %v461_v21 = vld [vmem:[%s8963_s1 + $0x428] sm:$0xff]  ;;  %v5634_v48 = vpack.c.bf16 %v4318_v35, %v4316_v32  ;;  %v4340_v32 = vld [vmem:[%s8966_s4 + $0x4e0] sm:$0xff]  ;;  %v6384_v35 = vld [vmem:[%s6610_s23 + $0x70] sm:$0xff] }
 0x175   : > { %5617 = vmatprep.subr.bf16.mxu1 %v5616_v25  ;;  %5419 = vmatpush1.bf16.msra.mxu0 %v5418_v46  ;;  %v4317_v25 = vld [vmem:[%s8966_s4 + $0x428] sm:$0xff]  ;;  %v5428_v29 = vpack.c.bf16 %v464_v22, %v461_v21  ;;  %v5432_v46 = vpack.c.bf16 %v470_v40, %v467_v39  ;;  %v4344_v39 = vld [vmem:[%s8966_s4 + $0x500] sm:$0xff]  ;;  %v4346_v40 = vld [vmem:[%s8966_s4 + $0x510] sm:$0xff] }
 0x176   : > { %5421 = vmatprep.subr.bf16.mxu0 %v5420_v53  ;;  %v5632_v34 = vpack.c.bf16 %v4319_v26, %v4317_v25  ;;  %589 = vmatprep.mubr.f32.mxu0 %v6376_v36  ;;  %v6378_v53 = vld [vmem:[%s6610_s23 + $0xb0] sm:$0xff]  ;;  %v4336_v25 = vld [vmem:[%s8966_s4 + $0x4c0] sm:$0xff] }
 0x177   : > { %1711 = vmatmul.mubr.f32.gmra.mrb[34].mxu1 %v7491_v49  ;;  %590 = vmatmul.mubr.f32.gmra.mrb[12].mxu0 %v6377_v44  ;;  %v4338_v26 = vld [vmem:[%s8966_s4 + $0x4d0] sm:$0xff]  ;;  %v6385_v44 = vld [vmem:[%s6610_s23 + $0x88] sm:$0xff] }
 0x178   : > { %5619 = vmatpush1.bf16.msra.mxu1 %v5618_v38  ;;  %1716 = vmatprep.mubr.f32.mxu1 %v7472_v37  ;;  %v5430_v38 = vpack.c.bf16 %v463_v33, %v460_v10  ;;  %v5654_v10 = vpack.c.bf16 %v4338_v26, %v4336_v25  ;;  %v4342_v33 = vld [vmem:[%s8966_s4 + $0x4f0] sm:$0xff]  ;;  %v4371_v25 = vld [vmem:[%s8966_s4 + $0x5d8] sm:$0xff] }
 0x179   : > { %5621 = vmatprep.subr.bf16.mxu1 %v5620_v42  ;;  %5423 = vmatpush1.bf16.msra.mxu0 %v5422_v63  ;;  %v4321_v42 = vld [vmem:[%s8966_s4 + $0x448] sm:$0xff]  ;;  %v4326_v63 = vld [vmem:[%s8966_s4 + $0x470] sm:$0xff]  ;;  %v5658_v36 = vpack.c.bf16 %v4342_v33, %v4340_v32  ;;  %v4375_v32 = vld [vmem:[%s8966_s4 + $0x5f8] sm:$0xff] }
 0x17a   : > { %5425 = vmatprep.subr.bf16.mxu0 %v5424_v8  ;;  %v5636_v51 = vpack.c.bf16 %v4323_v43, %v4321_v42  ;;  %595 = vmatprep.mubr.f32.mxu0 %v6378_v53  ;;  %v5642_v5 = vpack.c.bf16 %v4326_v63, %v4324_v62  ;;  %v4330_v8 = vld [vmem:[%s8966_s4 + $0x490] sm:$0xff]  ;;  %v7699_v42 = vld [vmem:[#allocation3 + $0x80] sm:$0xff]  ;;  %v4351_v43 = vld [vmem:[%s8966_s4 + $0x538] sm:$0xff] }
 0x17b   : > { %1717 = vmatmul.mubr.f32.gmra.mrb[36].mxu1 %v7521_v3  ;;  %596 = vmatmul.mubr.f32.gmra.mrb[14].mxu0 %v6379_v58  ;;  %v5646_v12 = vpack.c.bf16 %v4330_v8, %v4328_v7  ;;  %v6387_v53 = vld [vmem:[#allocation3 + $0x11] sm:$0xff]  ;;  %v6389_v63 = vld [vmem:[#allocation3 + $0x21] sm:$0xff] }
 0x17c   : > { %5623 = vmatpush1.bf16.msra.mxu1 %v5622_v56  ;;  %1722 = vmatprep.mubr.f32.mxu1 %v7472_v37  ;;  %v4325_v56 = vld [vmem:[%s8966_s4 + $0x468] sm:$0xff]  ;;  %v4354_v58 = vld [vmem:[%s8966_s4 + $0x550] sm:$0xff]  ;;  %v6388_v62 = vld [vmem:[%s6610_s23 + $0xb8] sm:$0xff] }
 0x17d   : > { %5625 = vmatprep.subr.bf16.mxu1 %v5624_v60  ;;  %5427 = vmatpush1.bf16.msra.mxu0 %v5426_v20  ;;  %v5640_v61 = vpack.c.bf16 %v4327_v57, %v4325_v56  ;;  %v6382_v20 = vld [vmem:[%s6610_s23 + $0x40] sm:$0xff]  ;;  %v4363_v7 = vld [vmem:[%s8966_s4 + $0x598] sm:$0xff] }
 0x17e   : > { %5429 = vmatprep.subr.bf16.mxu0 %v5428_v29  ;;  %666 = vmatprep.mubr.f32.mxu0 %v7472_v37  ;;  %v6383_v29 = vld [vmem:[%s6610_s23 + $0x58] sm:$0xff]  ;;  %v4352_v57 = vld [vmem:[%s8966_s4 + $0x540] sm:$0xff] }
 0x17f   : > { %1723 = vmatmul.mubr.f32.gmra.mrb[38].mxu1 %v7551_v24  ;;  %v6390_v8 = vld [vmem:[#allocation3 + $0x31] sm:$0xff]  ;;  %v6393_v33 = vld [vmem:[#allocation3 + $0x61] sm:$0xff] }
 0x180   : > { %5627 = vmatpush1.bf16.msra.mxu1 %v5626_v11  ;;  %1850 = vmatprep.mubr.f32.mxu1 %v7472_v37  ;;  %v6381_v11 = vld [vmem:[%s6610_s23 + $0x28] sm:$0xff]  ;;  %v6392_v26 = vld [vmem:[#allocation3 + $0x51] sm:$0xff] }
 0x181   : > { %5629 = vmatprep.subr.bf16.mxu1 %v5628_v16  ;;  %5431 = vmatpush1.bf16.msra.mxu0 %v5430_v38  ;;  %v4332_v16 = vld [vmem:[%s8966_s4 + $0x4a0] sm:$0xff] }
 0x182   : > { %5433 = vmatprep.subr.bf16.mxu0 %v5432_v46  ;;  %v5650_v21 = vpack.c.bf16 %v4334_v18, %v4332_v16  ;;  %v5662_v46 = vpack.c.bf16 %v4346_v40, %v4344_v39  ;;  %v4367_v16 = vld [vmem:[%s8966_s4 + $0x5b8] sm:$0xff]  ;;  %v6391_v18 = vld [vmem:[#allocation3 + $0x41] sm:$0xff] }
 0x183   : > { %1851 = vmatmul.mubr.f32.vlgmr.msra.gmra.mrb[24].mxu1 %v7156_v0  ;;  %v4320_v0 = vld [vmem:[%s8966_s4 + $0x440] sm:$0xff]  ;;  %v4379_v39 = vld [vmem:[%s8966_s4 + $0x618] sm:$0xff] }
 0x184   : > { %5631 = vmatpush1.bf16.msra.mxu1 %v5630_v30  ;;  %1856 = vmatprep.mubr.f32.mxu1 %v7472_v37  ;;  %v5638_v60 = vpack.c.bf16 %v4322_v52, %v4320_v0  ;;  %v4355_v0 = vld [vmem:[%s8966_s4 + $0x558] sm:$0xff]  ;;  %v6386_v52 = vld [vmem:[%s6610_s23 + $0xa0] sm:$0xff] }
 0x185   : > { %5633 = vmatprep.subr.bf16.mxu1 %v5632_v34  ;;  %5435 = vmatpush1.bf16.msra.mxu0 %v5434_v55  ;;  %v4347_v34 = vld [vmem:[%s8966_s4 + $0x518] sm:$0xff] }
 0x186   : > { %v6394_v40 = vld [vmem:[#allocation3 + $0x71] sm:$0xff] }
 0x187   : > { %1857 = vmatmul.mubr.f32.gmra.mrb[26].mxu1 %v7184_v14  ;;  %v4329_v14 = vld [vmem:[%s8966_s4 + $0x488] sm:$0xff] }
 0x188   : > { %5635 = vmatpush1.bf16.msra.mxu1 %v5634_v48  ;;  %1862 = vmatprep.mubr.f32.mxu1 %v7472_v37  ;;  %v5644_v6 = vpack.c.bf16 %v4331_v1, %v4329_v14  ;;  %v4348_v48 = vld [vmem:[%s8966_s4 + $0x520] sm:$0xff]  ;;  %v5670_v14 = vpack.c.bf16 %v4354_v58, %v4352_v57 }
 0x189   : > { %5637 = vmatprep.subr.bf16.mxu1 %v5636_v51  ;;  %667 = vmatmul.mubr.f32.vlgmr.msra.gmra.mrb[0].mxu0 %v6380_v2  ;;  %v4353_v51 = vld [vmem:[%s8966_s4 + $0x548] sm:$0xff]  ;;  %v5666_v55 = vpack.c.bf16 %v4350_v50, %v4348_v48  ;;  %v4356_v2 = vld [vmem:[%s8966_s4 + $0x560] sm:$0xff]  ;;  %v4383_v48 = vld [vmem:[%s8966_s4 + $0x638] sm:$0xff] }
 0x18a   : > { %672 = vmatprep.mubr.f32.mxu0 %v7472_v37  ;;  %v5668_v56 = vpack.c.bf16 %v4355_v0, %v4353_v51  ;;  %v6395_v50 = vld [vmem:[#allocation3 + $0x81] sm:$0xff] }
 0x18b   : > { %1863 = vmatmul.mubr.f32.gmra.mrb[28].mxu1 %v7212_v28  ;;  %v4333_v28 = vld [vmem:[%s8966_s4 + $0x4a8] sm:$0xff]  ;;  %v4472_v51 = vld [vmem:[%s8968_s6 + $0x80] sm:$0xff] }
 0x18c   : > { %5639 = vmatpush1.bf16.msra.mxu1 %v5638_v60  ;;  %1868 = vmatprep.mubr.f32.mxu1 %v7472_v37  ;;  %v5648_v15 = vpack.c.bf16 %v4335_v9, %v4333_v28  ;;  %v4357_v60 = vld [vmem:[%s8966_s4 + $0x568] sm:$0xff]  ;;  %v4380_v58 = vld [vmem:[%s8966_s4 + $0x620] sm:$0xff] }
 0x18d   : > { %5641 = vmatprep.subr.bf16.mxu1 %v5640_v61  ;;  %673 = vmatmul.mubr.f32.gmra.mrb[2].mxu0 %v6381_v11  ;;  %v4359_v61 = vld [vmem:[%s8966_s4 + $0x578] sm:$0xff]  ;;  %v4360_v11 = vld [vmem:[%s8966_s4 + $0x580] sm:$0xff]  ;;  %v4473_v0 = vld [vmem:[%s8968_s6 + $0x88] sm:$0xff] }
 0x18e   : > { %678 = vmatprep.mubr.f32.mxu0 %v7472_v37  ;;  %v5672_v1 = vpack.c.bf16 %v4359_v61, %v4357_v60  ;;  %v4382_v60 = vld [vmem:[%s8966_s4 + $0x630] sm:$0xff] }
 0x18f   : > { %1869 = vmatmul.mubr.f32.gmra.mrb[30].mxu1 %v7240_v41  ;;  %v4337_v41 = vld [vmem:[%s8966_s4 + $0x4c8] sm:$0xff] }
 0x190   : > { %5643 = vmatpush1.bf16.msra.mxu1 %v5642_v5  ;;  %1874 = vmatprep.mubr.f32.mxu1 %v7472_v37  ;;  %v5652_v22 = vpack.c.bf16 %v4339_v19, %v4337_v41  ;;  %v4358_v5 = vld [vmem:[%s8966_s4 + $0x570] sm:$0xff] }
 0x191   : > { %5645 = vmatprep.subr.bf16.mxu1 %v5644_v6  ;;  %679 = vmatmul.mubr.f32.gmra.mrb[4].mxu0 %v6382_v20  ;;  %v4361_v6 = vld [vmem:[%s8966_s4 + $0x588] sm:$0xff]  ;;  %v5674_v28 = vpack.c.bf16 %v4358_v5, %v4356_v2  ;;  %v4364_v20 = vld [vmem:[%s8966_s4 + $0x5a0] sm:$0xff]  ;;  %v4386_v5 = vld [vmem:[%s8966_s4 + $0x650] sm:$0xff] }
 0x192   : > { %684 = vmatprep.mubr.f32.mxu0 %v7472_v37  ;;  %v5676_v9 = vpack.c.bf16 %v4363_v7, %v4361_v6  ;;  %v4384_v2 = vld [vmem:[%s8966_s4 + $0x640] sm:$0xff]  ;;  %v4391_v6 = vld [vmem:[%s8966_s4 + $0x678] sm:$0xff] }
 0x193   : > { %1875 = vmatmul.mubr.f32.gmra.mrb[32].mxu1 %v7268_v54  ;;  %v4341_v54 = vld [vmem:[%s8966_s4 + $0x4e8] sm:$0xff]  ;;  %v5702_v7 = vpack.c.bf16 %v4386_v5, %v4384_v2  ;;  %v4422_v2 = vld [vmem:[%s8966_s4 + $0x770] sm:$0xff]  ;;  %v2258_v5 = vld [vmem:[#allocation3 + $0x40] sm:$0xff] }
 0x194   : > { %5647 = vmatpush1.bf16.msra.mxu1 %v5646_v12  ;;  %1880 = vmatprep.mubr.f32.mxu1 %v7472_v37  ;;  %v5656_v30 = vpack.c.bf16 %v4343_v27, %v4341_v54  ;;  %v4362_v12 = vld [vmem:[%s8966_s4 + $0x590] sm:$0xff] }
 0x195   : > { %5649 = vmatprep.subr.bf16.mxu1 %v5648_v15  ;;  %685 = vmatmul.mubr.f32.gmra.mrb[6].mxu0 %v6383_v29  ;;  %v4365_v15 = vld [vmem:[%s8966_s4 + $0x5a8] sm:$0xff]  ;;  %v5678_v41 = vpack.c.bf16 %v4362_v12, %v4360_v11  ;;  %v4368_v29 = vld [vmem:[%s8966_s4 + $0x5c0] sm:$0xff] }
 0x196   : > { %690 = vmatprep.mubr.f32.mxu0 %v7472_v37  ;;  %v5680_v19 = vpack.c.bf16 %v4367_v16, %v4365_v15  ;;  %v4393_v11 = vld [vmem:[%s8966_s4 + $0x688] sm:$0xff]  ;;  %v4392_v16 = vld [vmem:[%s8966_s4 + $0x680] sm:$0xff] }
 0x197   : > { %1881 = vmatmul.mubr.f32.gmra.mrb[34].mxu1 %v7296_v4  ;;  %v4345_v4 = vld [vmem:[%s8966_s4 + $0x508] sm:$0xff] }
 0x198   : > { %5651 = vmatpush1.bf16.msra.mxu1 %v5650_v21  ;;  %1886 = vmatprep.mubr.f32.mxu1 %v7472_v37  ;;  %v5660_v38 = vpack.c.bf16 %v4347_v34, %v4345_v4  ;;  %v4366_v21 = vld [vmem:[%s8966_s4 + $0x5b0] sm:$0xff] }
 0x199   : > { %5653 = vmatprep.subr.bf16.mxu1 %v5652_v22  ;;  %691 = vmatmul.mubr.f32.gmra.mrb[8].mxu0 %v6384_v35  ;;  %v4369_v22 = vld [vmem:[%s8966_s4 + $0x5c8] sm:$0xff]  ;;  %v5682_v54 = vpack.c.bf16 %v4366_v21, %v4364_v20  ;;  %v4372_v35 = vld [vmem:[%s8966_s4 + $0x5e0] sm:$0xff] }
 0x19a   : > { %696 = vmatprep.mubr.f32.mxu0 %v7472_v37  ;;  %v5684_v27 = vpack.c.bf16 %v4371_v25, %v4369_v22  ;;  %v4396_v21 = vld [vmem:[%s8966_s4 + $0x6a0] sm:$0xff]  ;;  %v4398_v22 = vld [vmem:[%s8966_s4 + $0x6b0] sm:$0xff]  ;;  %v4401_v25 = vld [vmem:[%s8966_s4 + $0x6c8] sm:$0xff] }
 0x19b   : > { %1887 = vmatmul.mubr.f32.gmra.mrb[36].mxu1 %v7318_v17  ;;  %v4349_v17 = vld [vmem:[%s8966_s4 + $0x528] sm:$0xff] }
 0x19c   : > { %5655 = vmatpush1.bf16.msra.mxu1 %v5654_v10  ;;  %1892 = vmatprep.mubr.f32.mxu1 %v7472_v37  ;;  %v5664_v47 = vpack.c.bf16 %v4351_v43, %v4349_v17  ;;  %v4370_v10 = vld [vmem:[%s8966_s4 + $0x5d0] sm:$0xff] }
 0x19d   : > { %5657 = vmatprep.subr.bf16.mxu1 %v5656_v30  ;;  %697 = vmatmul.mubr.f32.gmra.mrb[10].mxu0 %v6385_v44  ;;  %v4373_v30 = vld [vmem:[%s8966_s4 + $0x5e8] sm:$0xff]  ;;  %v5686_v4 = vpack.c.bf16 %v4370_v10, %v4368_v29  ;;  %v4376_v44 = vld [vmem:[%s8966_s4 + $0x600] sm:$0xff]  ;;  %v4402_v29 = vld [vmem:[%s8966_s4 + $0x6d0] sm:$0xff] }
 0x19e   : > { %702 = vmatprep.mubr.f32.mxu0 %v7472_v37  ;;  %v5688_v34 = vpack.c.bf16 %v4375_v32, %v4373_v30  ;;  %v4405_v10 = vld [vmem:[%s8966_s4 + $0x6e8] sm:$0xff] }
 0x19f   : > { %1893 = vmatmul.mubr.f32.gmra.mrb[38].mxu1 %v7699_v42 }
 0x1a0   : > { %5659 = vmatpush1.bf16.msra.mxu1 %v5658_v36  ;;  %2020 = vmatprep.mubr.f32.mxu1 %v7472_v37  ;;  %v4374_v36 = vld [vmem:[%s8966_s4 + $0x5f0] sm:$0xff] }
 0x1a1   : > { %5661 = vmatprep.subr.bf16.mxu1 %v5660_v38  ;;  %703 = vmatmul.mubr.f32.gmra.mrb[12].mxu0 %v6386_v52  ;;  %v4377_v38 = vld [vmem:[%s8966_s4 + $0x608] sm:$0xff]  ;;  %v5690_v17 = vpack.c.bf16 %v4374_v36, %v4372_v35  ;;  %v4474_v52 = vld [vmem:[%s8968_s6 + $0x90] sm:$0xff] }
 0x1a2   : > { %708 = vmatprep.mubr.f32.mxu0 %v7472_v37  ;;  %v5692_v43 = vpack.c.bf16 %v4379_v39, %v4377_v38  ;;  %v4408_v38 = vld [vmem:[%s8966_s4 + $0x700] sm:$0xff]  ;;  %v4410_v39 = vld [vmem:[%s8966_s4 + $0x710] sm:$0xff] }
 0x1a3   : > { %2021 = vmatmul.mubr.f32.vlgmr.msra.gmra.mrb[24].mxu1 %v6387_v53 }
 0x1a4   : > { %5663 = vmatpush1.bf16.msra.mxu1 %v5662_v46  ;;  %2026 = vmatprep.mubr.f32.mxu1 %v7472_v37  ;;  %v4378_v46 = vld [vmem:[%s8966_s4 + $0x610] sm:$0xff] }
 0x1a5   : > { %5665 = vmatprep.subr.bf16.mxu1 %v5664_v47  ;;  %709 = vmatmul.mubr.f32.gmra.mrb[14].mxu0 %v6388_v62  ;;  %v4381_v47 = vld [vmem:[%s8966_s4 + $0x628] sm:$0xff]  ;;  %v5694_v53 = vpack.c.bf16 %v4378_v46, %v4376_v44  ;;  %v4412_v46 = vld [vmem:[%s8966_s4 + $0x720] sm:$0xff] }
 0x1a6   : > { %v5696_v57 = vpack.c.bf16 %v4383_v48, %v4381_v47  ;;  %v4385_v62 = vld [vmem:[%s8966_s4 + $0x648] sm:$0xff]  ;;  %v4414_v47 = vld [vmem:[%s8966_s4 + $0x730] sm:$0xff]  ;;  %v2256_v48 = vld [vmem:[#allocation3 + $0x20] sm:$0xff] }
 0x1a7   : > { %2027 = vmatmul.mubr.f32.gmra.mrb[26].mxu1 %v6389_v63  ;;  %v4387_v63 = vld [vmem:[%s8966_s4 + $0x658] sm:$0xff] }
 0x1a8   : > { %5667 = vmatpush1.bf16.msra.mxu1 %v5666_v55  ;;  %2032 = vmatprep.mubr.f32.mxu1 %v7472_v37  ;;  %v5788_v55 = vpack.c.bf16 %v4473_v0, %v4472_v51  ;;  %v4419_v51 = vld [vmem:[%s8966_s4 + $0x758] sm:$0xff]  ;;  %v5730_v0 = vpack.c.bf16 %v4414_v47, %v4412_v46  ;;  %v4440_v46 = vld [vmem:[%s8966_s4 + $0x800] sm:$0xff]  ;;  %v4442_v47 = vld [vmem:[%s8966_s4 + $0x810] sm:$0xff] }
 0x1a9   : > { %5669 = vmatprep.subr.bf16.mxu1 %v5668_v56  ;;  %v4475_v56 = vld [vmem:[%s8968_s6 + $0x98] sm:$0xff] }
 0x1aa   : > { %v5792_v61 = vpack.c.bf16 %v4475_v56, %v4474_v52  ;;  %5789 = vmatprep.subr.bf16.mxu0 %v5788_v55  ;;  %v4476_v52 = vld [vmem:[%s8968_s6 + $0xa0] sm:$0xff] }
 0x1ab   : > { %2033 = vmatmul.mubr.f32.gmra.mrb[28].mxu1 %v6390_v8  ;;  %5791 = vmatpush3.bf16.msra.mxu0 %v5788_v55  ;;  %v4416_v56 = vld [vmem:[%s8966_s4 + $0x740] sm:$0xff] }
 0x1ac   : > { %5671 = vmatpush1.bf16.msra.mxu1 %v5670_v14  ;;  %2038 = vmatprep.mubr.f32.mxu1 %v7472_v37  ;;  %v5698_v14 = vpack.c.bf16 %v4382_v60, %v4380_v58  ;;  %v2257_v60 = vld [vmem:[#allocation3 + $0x30] sm:$0xff] }
 0x1ad   : > { %5673 = vmatprep.subr.bf16.mxu1 %v5672_v1  ;;  %v5700_v1 = vpack.c.bf16 %v4387_v63, %v4385_v62  ;;  %5793 = vmatprep.subr.bf16.mxu0 %v5792_v61  ;;  %v4423_v62 = vld [vmem:[%s8966_s4 + $0x778] sm:$0xff] }
 0x1af   : > { %2039 = vmatmul.mubr.f32.gmra.mrb[30].mxu1 %v6391_v18  ;;  %5795 = vmatpush3.bf16.msra.mxu0 %v5792_v61  ;;  %v4394_v18 = vld [vmem:[%s8966_s4 + $0x690] sm:$0xff]  ;;  %v4421_v61 = vld [vmem:[%s8966_s4 + $0x768] sm:$0xff] }
 0x1b0   : > { %5675 = vmatpush1.bf16.msra.mxu1 %v5674_v28  ;;  %2044 = vmatprep.mubr.f32.mxu1 %v7472_v37  ;;  %v4388_v28 = vld [vmem:[%s8966_s4 + $0x660] sm:$0xff] }
 0x1b1   : > { %5677 = vmatprep.subr.bf16.mxu1 %v5676_v9  ;;  %v4390_v9 = vld [vmem:[%s8966_s4 + $0x670] sm:$0xff] }
 0x1b2   : > { %v5706_v12 = vpack.c.bf16 %v4390_v9, %v4388_v28  ;;  %v4479_v28 = vld [vmem:[%s8968_s6 + $0xb8] sm:$0xff] }
 0x1b3   : > { %2045 = vmatmul.mubr.f32.gmra.mrb[32].mxu1 %v6392_v26  ;;  %v5714_v26 = vpack.c.bf16 %v4398_v22, %v4396_v21  ;;  %v2260_v21 = vld [vmem:[#allocation3 + $0x60] sm:$0xff]  ;;  %v4433_v22 = vld [vmem:[%s8966_s4 + $0x7c8] sm:$0xff] }
 0x1b4   : > { %5679 = vmatpush1.bf16.msra.mxu1 %v5678_v41  ;;  %2050 = vmatprep.mubr.f32.mxu1 %v7472_v37  ;;  %v4397_v41 = vld [vmem:[%s8966_s4 + $0x6a8] sm:$0xff] }
 0x1b5   : > { %5681 = vmatprep.subr.bf16.mxu1 %v5680_v19  ;;  %v5710_v19 = vpack.c.bf16 %v4394_v18, %v4392_v16  ;;  %v4429_v16 = vld [vmem:[%s8966_s4 + $0x7a8] sm:$0xff]  ;;  %v4431_v18 = vld [vmem:[%s8966_s4 + $0x7b8] sm:$0xff] }
 0x1b7   : > { %2051 = vmatmul.mubr.f32.gmra.mrb[34].mxu1 %v6393_v33  ;;  %v4404_v33 = vld [vmem:[%s8966_s4 + $0x6e0] sm:$0xff] }
 0x1b8   : > { %5683 = vmatpush1.bf16.msra.mxu1 %v5682_v54  ;;  %2056 = vmatprep.mubr.f32.mxu1 %v7472_v37 }
 0x1b9   : > { %5685 = vmatprep.subr.bf16.mxu1 %v5684_v27  ;;  %v4400_v27 = vld [vmem:[%s8966_s4 + $0x6c0] sm:$0xff] }
 0x1ba   : > { %v5718_v30 = vpack.c.bf16 %v4402_v29, %v4400_v27  ;;  %v4432_v29 = vld [vmem:[%s8966_s4 + $0x7c0] sm:$0xff] }
 0x1bb   : > { %2057 = vmatmul.mubr.f32.gmra.mrb[36].mxu1 %v6394_v40  ;;  %v7934_v40 = vld [vmem:[#allocation3 + $0x82] sm:$0xff] }
 0x1bc   : > { %5687 = vmatpush1.bf16.msra.mxu1 %v5686_v4  ;;  %2062 = vmatprep.mubr.f32.mxu1 %v7472_v37  ;;  %v4406_v4 = vld [vmem:[%s8966_s4 + $0x6f0] sm:$0xff] }
 0x1bd   : > { %5689 = vmatprep.subr.bf16.mxu1 %v5688_v34  ;;  %v4409_v34 = vld [vmem:[%s8966_s4 + $0x708] sm:$0xff]  ;;  %v5722_v35 = vpack.c.bf16 %v4406_v4, %v4404_v33  ;;  %v4439_v33 = vld [vmem:[%s8966_s4 + $0x7f8] sm:$0xff] }
 0x1bf   : > { %2063 = vmatmul.mubr.f32.gmra.mrb[38].mxu1 %v6395_v50  ;;  %v4417_v50 = vld [vmem:[%s8966_s4 + $0x748] sm:$0xff] }
 0x1c0   : > { %5691 = vmatpush1.bf16.msra.mxu1 %v5690_v17  ;;  %2190 = vmatprep.mubr.f32.mxu1 %v7472_v37  ;;  %v4415_v17 = vld [vmem:[%s8966_s4 + $0x738] sm:$0xff]  ;;  %v5732_v55 = vpack.c.bf16 %v4419_v51, %v4417_v50  ;;  %v5758_v50 = vpack.c.bf16 %v4442_v47, %v4440_v46  ;;  %v476_v46 = vsub.s32 0, %v7003_v23  ;;  %v6397_v47 = vld [vmem:[%s8964_s2] sm:$0x7] }
 0x1c1   : > { %5693 = vmatprep.subr.bf16.mxu1 %v5692_v43  ;;  %v5726_v43 = vpack.c.bf16 %v4410_v39, %v4408_v38  ;;  %v4438_v38 = vld [vmem:[%s8966_s4 + $0x7f0] sm:$0xff] }
 0x1c3   : > { %2191 = vmatmul.mubr.f32.vlgmr.msra.gmra.mrb[24].mxu1 %v7371_v45  ;;  %v4389_v45 = vld [vmem:[%s8966_s4 + $0x668] sm:$0xff] }
 0x1c4   : > { %5695 = vmatpush1.bf16.msra.mxu1 %v5694_v53  ;;  %2196 = vmatprep.mubr.f32.mxu1 %v7472_v37  ;;  %v5704_v8 = vpack.c.bf16 %v4391_v6, %v4389_v45  ;;  %v4477_v53 = vld [vmem:[%s8968_s6 + $0xa8] sm:$0xff]  ;;  %v4427_v6 = vld [vmem:[%s8966_s4 + $0x798] sm:$0xff] }
 0x1c5   : > { %5697 = vmatprep.subr.bf16.mxu1 %v5696_v57  ;;  %v4418_v57 = vld [vmem:[%s8966_s4 + $0x750] sm:$0xff]  ;;  %v5796_v58 = vpack.c.bf16 %v4477_v53, %v4476_v52  ;;  %v4425_v45 = vld [vmem:[%s8966_s4 + $0x788] sm:$0xff] }
 0x1c6   : > { %v5734_v63 = vpack.c.bf16 %v4418_v57, %v4416_v56  ;;  %v5740_v9 = vpack.c.bf16 %v4427_v6, %v4425_v45  ;;  %v4446_v52 = vld [vmem:[%s8966_s4 + $0x830] sm:$0xff]  ;;  %v2426_v53 = vld [vmem:[#allocation3 + $0x21] sm:$0xff]  ;;  %v4451_v56 = vld [vmem:[%s8966_s4 + $0x858] sm:$0xff] }
 0x1c7   : > { %2197 = vmatmul.mubr.f32.gmra.mrb[26].mxu1 %v7399_v59  ;;  %v4395_v59 = vld [vmem:[%s8966_s4 + $0x698] sm:$0xff]  ;;  %5797 = vmatprep.subr.bf16.mxu0 %v5796_v58  ;;  %v4454_v45 = vld [vmem:[%s8966_s4 + $0x870] sm:$0xff]  ;;  %v2428_v6 = vld [vmem:[#allocation3 + $0x41] sm:$0xff] }
 0x1c8   : > { %5699 = vmatpush1.bf16.msra.mxu1 %v5698_v14  ;;  %2202 = vmatprep.mubr.f32.mxu1 %v7472_v37  ;;  %v5708_v15 = vpack.c.bf16 %v4395_v59, %v4393_v11  ;;  %v5736_v14 = vpack.c.bf16 %v4423_v62, %v4421_v61  ;;  %v4424_v11 = vld [vmem:[%s8966_s4 + $0x780] sm:$0xff]  ;;  %v4426_v59 = vld [vmem:[%s8966_s4 + $0x790] sm:$0xff] }
 0x1c9   : > { %5701 = vmatprep.subr.bf16.mxu1 %v5700_v1  ;;  %v4420_v1 = vld [vmem:[%s8966_s4 + $0x760] sm:$0xff]  ;;  %5799 = vmatpush3.bf16.msra.mxu0 %v5796_v58  ;;  %v4450_v61 = vld [vmem:[%s8966_s4 + $0x850] sm:$0xff] }
 0x1ca   : > { %v2427_v62 = vld [vmem:[#allocation3 + $0x31] sm:$0xff] }
 0x1cb   : > { %2203 = vmatmul.mubr.f32.gmra.mrb[28].mxu1 %v7429_v13  ;;  %v4399_v13 = vld [vmem:[%s8966_s4 + $0x6b8] sm:$0xff] }
 0x1cc   : > { %5703 = vmatpush1.bf16.msra.mxu1 %v5702_v7  ;;  %2208 = vmatprep.mubr.f32.mxu1 %v7472_v37  ;;  %v5712_v20 = vpack.c.bf16 %v4399_v13, %v4397_v41  ;;  %v5738_v7 = vpack.c.bf16 %v4422_v2, %v4420_v1  ;;  %v5742_v41 = vpack.c.bf16 %v4426_v59, %v4424_v11  ;;  %v4456_v11 = vld [vmem:[%s8966_s4 + $0x880] sm:$0xff]  ;;  %v4458_v59 = vld [vmem:[%s8966_s4 + $0x890] sm:$0xff] }
 0x1cd   : > { %5705 = vmatprep.subr.bf16.mxu1 %v5704_v8  ;;  %v4478_v8 = vld [vmem:[%s8968_s6 + $0xb0] sm:$0xff]  ;;  %v5744_v13 = vpack.c.bf16 %v4431_v18, %v4429_v16  ;;  %v4463_v16 = vld [vmem:[%s8966_s4 + $0x8b8] sm:$0xff]  ;;  %v5774_v18 = vpack.c.bf16 %v4458_v59, %v4456_v11 }
 0x1cf   : > { %2209 = vmatmul.mubr.f32.gmra.mrb[30].mxu1 %v7459_v31  ;;  %v4403_v31 = vld [vmem:[%s8966_s4 + $0x6d8] sm:$0xff] }
 0x1d0   : > { %5707 = vmatpush1.bf16.msra.mxu1 %v5706_v12  ;;  %2214 = vmatprep.mubr.f32.mxu1 %v7472_v37  ;;  %v5716_v54 = vpack.c.bf16 %v4403_v31, %v4401_v25  ;;  %v5800_v12 = vpack.c.bf16 %v4479_v28, %v4478_v8  ;;  %v4435_v25 = vld [vmem:[%s8966_s4 + $0x7d8] sm:$0xff] }
 0x1d1   : > { %5709 = vmatprep.subr.bf16.mxu1 %v5708_v15  ;;  %v2259_v15 = vld [vmem:[#allocation3 + $0x50] sm:$0xff]  ;;  %v5748_v27 = vpack.c.bf16 %v4435_v25, %v4433_v22  ;;  %v4459_v8 = vld [vmem:[%s8966_s4 + $0x898] sm:$0xff] }
 0x1d2   : > { %5801 = vmatprep.subr.bf16.mxu0 %v5800_v12  ;;  %v4467_v22 = vld [vmem:[%s8966_s4 + $0x8d8] sm:$0xff] }
 0x1d3   : > { %2215 = vmatmul.mubr.f32.gmra.mrb[32].mxu1 %v7491_v49  ;;  %v4407_v49 = vld [vmem:[%s8966_s4 + $0x6f8] sm:$0xff]  ;;  %5803 = vmatpush3.bf16.msra.mxu0 %v5800_v12 }
 0x1d4   : > { %5711 = vmatpush1.bf16.msra.mxu1 %v5710_v19  ;;  %2220 = vmatprep.mubr.f32.mxu1 %v7472_v37  ;;  %v5720_v32 = vpack.c.bf16 %v4407_v49, %v4405_v10  ;;  %v4428_v19 = vld [vmem:[%s8966_s4 + $0x7a0] sm:$0xff]  ;;  %v4434_v10 = vld [vmem:[%s8966_s4 + $0x7d0] sm:$0xff] }
 0x1d5   : > { %5713 = vmatprep.subr.bf16.mxu1 %v5712_v20  ;;  %v4430_v20 = vld [vmem:[%s8966_s4 + $0x7b0] sm:$0xff]  ;;  %v5750_v4 = vpack.c.bf16 %v4434_v10, %v4432_v29  ;;  %v4469_v29 = vld [vmem:[%s8966_s4 + $0x8e8] sm:$0xff]  ;;  %v8151_v10 = vld [vmem:[#allocation2] sm:$0xff] }
 0x1d6   : > { %v5746_v31 = vpack.c.bf16 %v4430_v20, %v4428_v19  ;;  %v2429_v12 = vld [vmem:[#allocation3 + $0x51] sm:$0xff]  ;;  %v2430_v20 = vld [vmem:[#allocation3 + $0x61] sm:$0xff] }
 0x1d7   : > { %2221 = vmatmul.mubr.f32.gmra.mrb[34].mxu1 %v7521_v3  ;;  %v4411_v3 = vld [vmem:[%s8966_s4 + $0x718] sm:$0xff]  ;;  %v4462_v19 = vld [vmem:[%s8966_s4 + $0x8b0] sm:$0xff] }
 0x1d8   : > { %5715 = vmatpush1.bf16.msra.mxu1 %v5714_v26  ;;  %2226 = vmatprep.mubr.f32.mxu1 %v7472_v37  ;;  %v5724_v36 = vpack.c.bf16 %v4411_v3, %v4409_v34  ;;  %v4480_v26 = vld [vmem:[%s8968_s6 + $0xc0] sm:$0xff]  ;;  %v4482_v34 = vld [vmem:[%s8968_s6 + $0xd0] sm:$0xff]  ;;  %v4483_v3 = vld [vmem:[%s8968_s6 + $0xd8] sm:$0xff] }
 0x1d9   : > { %5717 = vmatprep.subr.bf16.mxu1 %v5716_v54  ;;  %v4481_v54 = vld [vmem:[%s8968_s6 + $0xc8] sm:$0xff]  ;;  %v5808_v39 = vpack.c.bf16 %v4483_v3, %v4482_v34  ;;  %v2433_v34 = vld [vmem:[#allocation3 + $0x91] sm:$0xff] }
 0x1da   : > { %v5804_v49 = vpack.c.bf16 %v4481_v54, %v4480_v26  ;;  %v4464_v26 = vld [vmem:[%s8966_s4 + $0x8c0] sm:$0xff]  ;;  %v4466_v54 = vld [vmem:[%s8966_s4 + $0x8d0] sm:$0xff] }
 0x1db   : > { %2227 = vmatmul.mubr.f32.gmra.mrb[36].mxu1 %v7551_v24  ;;  %v4413_v24 = vld [vmem:[%s8966_s4 + $0x728] sm:$0xff] }
 0x1dc   : > { %5719 = vmatpush1.bf16.msra.mxu1 %v5718_v30  ;;  %2232 = vmatprep.mubr.f32.mxu1 %v7472_v37  ;;  %v5728_v44 = vpack.c.bf16 %v4415_v17, %v4413_v24  ;;  %v2261_v30 = vld [vmem:[#allocation3 + $0x70] sm:$0xff]  ;;  %v4441_v24 = vld [vmem:[%s8966_s4 + $0x808] sm:$0xff]  ;;  %v4443_v17 = vld [vmem:[%s8966_s4 + $0x818] sm:$0xff] }
 0x1dd   : > { %5721 = vmatprep.subr.bf16.mxu1 %v5720_v32  ;;  %v4437_v32 = vld [vmem:[%s8966_s4 + $0x7e8] sm:$0xff]  ;;  %5805 = vmatprep.subr.bf16.mxu0 %v5804_v49 }
 0x1de   : > { %5807 = vmatpush3.bf16.msra.mxu0 %v5804_v49  ;;  %v5782_v49 = vpack.c.bf16 %v4466_v54, %v4464_v26  ;;  %v4486_v26 = vld [vmem:[%s8968_s6 + $0xf0] sm:$0xff]  ;;  %v4487_v54 = vld [vmem:[%s8968_s6 + $0xf8] sm:$0xff] }
 0x1df   : > { %2233 = vmatmul.mubr.f32.gmra.mrb[38].mxu1 %v7934_v40  ;;  %5809 = vmatprep.subr.bf16.mxu0 %v5808_v39 }
 0x1e0   : > { %5723 = vmatpush1.bf16.msra.mxu1 %v5722_v35  ;;  %2361 = vmatprep.mubr.f32.mxu1 %v7472_v37  ;;  %v5752_v35 = vpack.c.bf16 %v4439_v33, %v4437_v32  ;;  %v4468_v32 = vld [vmem:[%s8966_s4 + $0x8e0] sm:$0xff]  ;;  %v4470_v33 = vld [vmem:[%s8966_s4 + $0x8f0] sm:$0xff] }
 0x1e1   : > { %5725 = vmatprep.subr.bf16.mxu1 %v5724_v36  ;;  %v4436_v36 = vld [vmem:[%s8966_s4 + $0x7e0] sm:$0xff]  ;;  %v5786_v3 = vpack.c.bf16 %v4470_v33, %v4468_v32  ;;  %v2861_v33 = vld [vmem:[%s8968_s6 + $0x8] sm:$0xff] }
 0x1e2   : > { %5811 = vmatpush3.bf16.msra.mxu0 %v5808_v39  ;;  %v2599_v39 = vld [vmem:[#allocation3 + $0x52] sm:$0xff]  ;;  %v2860_v32 = vld [vmem:[%s8968_s6] sm:$0xff] }
 0x1e3   : > { %2362 = vmatmul.mubr.f32.vlgmr.msra.gmra.mrb[24].mxu1 %v2256_v48  ;;  %v4447_v48 = vld [vmem:[%s8966_s4 + $0x838] sm:$0xff] }
 0x1e4   : > { %5727 = vmatpush1.bf16.msra.mxu1 %v5726_v43  ;;  %2367 = vmatprep.mubr.f32.mxu1 %v7472_v37  ;;  %v5754_v43 = vpack.c.bf16 %v4438_v38, %v4436_v36  ;;  %v2597_v36 = vld [vmem:[#allocation3 + $0x32] sm:$0xff]  ;;  %v2598_v38 = vld [vmem:[#allocation3 + $0x42] sm:$0xff] }
 0x1e5   : > { %5729 = vmatprep.subr.bf16.mxu1 %v5728_v44  ;;  %v5756_v44 = vpack.c.bf16 %v4443_v17, %v4441_v24  ;;  %v2600_v24 = vld [vmem:[#allocation3 + $0x62] sm:$0xff]  ;;  %v2601_v17 = vld [vmem:[#allocation3 + $0x72] sm:$0xff] }
 0x1e7   : > { %2368 = vmatmul.mubr.f32.gmra.mrb[26].mxu1 %v2257_v60  ;;  %v4448_v60 = vld [vmem:[%s8966_s4 + $0x840] sm:$0xff] }
 0x1e8   : > { %5731 = vmatpush1.bf16.msra.mxu1 %v5730_v0  ;;  %2373 = vmatprep.mubr.f32.mxu1 %v7472_v37  ;;  %v4444_v0 = vld [vmem:[%s8966_s4 + $0x820] sm:$0xff]  ;;  %v5766_v1 = vpack.c.bf16 %v4450_v61, %v4448_v60 }
 0x1e9   : > { %5733 = vmatprep.subr.bf16.mxu1 %v5732_v55  ;;  %v4449_v55 = vld [vmem:[%s8966_s4 + $0x848] sm:$0xff]  ;;  %v5762_v57 = vpack.c.bf16 %v4446_v52, %v4444_v0 }
 0x1ea   : > { %v5764_v58 = vpack.c.bf16 %v4451_v56, %v4449_v55 }
 0x1eb   : > { %2374 = vmatmul.mubr.f32.gmra.mrb[28].mxu1 %v2258_v5  ;;  %v4452_v5 = vld [vmem:[%s8966_s4 + $0x860] sm:$0xff] }
 0x1ec   : > { %5735 = vmatpush1.bf16.msra.mxu1 %v5734_v63  ;;  %2379 = vmatprep.mubr.f32.mxu1 %v7472_v37  ;;  %v4453_v63 = vld [vmem:[%s8966_s4 + $0x868] sm:$0xff]  ;;  %v5770_v28 = vpack.c.bf16 %v4454_v45, %v4452_v5 }
 0x1ed   : > { %5737 = vmatprep.subr.bf16.mxu1 %v5736_v14  ;;  %v4455_v14 = vld [vmem:[%s8966_s4 + $0x878] sm:$0xff] }
 0x1ee   : > { %v5768_v2 = vpack.c.bf16 %v4455_v14, %v4453_v63 }
 0x1ef   : > { %2380 = vmatmul.mubr.f32.gmra.mrb[30].mxu1 %v2259_v15  ;;  %v4461_v15 = vld [vmem:[%s8966_s4 + $0x8a8] sm:$0xff] }
 0x1f0   : > { %5739 = vmatpush1.bf16.msra.mxu1 %v5738_v7  ;;  %2385 = vmatprep.mubr.f32.mxu1 %v7472_v37  ;;  %v4457_v7 = vld [vmem:[%s8966_s4 + $0x888] sm:$0xff] }
 0x1f1   : > { %5741 = vmatprep.subr.bf16.mxu1 %v5740_v9  ;;  %v5772_v9 = vpack.c.bf16 %v4459_v8, %v4457_v7 }
 0x1f3   : > { %2386 = vmatmul.mubr.f32.gmra.mrb[32].mxu1 %v2260_v21  ;;  %v4465_v21 = vld [vmem:[%s8966_s4 + $0x8c8] sm:$0xff] }
 0x1f4   : > { %5743 = vmatpush1.bf16.msra.mxu1 %v5742_v41  ;;  %2391 = vmatprep.mubr.f32.mxu1 %v7472_v37  ;;  %v5776_v41 = vpack.c.bf16 %v4463_v16, %v4461_v15 }
 0x1f5   : > { %5745 = vmatprep.subr.bf16.mxu1 %v5744_v13  ;;  %v4460_v13 = vld [vmem:[%s8966_s4 + $0x8a0] sm:$0xff] }
 0x1f6   : > { %v5778_v25 = vpack.c.bf16 %v4462_v19, %v4460_v13  ;;  %v4584_v13 = vld [vmem:[%s8968_s6 + $0x400] sm:$0xff] }
 0x1f7   : > { %2392 = vmatmul.mubr.f32.gmra.mrb[34].mxu1 %v2261_v30 }
 0x1f8   : > { %5747 = vmatpush1.bf16.msra.mxu1 %v5746_v31  ;;  %2397 = vmatprep.mubr.f32.mxu1 %v7472_v37  ;;  %v5780_v31 = vpack.c.bf16 %v4467_v22, %v4465_v21  ;;  %v4585_v22 = vld [vmem:[%s8968_s6 + $0x408] sm:$0xff] }
 0x1f9   : > { %5749 = vmatprep.subr.bf16.mxu1 %v5748_v27  ;;  %v2431_v27 = vld [vmem:[#allocation3 + $0x71] sm:$0xff] }
 0x1fb   : > { %2398 = vmatmul.mubr.f32.gmra.mrb[36].mxu1 %v7699_v42  ;;  %v4445_v42 = vld [vmem:[%s8966_s4 + $0x828] sm:$0xff] }
 0x1fc   : > { %5751 = vmatpush1.bf16.msra.mxu1 %v5750_v4  ;;  %2403 = vmatprep.mubr.f32.mxu1 %v7472_v37  ;;  %v5760_v51 = vpack.c.bf16 %v4447_v48, %v4445_v42  ;;  %v2432_v4 = vld [vmem:[#allocation3 + $0x81] sm:$0xff]  ;;  %v477_v42 = vrot.slane %v6397_v47, %v476_v46 }
 0x1fd   : > { %5753 = vmatprep.subr.bf16.mxu1 %v5752_v35  ;;  %v2596_v35 = vld [vmem:[#allocation3 + $0x22] sm:$0xff] }
 0x1ff   : > { %2404 = vmatmul.mubr.f32.gmra.mrb[38].mxu1 %v7472_v37 }
 0x200   : > { %5755 = vmatpush1.bf16.msra.mxu1 %v5754_v43  ;;  %2531 = vmatprep.mubr.f32.mxu1 %v7472_v37  ;;  %v2603_v43 = vld [vmem:[#allocation3 + $0x92] sm:$0xff] }
 0x201   : > { %5757 = vmatprep.subr.bf16.mxu1 %v5756_v44  ;;  %v480_v44 = vsub.s32 1, %v7003_v23 }
 0x203   : > { %2532 = vmatmul.mubr.f32.vlgmr.msra.gmra.mrb[24].mxu1 %v2426_v53  ;;  %v481_v48 = vrot.slane %v6397_v47, %v480_v44  ;;  %v4594_v47 = vld [vmem:[%s8968_s6 + $0x450] sm:$0xff] }
 0x204   : > { %5759 = vmatpush1.bf16.msra.mxu1 %v5758_v50  ;;  %2537 = vmatprep.mubr.f32.mxu1 %v7472_v37 }
 0x205   : > { %5761 = vmatprep.subr.bf16.mxu1 %v5760_v51 }
 0x207   : > { %2538 = vmatmul.mubr.f32.gmra.mrb[26].mxu1 %v2427_v62 }
 0x208   : > { %5763 = vmatpush1.bf16.msra.mxu1 %v5762_v57  ;;  %2543 = vmatprep.mubr.f32.mxu1 %v7472_v37 }
 0x209   : > { %5765 = vmatprep.subr.bf16.mxu1 %v5764_v58 }
 0x20b   : > { %2544 = vmatmul.mubr.f32.gmra.mrb[28].mxu1 %v2428_v6 }
 0x20c   : > { %5767 = vmatpush1.bf16.msra.mxu1 %v5766_v1  ;;  %2549 = vmatprep.mubr.f32.mxu1 %v7472_v37 }
 0x20d   : > { %5769 = vmatprep.subr.bf16.mxu1 %v5768_v2 }
 0x20f   : > { %2550 = vmatmul.mubr.f32.gmra.mrb[30].mxu1 %v2429_v12 }
 0x210   : > { %5771 = vmatpush1.bf16.msra.mxu1 %v5770_v28  ;;  %2555 = vmatprep.mubr.f32.mxu1 %v7472_v37 }
 0x211   : > { %5773 = vmatprep.subr.bf16.mxu1 %v5772_v9 }
 0x213   : > { %2556 = vmatmul.mubr.f32.gmra.mrb[32].mxu1 %v2430_v20 }
 0x214   : > { %5775 = vmatpush1.bf16.msra.mxu1 %v5774_v18  ;;  %2561 = vmatprep.mubr.f32.mxu1 %v7472_v37  ;;  %v4471_v37 = vld [vmem:[%s8966_s4 + $0x8f8] sm:$0xff]  ;;  %v4484_v18 = vld [vmem:[%s8968_s6 + $0xe0] sm:$0xff] }
 0x215   : > { %5777 = vmatprep.subr.bf16.mxu1 %v5776_v41  ;;  %v5784_v30 = vpack.c.bf16 %v4471_v37, %v4469_v29  ;;  %v4485_v41 = vld [vmem:[%s8968_s6 + $0xe8] sm:$0xff]  ;;  %v5816_v29 = vpack.c.bf16 %v4487_v54, %v4486_v26  ;;  %v4587_v37 = vld [vmem:[%s8968_s6 + $0x418] sm:$0xff] }
 0x216   : > { %v5812_v21 = vpack.c.bf16 %v4485_v41, %v4484_v18 }
 0x217   : > { %2562 = vmatmul.mubr.f32.gmra.mrb[34].mxu1 %v2431_v27  ;;  %v4586_v27 = vld [vmem:[%s8968_s6 + $0x410] sm:$0xff] }
 0x218   : > { %5779 = vmatpush1.bf16.msra.mxu1 %v5778_v25  ;;  %2567 = vmatprep.mubr.f32.mxu1 %v8151_v10 }
 0x219   : > { %5781 = vmatprep.subr.bf16.mxu1 %v5780_v31  ;;  %v8198_v31 = vpack.c.bf16 %v4585_v22, %v4584_v13  ;;  %5813 = vmatprep.subr.bf16.mxu0 %v5812_v21 }
 0x21a   : > { %5815 = vmatpush3.bf16.msra.mxu0 %v5812_v21 }
 0x21b   : > { %2568 = vmatmul.mubr.f32.gmra.mrb[36].mxu1 %v2432_v4  ;;  %5817 = vmatprep.subr.bf16.mxu0 %v5816_v29  ;;  %v8225_v4 = vpack.c.bf16 %v2861_v33, %v2860_v32 }
 0x21c   : > { %5783 = vmatpush1.bf16.msra.mxu1 %v5782_v49  ;;  %2573 = vmatprep.mubr.f32.mxu1 %v8151_v10  ;;  %v8215_v49 = vpack.c.bf16 %v4587_v37, %v4586_v27 }
 0x21d   : > { %5785 = vmatprep.subr.bf16.mxu1 %v5784_v30  ;;  %v2876_v30 = vld [vmem:[#allocation4 + $0x1] sm:$0xff] }
 0x21e   : > { %5819 = vmatpush3.bf16.msra.mxu0 %v5816_v29  ;;  %4976 = vmatprep.mubr.f32.mxu0 %v2876_v30 }
 0x21f   : > { %2574 = vmatmul.mubr.f32.gmra.mrb[38].mxu1 %v2433_v34  ;;  %v4588_v34 = vld [vmem:[%s8968_s6 + $0x420] sm:$0xff]  ;;  %5821 = vmatprep.subr.bf16.mxu0 %v8225_v4 }
 0x220   : > { %5787 = vmatpush1.bf16.msra.mxu1 %v5786_v3  ;;  %2701 = vmatprep.mubr.f32.mxu1 %v8151_v10  ;;  %v4589_v3 = vld [vmem:[%s8968_s6 + $0x428] sm:$0xff] }
 0x221   : > { %6076 = vmatprep.subr.bf16.mxu1 %v8198_v31 }
 0x223   : > { %2702 = vmatmul.mubr.f32.vlgmr.msra.gmra.mrb[24].mxu1 %v2596_v35  ;;  %v8233_v35 = vpack.c.bf16 %v4589_v3, %v4588_v34 }
 0x224   : > { %2707 = vmatprep.mubr.f32.mxu1 %v8151_v10  ;;  %6084 = vmatpush3.bf16.msra.mxu1 %v8198_v31 }
 0x225   : > { %6077 = vmatprep.subr.bf16.mxu1 %v8215_v49 }
 0x227   : > { %2708 = vmatmul.mubr.f32.gmra.mrb[26].mxu1 %v2597_v36  ;;  %v4590_v36 = vld [vmem:[%s8968_s6 + $0x430] sm:$0xff] }
 0x228   : > { %2713 = vmatprep.mubr.f32.mxu1 %v8151_v10  ;;  %6085 = vmatpush3.bf16.msra.mxu1 %v8215_v49 }
 0x229   : > { %6078 = vmatprep.subr.bf16.mxu1 %v8233_v35 }
 0x22b   : > { %2714 = vmatmul.mubr.f32.gmra.mrb[28].mxu1 %v2598_v38  ;;  %v4591_v38 = vld [vmem:[%s8968_s6 + $0x438] sm:$0xff] }
 0x22c   : > { %2719 = vmatprep.mubr.f32.mxu1 %v8151_v10  ;;  %6086 = vmatpush3.bf16.msra.mxu1 %v8233_v35 }
 0x22f   : > { %2720 = vmatmul.mubr.f32.gmra.mrb[30].mxu1 %v2599_v39  ;;  %v8244_v39 = vpack.c.bf16 %v4591_v38, %v4590_v36 }
 0x230   : > { %2725 = vmatprep.mubr.f32.mxu1 %v8151_v10 }
 0x231   : > { %6079 = vmatprep.subr.bf16.mxu1 %v8244_v39 }
 0x232   : > { %6087 = vmatpush3.bf16.msra.mxu1 %v8244_v39 }
 0x233   : > { %2726 = vmatmul.mubr.f32.gmra.mrb[32].mxu1 %v2600_v24  ;;  %v4592_v24 = vld [vmem:[%s8968_s6 + $0x440] sm:$0xff] }
 0x234   : > { %2731 = vmatprep.mubr.f32.mxu1 %v8151_v10 }
 0x237   : > { %2732 = vmatmul.mubr.f32.gmra.mrb[34].mxu1 %v2601_v17  ;;  %v4593_v17 = vld [vmem:[%s8968_s6 + $0x448] sm:$0xff] }
 0x238   : > { %2737 = vmatprep.mubr.f32.mxu1 %v8151_v10 }
 0x23b   : > { %2738 = vmatmul.mubr.f32.gmra.mrb[36].mxu1 %v7934_v40 }
 0x23c   : > { %2743 = vmatprep.mubr.f32.mxu1 %v8151_v10 }
 0x23f   : > { %2744 = vmatmul.mubr.f32.gmra.mrb[38].mxu1 %v2603_v43  ;;  %v8254_v43 = vpack.c.bf16 %v4593_v17, %v4592_v24  ;;  %v8311_v24 = vld [vmem:[%s8965_s3] ss:$0 sm:$0xff] }
 0x241   : > { %6080 = vmatprep.subr.bf16.mxu1 %v8254_v43 }
 0x242   : > { %6088 = vmatpush3.bf16.msra.mxu1 %v8254_v43 }
 0x25c   : > { %v668_v50 = vpop.f32.mrb[0].mxu0 }
 0x25d   : > { %v6092_v40 = vadd.f32 %v668_v50, %v477_v42  ;;  %v670_v51 = vpop.f32.mrb[1].mxu0  ;;  %v4596_v50 = vld [vmem:[%s8968_s6 + $0x460] sm:$0xff] }
 0x25e   : > { %v6093_v0 = vadd.f32 %v670_v51, %v481_v48 }
 0x25f   : > { %1041 = vst [vmem:[#allocation2 + $0x11] sm:$0xff] %v6092_v40  ;;  %v4597_v40 = vld [vmem:[%s8968_s6 + $0x468] sm:$0xff] }
 0x260   : > { %v674_v52 = vpop.f32.mrb[2].mxu0  ;;  %999 = vrot.lane.b32.xlu0 %v6093_v0, %s6464_s13  ;;  %v8274_v51 = vpack.c.bf16 %v4597_v40, %v4596_v50  ;;  %v4598_v0 = vld [vmem:[%s8968_s6 + $0x470] sm:$0xff] }
 0x261   : > { %v6094_v53 = vadd.f32 %v674_v52, %v477_v42  ;;  %v676_v55 = vpop.f32.mrb[3].mxu0  ;;  %v4599_v52 = vld [vmem:[%s8968_s6 + $0x478] sm:$0xff] }
 0x262   : > { %v6095_v56 = vadd.f32 %v676_v55, %v481_v48  ;;  %v1050_v55 = vld [vmem:[#allocation2 + $0x8] sm:$0x3] }
 0x263   : > { %1042 = vst [vmem:[#allocation2 + $0x21] sm:$0xff] %v6094_v53  ;;  %v8284_v53 = vpack.c.bf16 %v4599_v52, %v4598_v0 }
 0x264   : > { %v680_v57 = vpop.f32.mrb[4].mxu0  ;;  %1001 = vrot.lane.b32.xlu0 %v6095_v56, %s6464_s13 }
 0x265   : > { %v6096_v58 = vadd.f32 %v680_v57, %v477_v42  ;;  %v682_v60 = vpop.f32.mrb[5].mxu0 }
 0x266   : > { %v6097_v61 = vadd.f32 %v682_v60, %v481_v48  ;;  %v1066_v60 = vld [vmem:[#allocation2 + $0x18] sm:$0x3] }
 0x267   : > { %1043 = vst [vmem:[#allocation2 + $0x31] sm:$0xff] %v6096_v58  ;;  %v1065_v58 = vld [vmem:[#allocation2 + $0x10] sm:$0xff]  ;;  %v1052_v21 = vld [vmem:[#allocation2 + $0x18] sm:$0x3] }
 0x268   : > { %v686_v62 = vpop.f32.mrb[6].mxu0  ;;  %1003 = vrot.lane.b32.xlu1 %v6097_v61, %s6464_s13 }
 0x269   : > { %v6098_v63 = vadd.f32 %v686_v62, %v477_v42  ;;  %v688_v14 = vpop.f32.mrb[7].mxu0  ;;  %v1081_v62 = vadd.f32 %v8151_v10, %v1065_v58 }
 0x26a   : > { %v6099_v1 = vadd.f32 %v688_v14, %v481_v48  ;;  %v1099_v57 = vld [vmem:[#allocation2 + $0x28] sm:$0x3]  ;;  %v1098_v61 = vld [vmem:[#allocation2 + $0x20] sm:$0xff] }
 0x26b   : > { %1044 = vst [vmem:[#allocation2 + $0x41] sm:$0xff] %v6098_v63  ;;  %v1082_v63 = vadd.f32 %v1066_v60, %v1050_v55  ;;  %v1114_v14 = vadd.f32 %v1098_v61, %v1081_v62 }
 0x26c   : > { %v692_v2 = vpop.f32.mrb[8].mxu0  ;;  %1005 = vrot.lane.b32.xlu1 %v6099_v1, %s6464_s13 }
 0x26d   : > { %v6100_v5 = vadd.f32 %v692_v2, %v477_v42  ;;  %v694_v45 = vpop.f32.mrb[9].mxu0  ;;  %v1115_v1 = vadd.f32 %v1099_v57, %v1082_v63 }
 0x26e   : > { %v6101_v6 = vadd.f32 %v694_v45, %v481_v48  ;;  %v1083_v45 = vadd.f32 %v1098_v61, %v1065_v58  ;;  %v1056_v37 = vld [vmem:[#allocation2 + $0x38] sm:$0x3] }
 0x26f   : > { %1045 = vst [vmem:[#allocation2 + $0x51] sm:$0xff] %v6100_v5 }
 0x270   : > { %v698_v7 = vpop.f32.mrb[10].mxu0  ;;  %1007 = vrot.lane.b32.xlu0 %v6101_v6, %s6464_s13  ;;  %v1147_v6 = vrot.slane %v1114_v14, 1 }
 0x271   : > { %v6102_v8 = vadd.f32 %v698_v7, %v477_v42  ;;  %v700_v28 = vpop.f32.mrb[11].mxu0  ;;  %v1148_v7 = vrot.slane %v1115_v1, 1 }
 0x272   : > { %v6103_v9 = vadd.f32 %v700_v28, %v481_v48  ;;  %v1102_v2 = vld [vmem:[#allocation2 + $0x40] sm:$0xff]  ;;  %v1189_v28 = vrot.slane %v1115_v1, 2  ;;  %v1072_v29 = vld [vmem:[#allocation2 + $0x48] sm:$0x3] }
 0x273   : > { %1046 = vst [vmem:[#allocation2 + $0x61] sm:$0xff] %v6102_v8  ;;  %v1188_v8 = vrot.slane %v1114_v14, 2 }
 0x274   : > { %v704_v11 = vpop.f32.mrb[12].mxu0  ;;  %1009 = vrot.lane.b32.xlu1 %v6103_v9, %s6464_s13  ;;  %v1103_v9 = vld [vmem:[#allocation2 + $0x48] sm:$0x3] }
 0x275   : > { %v6104_v59 = vadd.f32 %v704_v11, %v477_v42  ;;  %v706_v12 = vpop.f32.mrb[13].mxu0  ;;  %v1190_v18 = vsel %vm1187_vm3, %v1188_v8, %v1189_v28 }
 0x276   : > { %v6105_v15 = vadd.f32 %v706_v12, %v481_v48  ;;  %v1069_v12 = vld [vmem:[#allocation2 + $0x30] sm:$0xff]  ;;  %v1105_v55 = vld [vmem:[#allocation2 + $0x58] sm:$0x3] }
 0x277   : > { %1047 = vst [vmem:[#allocation2 + $0x71] sm:$0xff] %v6104_v59  ;;  %v1054_v59 = vld [vmem:[#allocation2 + $0x28] sm:$0x3]  ;;  %v1085_v41 = vadd.f32 %v1098_v61, %v1069_v12  ;;  %v1116_v26 = vadd.f32 %v1083_v45, %v1069_v12  ;;  %v1087_v30 = vadd.f32 %v1102_v2, %v1069_v12  ;;  %v1104_v36 = vld [vmem:[#allocation2 + $0x50] sm:$0xff]  ;;  %v1074_v62 = vld [vmem:[#allocation2 + $0x58] sm:$0x3] }
 0x278   : > { %v710_v16 = vpop.f32.mrb[14].mxu0  ;;  %1011 = vrot.lane.b32.xlu0 %v6105_v15, %s6464_s13  ;;  %v1070_v15 = vld [vmem:[#allocation2 + $0x38] sm:$0x3]  ;;  %v1058_v61 = vld [vmem:[#allocation2 + $0x48] sm:$0x3]  ;;  %v1089_v63 = vadd.f32 %v1104_v36, %v1102_v2 }
 0x279   : > { %v6106_v19 = vadd.f32 %v710_v16, %v477_v42  ;;  %v712_v20 = vpop.f32.mrb[15].mxu0  ;;  %v4595_v42 = vld [vmem:[%s8968_s6 + $0x458] sm:$0xff]  ;;  %v1149_v16 = vsel %vm1146_vm2, %v1147_v6, %v1148_v7  ;;  %v1086_v13 = vadd.f32 %v1070_v15, %v1054_v59  ;;  %v1118_v54 = vadd.f32 %v1102_v2, %v1085_v41 }
 0x27a   : > { %v6107_v25 = vadd.f32 %v712_v20, %v481_v48  ;;  %v8264_v48 = vpack.c.bf16 %v4595_v42, %v4594_v47  ;;  %v1101_v20 = vld [vmem:[#allocation2 + $0x38] sm:$0x3]  ;;  %v1179_v22 = vadd.f32 %v1149_v16, %v1114_v14  ;;  %v1150_v34 = vrot.slane %v1116_v26, 1  ;;  %v1106_v14 = vld [vmem:[#allocation2 + $0x60] sm:$0xff]  ;;  %v1107_v59 = vld [vmem:[#allocation2 + $0x68] sm:$0x3] }
 0x27b   : > { %1048 = vst [vmem:[#allocation2 + $0x81] sm:$0xff] %v6106_v19  ;;  %v1068_v19 = vld [vmem:[#allocation2 + $0x28] sm:$0x3]  ;;  %v1119_v27 = vadd.f32 %v1103_v9, %v1086_v13  ;;  %v1191_v3 = vrot.slane %v1116_v26, 2  ;;  %v1153_v17 = vrot.slane %v1118_v54, 1  ;;  %v1194_v42 = vrot.slane %v1118_v54, 2 }
 0x27c   : > { %1013 = vrot.lane.b32.xlu1 %v6107_v25, %s6464_s13  ;;  %6081 = vmatprep.subr.bf16.mxu1 %v8264_v48  ;;  %s8292_s13 = scalar_lea.vmem [#allocation5], %s6316_s24  ;;  %v1084_v25 = vadd.f32 %v1068_v19, %v1052_v21  ;;  %v1220_v32 = vadd.f32 %v1190_v18, %v1179_v22  ;;  %v1120_v60 = vadd.f32 %v1104_v36, %v1087_v30  ;;  %v1060_v16 = vld [vmem:[#allocation2 + $0x58] sm:$0x3]  ;;  %v1076_v18 = vld [vmem:[#allocation2 + $0x68] sm:$0x3]  ;;  %s6318_s24 = smul.u32 3072, %s6536_s9 }
 0x27d   : > { %6089 = vmatpush3.bf16.msra.mxu1 %v8264_v48  ;;  %v1154_v47 = vrot.slane %v1119_v27, 1  ;;  %v1195_v50 = vrot.slane %v1119_v27, 2  ;;  %v1090_v12 = vadd.f32 %v1074_v62, %v1058_v61  ;;  %v1122_v15 = vadd.f32 %v1106_v14, %v1089_v63  ;;  %s4148_s26 = sshll.u32 %s8292_s13, 4  ;;  %s8921_s9 = scalar_lea.sflag [#allocation6], %s296_s22  ;;  %s8913_s26 = int_to_ptr.vmem [resolvable:$true] %s4148_s26 }
 0x27e   : > { %6082 = vmatprep.subr.bf16.mxu1 %v8274_v51  ;;  %v1117_v33 = vadd.f32 %v1101_v20, %v1084_v25  ;;  %v1228_v40 = vmul.f32 0.11111111, %v1220_v32  ;;  %v1156_v9 = vrot.slane %v1120_v60, 1  ;;  %v1091_v20 = vadd.f32 %v1106_v14, %v1104_v36  ;;  %v1108_v21 = vld [vmem:[#allocation2 + $0x70] sm:$0xff]  ;;  %v1109_v27 = vld [vmem:[#allocation2 + $0x78] sm:$0x3]  ;;  %p6406_p0 = scmp.lt.s32.totalorder %s8913_s26, %s6404_s25 }
 0x27f   : > { %v1155_v57 = vsel %vm1146_vm2, %v1153_v17, %v1154_v47  ;;  %v1196_v58 = vsel %vm1187_vm3, %v1194_v42, %v1195_v50  ;;  %v1123_v25 = vadd.f32 %v1107_v59, %v1090_v12  ;;  %s6399_s17 = scalar_lea.vmem %s8913_s26, 3072 }
 0x280   : > { %v1151_v0 = vrot.slane %v1117_v33, 1  ;;  %v1192_v52 = vrot.slane %v1117_v33, 2  ;;  %v1243_v1 = vadd.f32 %v8311_v24, %v1228_v40  ;;  %v1092_v33 = vadd.f32 %v1076_v18, %v1060_v16  ;;  %p6400_p11 = scmp.ne.s32.totalorder %s8913_s26, %s6399_s17  ;;  %p6407_p1 = scmp.lt.s32.totalorder %s6405_s19, %s6399_s17 }
 0x281   : > { %6090 = vmatpush3.bf16.msra.mxu1 %v8274_v51  ;;  %v1160_v17 = vrot.slane %v1123_v25, 1  ;;  %v1201_v47 = vrot.slane %v1123_v25, 2  ;;  %v1124_v50 = vadd.f32 %v1108_v21, %v1091_v20 }
 0x282   : > { %6083 = vmatprep.subr.bf16.mxu1 %v8284_v53  ;;  %v1152_v45 = vsel %vm1146_vm2, %v1150_v34, %v1151_v0  ;;  %v1193_v6 = vsel %vm1187_vm3, %v1191_v3, %v1192_v52  ;;  %v1062_v34 = vld [vmem:[#allocation2 + $0x68] sm:$0x3]  ;;  %v1078_v3 = vld [vmem:[#allocation2 + $0x78] sm:$0x3]  ;;  %v1125_v40 = vadd.f32 %v1109_v27, %v1092_v33  ;;  %v1093_v0 = vadd.f32 %v1108_v21, %v1106_v14  ;;  %v1110_v52 = vld [vmem:[#allocation2 + $0x80] sm:$0xff]  ;;  %p6401_p12 = pnand %p6400_p11, %p6553_p5  ;;  %p6408_p2 = por %p6407_p1, %p6406_p0 }
 0x283   : > { %v1180_v8 = vadd.f32 %v1152_v45, %v1116_v26  ;;  %v1159_v26 = vrot.slane %v1122_v15, 1  ;;  %v1094_v61 = vadd.f32 %v1078_v3, %v1062_v34  ;;  %v1162_v63 = vrot.slane %v1124_v50, 1  ;;  %v2863_v33 = vld [vmem:[%s8968_s6 + $0x18] sm:$0xff] }
 0x284   : > { %v1204_v45 = vrot.slane %v1125_v40, 2  ;;  %v1095_v59 = vadd.f32 %v1110_v52, %v1108_v21  ;;  %p6402_p13 = pneg %p6401_p12 }
 0x285   : > { %6091 = vmatpush3.bf16.msra.mxu1 %v8284_v53  ;;  %v1221_v41 = vadd.f32 %v1193_v6, %v1180_v8  ;;  %v1126_v6 = vadd.f32 %v1110_v52, %v1093_v0 }
 0x286   : > { %p6409_p3 = pnand %p6408_p2, %p6402_p13 }
 0x287   : > { %v1165_v18 = vrot.slane %v1126_v6, 1  ;;  %v1206_v20 = vrot.slane %v1126_v6, 2 }
 0x2d2   : > { %v1000_v56 = vpop.permute.xlu0 %999 }
 0x2d3   : > { %1024 = vst.msk [vmem:[%s8292_s13] sm:$0xff] %vm1023_vm0, %v1000_v56 }
 0x2d4   : > { %1026 = vst.msk [vmem:[%s8292_s13 + $0x8] sm:$0xff] %vm1025_vm1, %v1000_v56  ;;  %v1088_v56 = vadd.f32 %v1072_v29, %v1056_v37  ;;  %v1229_v37 = vmul.f32 0.11111111, %v1221_v41  ;;  %v1113_v41 = vld [vmem:[#allocation2 + $0x98] sm:$0x3] }
 0x2d5   : > { %1252 = vst.msk [vmem:[%s8292_s13] sm:$0xff] %vm1251_vm4, %v1243_v1  ;;  %v1163_v1 = vrot.slane %v1125_v40, 1 }
 0x2d6   : > { %v1002_v5 = vpop.permute.xlu0 %1001  ;;  %v1121_v28 = vadd.f32 %v1105_v55, %v1088_v56  ;;  %v1244_v42 = vadd.f32 %v8311_v24, %v1229_v37  ;;  %v1111_v55 = vld [vmem:[#allocation2 + $0x88] sm:$0x3] }
 0x2d7   : > { %1027 = vst.msk [vmem:[%s8292_s13 + $0x18] sm:$0xff] %vm1023_vm0, %v1002_v5 }
 0x2d8   : > { %1028 = vst.msk [vmem:[%s8292_s13 + $0x20] sm:$0xff] %vm1025_vm1, %v1002_v5  ;;  %v1181_v5 = vadd.f32 %v1155_v57, %v1118_v54  ;;  %v1157_v13 = vrot.slane %v1121_v28, 1  ;;  %v1198_v19 = vrot.slane %v1121_v28, 2  ;;  %v1200_v54 = vrot.slane %v1122_v15, 2 }
 0x2d9   : > { %v1161_v57 = vsel %vm1146_vm2, %v1159_v26, %v1160_v17  ;;  %1253 = vst.msk [vmem:[%s8292_s13 + $0x18] sm:$0xff] %vm1251_vm4, %v1244_v42  ;;  %v1164_v28 = vsel %vm1146_vm2, %v1162_v63, %v1163_v1 }
 0x2da   : > { %v1004_v11 = vpop.permute.xlu1 %1003  ;;  %v1222_v2 = vadd.f32 %v1196_v58, %v1181_v5  ;;  %v1158_v30 = vsel %vm1146_vm2, %v1156_v9, %v1157_v13  ;;  %v1202_v58 = vsel %vm1187_vm3, %v1200_v54, %v1201_v47  ;;  %v1183_v62 = vadd.f32 %v1161_v57, %v1122_v15  ;;  %v1064_v9 = vld [vmem:[#allocation2 + $0x78] sm:$0x3] }
 0x2db   : > { %1029 = vst.msk [vmem:[%s8292_s13 + $0x30] sm:$0xff] %vm1023_vm0, %v1004_v11  ;;  %v1203_v5 = vrot.slane %v1124_v50, 2  ;;  %v1184_v15 = vadd.f32 %v1164_v28, %v1124_v50  ;;  %v1128_v54 = vadd.f32 %v8151_v10, %v1095_v59  ;;  %v2867_v28 = vld [vmem:[%s8968_s6 + $0x38] sm:$0xff] }
 0x2dc   : > { %1030 = vst.msk [vmem:[%s8292_s13 + $0x38] sm:$0xff] %vm1025_vm1, %v1004_v11  ;;  %v1197_v11 = vrot.slane %v1120_v60, 2  ;;  %v1230_v22 = vmul.f32 0.11111111, %v1222_v2  ;;  %v1224_v8 = vadd.f32 %v1202_v58, %v1183_v62  ;;  %v2766_v2 = vld [vmem:[%s8967_s5] sm:$0x3] }
 0x2dd   : > { %v1205_v16 = vsel %vm1187_vm3, %v1203_v5, %v1204_v45  ;;  %v8361_v27 = vrot.slane %v2766_v2, %v476_v46  ;;  %v1168_v46 = vrot.slane %v1128_v54, 1  ;;  %v1209_v17 = vrot.slane %v1128_v54, 2 }
 0x2de   : > { %v1006_v38 = vpop.permute.xlu1 %1005  ;;  %v1199_v32 = vsel %vm1187_vm3, %v1197_v11, %v1198_v19  ;;  %v1245_v36 = vadd.f32 %v8311_v24, %v1230_v22  ;;  %v1080_v11 = vld [vmem:[#allocation2 + $0x88] sm:$0x3]  ;;  %v1232_v13 = vmul.f32 0.11111111, %v1224_v8  ;;  %v1225_v21 = vadd.f32 %v1205_v16, %v1184_v15  ;;  %v2866_v8 = vld [vmem:[%s8968_s6 + $0x30] sm:$0xff]  ;;  %v2868_v16 = vld [vmem:[%s8968_s6 + $0x40] sm:$0xff] }
 0x2df   : > { %1031 = vst.msk [vmem:[%s8292_s13 + $0x48] sm:$0xff] %vm1023_vm0, %v1006_v38  ;;  %v1096_v26 = vadd.f32 %v1080_v11, %v1064_v9 }
 0x2e0   : > { %1032 = vst.msk [vmem:[%s8292_s13 + $0x50] sm:$0xff] %vm1025_vm1, %v1006_v38  ;;  %v1182_v38 = vadd.f32 %v1158_v30, %v1120_v60  ;;  %v1233_v34 = vmul.f32 0.11111111, %v1225_v21 }
 0x2e1   : > { %1254 = vst.msk [vmem:[%s8292_s13 + $0x30] sm:$0xff] %vm1251_vm4, %v1245_v36  ;;  %v1129_v36 = vadd.f32 %v1113_v41, %v1096_v26 }
 0x2e2   : > { %v1008_v7 = vpop.permute.xlu0 %1007  ;;  %v1223_v56 = vadd.f32 %v1199_v32, %v1182_v38  ;;  %v2862_v32 = vld [vmem:[%s8968_s6 + $0x10] sm:$0xff]  ;;  %v8374_v38 = vrot.slane %v2766_v2, %v480_v44  ;;  %v1248_v47 = vadd.f32 %v8311_v24, %v1233_v34 }
 0x2e3   : > { %1033 = vst.msk [vmem:[%s8292_s13 + $0x60] sm:$0xff] %vm1023_vm0, %v1008_v7  ;;  %v1169_v50 = vrot.slane %v1129_v36, 1  ;;  %v1210_v40 = vrot.slane %v1129_v36, 2  ;;  %v5824_v52 = vpack.c.bf16 %v2863_v33, %v2862_v32  ;;  %v2873_v32 = vld [vmem:[%s8968_s6 + $0x68] sm:$0xff] }
 0x2e4   : > { %1034 = vst.msk [vmem:[%s8292_s13 + $0x68] sm:$0xff] %vm1025_vm1, %v1008_v7  ;;  %v1231_v14 = vmul.f32 0.11111111, %v1223_v56  ;;  %v1127_v7 = vadd.f32 %v1111_v55, %v1094_v61  ;;  %v2864_v61 = vld [vmem:[%s8968_s6 + $0x20] sm:$0xff] }
 0x2e5   : > { %v1170_v23 = vsel %vm1146_vm2, %v1168_v46, %v1169_v50  ;;  %v1211_v44 = vsel %vm1187_vm3, %v1209_v17, %v1210_v40  ;;  %v2874_v17 = vld [vmem:[%s8968_s6 + $0x70] sm:$0xff] }
 0x2e6   : > { %v1010_v29 = vpop.permute.xlu1 %1009  ;;  %v1246_v12 = vadd.f32 %v8311_v24, %v1231_v14  ;;  %v1166_v19 = vrot.slane %v1127_v7, 1  ;;  %v1207_v22 = vrot.slane %v1127_v7, 2  ;;  %v1186_v62 = vadd.f32 %v1170_v23, %v1128_v54 }
 0x2e7   : > { %1035 = vst.msk [vmem:[%s8292_s13 + $0x78] sm:$0xff] %vm1023_vm0, %v1010_v29 }
 0x2e8   : > { %1036 = vst.msk [vmem:[%s8292_s13 + $0x80] sm:$0xff] %vm1025_vm1, %v1010_v29  ;;  %v1247_v29 = vadd.f32 %v8311_v24, %v1232_v13  ;;  %v1167_v37 = vsel %vm1146_vm2, %v1165_v18, %v1166_v19  ;;  %v1208_v30 = vsel %vm1187_vm3, %v1206_v20, %v1207_v22  ;;  %v1227_v5 = vadd.f32 %v1211_v44, %v1186_v62  ;;  %v2869_v18 = vld [vmem:[%s8968_s6 + $0x48] sm:$0xff]  ;;  %v2870_v22 = vld [vmem:[%s8968_s6 + $0x50] sm:$0xff] }
 0x2e9   : > { %1255 = vst.msk [vmem:[%s8292_s13 + $0x48] sm:$0xff] %vm1251_vm4, %v1246_v12  ;;  %v1185_v3 = vadd.f32 %v1167_v37, %v1126_v6  ;;  %1257 = vst.msk [vmem:[%s8292_s13 + $0x78] sm:$0xff] %vm1251_vm4, %v1248_v47  ;;  %v5832_v12 = vpack.c.bf16 %v2867_v28, %v2866_v8  ;;  %v5836_v19 = vpack.c.bf16 %v2869_v18, %v2868_v16  ;;  %v2875_v47 = vld [vmem:[%s8968_s6 + $0x78] sm:$0xff]  ;;  %v4490_v62 = vld [vmem:[%s8968_s6 + $0x110] sm:$0xff] }
 0x2ea   : > { %v1012_v60 = vpop.permute.xlu0 %1011  ;;  %1256 = vst.msk [vmem:[%s8292_s13 + $0x60] sm:$0xff] %vm1251_vm4, %v1247_v29  ;;  %v4495_v28 = vld [vmem:[%s8968_s6 + $0x138] sm:$0xff]  ;;  %v3111_v16 = vld [vmem:[#allocation4 + $0x2] sm:$0xff] }
 0x2eb   : > { %1037 = vst.msk [vmem:[%s8292_s13 + $0x90] sm:$0xff] %vm1023_vm0, %v1012_v60  ;;  %v1226_v42 = vadd.f32 %v1208_v30, %v1185_v3  ;;  %v2872_v30 = vld [vmem:[%s8968_s6 + $0x60] sm:$0xff] }
 0x2ec   : > { %1038 = vst.msk [vmem:[%s8292_s13 + $0x98] sm:$0xff] %vm1025_vm1, %v1012_v60  ;;  %v2865_v60 = vld [vmem:[%s8968_s6 + $0x28] sm:$0xff]  ;;  %v5844_v36 = vpack.c.bf16 %v2873_v32, %v2872_v30 }
 0x2ed   : > { %v1234_v57 = vmul.f32 0.11111111, %v1226_v42  ;;  %v5828_v6 = vpack.c.bf16 %v2865_v60, %v2864_v61  ;;  %v4505_v30 = vld [vmem:[%s8968_s6 + $0x188] sm:$0xff] }
 0x2ee   : > { %v1014_v25 = vpop.permute.xlu1 %1013 }
 0x2ef   : > { %1039 = vst.msk [vmem:[%s8292_s13 + $0xa8] sm:$0xff] %vm1023_vm0, %v1014_v25  ;;  %v1249_v63 = vadd.f32 %v8311_v24, %v1234_v57 }
 0x2f0   : > { %1040 = vst.msk [vmem:[%s8292_s13 + $0xb0] sm:$0xff] %vm1025_vm1, %v1014_v25  ;;  %v2871_v25 = vld [vmem:[%s8968_s6 + $0x58] sm:$0xff] }
 0x2f1   : > { %1258 = vst.msk [vmem:[%s8292_s13 + $0x90] sm:$0xff] %vm1251_vm4, %v1249_v63  ;;  %v5840_v29 = vpack.c.bf16 %v2871_v25, %v2870_v22  ;;  %v4491_v63 = vld [vmem:[%s8968_s6 + $0x118] sm:$0xff]  ;;  %v4501_v22 = vld [vmem:[%s8968_s6 + $0x168] sm:$0xff] }
 0x2f6   : > { %v2703_v0 = vpop.f32.mrb[24].mxu1 }
 0x2f7   : > { %v2778_v55 = vadd.f32 %v8361_v27, %v2703_v0  ;;  %v2705_v56 = vpop.f32.mrb[25].mxu1  ;;  %v5848_v0 = vpack.c.bf16 %v2875_v47, %v2874_v17  ;;  %v4508_v17 = vld [vmem:[%s8968_s6 + $0x1a0] sm:$0xff]  ;;  %v4509_v47 = vld [vmem:[%s8968_s6 + $0x1a8] sm:$0xff] }
 0x2f8   : > { %v2779_v58 = vadd.f32 %v8374_v38, %v2705_v56  ;;  %v4489_v56 = vld [vmem:[%s8968_s6 + $0x108] sm:$0xff] }
 0x2f9   : > { %2844 = vst [vmem:[#allocation4 + $0x11] sm:$0xff] %v2778_v55  ;;  %4977 = vmatmul.mubr.f32.vlgmr.msra.gmra.mrb[16].mxu0 %v2778_v55  ;;  %v4488_v55 = vld [vmem:[%s8968_s6 + $0x100] sm:$0xff] }
 0x2fa   : > { %v2709_v1 = vpop.f32.mrb[26].mxu1  ;;  %2802 = vrot.lane.b32.xlu0 %v2779_v58, %s6465_s10  ;;  %5823 = vmatpush3.bf16.msra.mxu0 %v8225_v4  ;;  %v1235_v4 = vmul.f32 0.11111111, %v1227_v5  ;;  %v5852_v58 = vpack.c.bf16 %v4489_v56, %v4488_v55  ;;  %v4493_v5 = vld [vmem:[%s8968_s6 + $0x128] sm:$0xff]  ;;  %v4511_v55 = vld [vmem:[%s8968_s6 + $0x1b8] sm:$0xff] }
 0x2fb   : > { %v2780_v14 = vadd.f32 %v8361_v27, %v2709_v1  ;;  %v2711_v45 = vpop.f32.mrb[27].mxu1  ;;  %5825 = vmatprep.subr.bf16.mxu0 %v5824_v52 }
 0x2fc   : > { %v2781_v7 = vadd.f32 %v8374_v38, %v2711_v45  ;;  %v1250_v11 = vadd.f32 %v8311_v24, %v1235_v4 }
 0x2fd   : > { %2845 = vst [vmem:[#allocation4 + $0x21] sm:$0xff] %v2780_v14  ;;  %4979 = vmatprep.mubr.f32.mxu0 %v2780_v14 }
 0x2fe   : > { %v2715_v9 = vpop.f32.mrb[28].mxu1  ;;  %2804 = vrot.lane.b32.xlu1 %v2781_v7, %s6465_s10  ;;  %5827 = vmatpush3.bf16.msra.mxu0 %v5824_v52  ;;  %1259 = vst.msk [vmem:[%s8292_s13 + $0xa8] sm:$0xff] %vm1251_vm4, %v1250_v11 }
 0x2ff   : > { %v2782_v59 = vadd.f32 %v8361_v27, %v2715_v9  ;;  %v2717_v2 = vpop.f32.mrb[29].mxu1  ;;  %5829 = vmatprep.subr.bf16.mxu0 %v5828_v6 }
 0x300   : > { %v2783_v15 = vadd.f32 %v8374_v38, %v2717_v2  ;;  %v8490_v1 = vld [vmem:[#allocation4 + $0x10] sm:$0xff]  ;;  %v4497_v2 = vld [vmem:[%s8968_s6 + $0x148] sm:$0xff] }
 0x301   : > { %2846 = vst [vmem:[#allocation4 + $0x31] sm:$0xff] %v2782_v59  ;;  %4980 = vmatmul.mubr.f32.gmra.mrb[18].mxu0 %v2782_v59  ;;  %v4496_v59 = vld [vmem:[%s8968_s6 + $0x140] sm:$0xff] }
 0x302   : > { %v2721_v24 = vpop.f32.mrb[30].mxu1  ;;  %2806 = vrot.lane.b32.xlu0 %v2783_v15, %s6465_s10  ;;  %5831 = vmatpush3.bf16.msra.mxu0 %v5828_v6  ;;  %v4494_v6 = vld [vmem:[%s8968_s6 + $0x130] sm:$0xff]  ;;  %v5868_v15 = vpack.c.bf16 %v4497_v2, %v4496_v59  ;;  %v4520_v59 = vld [vmem:[%s8968_s6 + $0x200] sm:$0xff]  ;;  %v4521_v2 = vld [vmem:[%s8968_s6 + $0x208] sm:$0xff] }
 0x303   : > { %v8418_v41 = vadd.f32 %v8361_v27, %v2721_v24  ;;  %v2723_v13 = vpop.f32.mrb[31].mxu1  ;;  %5833 = vmatprep.subr.bf16.mxu0 %v5832_v12  ;;  %v5864_v9 = vpack.c.bf16 %v4495_v28, %v4494_v6  ;;  %v4498_v24 = vld [vmem:[%s8968_s6 + $0x150] sm:$0xff] }
 0x304   : > { %v2785_v20 = vadd.f32 %v8374_v38, %v2723_v13  ;;  %v8497_v14 = vld [vmem:[#allocation4 + $0x20] sm:$0xff]  ;;  %v4499_v13 = vld [vmem:[%s8968_s6 + $0x158] sm:$0xff]  ;;  %v4518_v28 = vld [vmem:[%s8968_s6 + $0x1f0] sm:$0xff] }
 0x305   : > { %2847 = vst [vmem:[#allocation4 + $0x41] sm:$0xff] %v8418_v41  ;;  %4982 = vmatprep.mubr.f32.mxu0 %v8418_v41 }
 0x306   : > { %v2727_v21 = vpop.f32.mrb[32].mxu1  ;;  %2808 = vrot.lane.b32.xlu1 %v2785_v20, %s6465_s10  ;;  %5835 = vmatpush3.bf16.msra.mxu0 %v5832_v12  ;;  %v4500_v20 = vld [vmem:[%s8968_s6 + $0x160] sm:$0xff] }
 0x307   : > { %v8431_v26 = vadd.f32 %v8361_v27, %v2727_v21  ;;  %v2729_v54 = vpop.f32.mrb[33].mxu1  ;;  %5837 = vmatprep.subr.bf16.mxu0 %v5836_v19  ;;  %v5876_v25 = vpack.c.bf16 %v4501_v22, %v4500_v20  ;;  %v4502_v21 = vld [vmem:[%s8968_s6 + $0x170] sm:$0xff]  ;;  %v4525_v20 = vld [vmem:[%s8968_s6 + $0x228] sm:$0xff] }
 0x308   : > { %v2787_v37 = vadd.f32 %v8374_v38, %v2729_v54  ;;  %v8505_v8 = vld [vmem:[#allocation4 + $0x30] sm:$0xff]  ;;  %v4503_v54 = vld [vmem:[%s8968_s6 + $0x178] sm:$0xff] }
 0x309   : > { %2848 = vst [vmem:[#allocation4 + $0x51] sm:$0xff] %v8431_v26  ;;  %4983 = vmatmul.mubr.f32.gmra.mrb[20].mxu0 %v8431_v26 }
 0x30a   : > { %v2733_v33 = vpop.f32.mrb[34].mxu1  ;;  %2810 = vrot.lane.b32.xlu0 %v2787_v37, %s6465_s10  ;;  %5839 = vmatpush3.bf16.msra.mxu0 %v5836_v19  ;;  %v5872_v19 = vpack.c.bf16 %v4499_v13, %v4498_v24  ;;  %v4504_v37 = vld [vmem:[%s8968_s6 + $0x180] sm:$0xff]  ;;  %v4523_v24 = vld [vmem:[%s8968_s6 + $0x218] sm:$0xff] }
 0x30b   : > { %v8444_v34 = vadd.f32 %v8361_v27, %v2733_v33  ;;  %v2735_v3 = vpop.f32.mrb[35].mxu1  ;;  %5841 = vmatprep.subr.bf16.mxu0 %v5840_v29  ;;  %v5884_v32 = vpack.c.bf16 %v4505_v30, %v4504_v37  ;;  %v4506_v33 = vld [vmem:[%s8968_s6 + $0x190] sm:$0xff]  ;;  %v4529_v37 = vld [vmem:[%s8968_s6 + $0x248] sm:$0xff] }
 0x30c   : > { %v2789_v46 = vadd.f32 %v8374_v38, %v2735_v3  ;;  %v8512_v4 = vld [vmem:[#allocation4 + $0x40] sm:$0xff]  ;;  %v4507_v3 = vld [vmem:[%s8968_s6 + $0x198] sm:$0xff] }
 0x30d   : > { %2849 = vst [vmem:[#allocation4 + $0x61] sm:$0xff] %v8444_v34  ;;  %4985 = vmatprep.mubr.f32.mxu0 %v8444_v34  ;;  %v8581_v56 = vld [vmem:[#allocation4 + $0x42] sm:$0xff] }
 0x30e   : > { %v2739_v42 = vpop.f32.mrb[36].mxu1  ;;  %2812 = vrot.lane.b32.xlu1 %v2789_v46, %s6465_s10  ;;  %5843 = vmatpush3.bf16.msra.mxu0 %v5840_v29  ;;  %v5880_v29 = vpack.c.bf16 %v4503_v54, %v4502_v21  ;;  %v8560_v46 = vld [vmem:[#allocation4 + $0x12] sm:$0xff] }
 0x30f   : > { %v8457_v50 = vadd.f32 %v8361_v27, %v2739_v42  ;;  %v2741_v40 = vpop.f32.mrb[37].mxu1  ;;  %5845 = vmatprep.subr.bf16.mxu0 %v5844_v36  ;;  %v8569_v42 = vld [vmem:[#allocation4 + $0x22] sm:$0xff]  ;;  %v4527_v21 = vld [vmem:[%s8968_s6 + $0x238] sm:$0xff] }
 0x310   : > { %v2791_v52 = vadd.f32 %v8374_v38, %v2741_v40  ;;  %v8515_v11 = vld [vmem:[#allocation4 + $0x50] sm:$0xff]  ;;  %v5892_v40 = vpack.c.bf16 %v4509_v47, %v4508_v17  ;;  %v4532_v47 = vld [vmem:[%s8968_s6 + $0x260] sm:$0xff] }
 0x311   : > { %2850 = vst [vmem:[#allocation4 + $0x71] sm:$0xff] %v8457_v50  ;;  %4986 = vmatmul.mubr.f32.gmra.mrb[22].mxu0 %v8457_v50 }
 0x312   : > { %v2745_v57 = vpop.f32.mrb[38].mxu1  ;;  %2814 = vrot.lane.b32.xlu0 %v2791_v52, %s6465_s10  ;;  %5847 = vmatpush3.bf16.msra.mxu0 %v5844_v36  ;;  %v5888_v36 = vpack.c.bf16 %v4507_v3, %v4506_v33  ;;  %v4510_v52 = vld [vmem:[%s8968_s6 + $0x1b0] sm:$0xff]  ;;  %v4531_v3 = vld [vmem:[%s8968_s6 + $0x258] sm:$0xff] }
 0x313   : > { %v8470_v23 = vadd.f32 %v8361_v27, %v2745_v57  ;;  %v2747_v44 = vpop.f32.mrb[39].mxu1  ;;  %5849 = vmatprep.subr.bf16.mxu0 %v5848_v0  ;;  %5020 = vmatprep.mubr.f32.mxu0 %v8151_v10  ;;  %v5856_v10 = vpack.c.bf16 %v4491_v63, %v4490_v62  ;;  %v4492_v27 = vld [vmem:[%s8968_s6 + $0x120] sm:$0xff]  ;;  %v5896_v57 = vpack.c.bf16 %v4511_v55, %v4510_v52  ;;  %v4514_v63 = vld [vmem:[%s8968_s6 + $0x1d0] sm:$0xff] }
 0x314   : > { %v2793_v61 = vadd.f32 %v8374_v38, %v2747_v44  ;;  %v8474_v60 = vld [vmem:[#allocation4 + $0x62] sm:$0xff]  ;;  %v5860_v45 = vpack.c.bf16 %v4493_v5, %v4492_v27  ;;  %v8584_v44 = vld [vmem:[#allocation4 + $0x52] sm:$0xff] }
 0x315   : > { %2851 = vst [vmem:[#allocation4 + $0x81] sm:$0xff] %v8470_v23  ;;  %5334 = vmatprep.mubr.f32.mxu1 %v8474_v60  ;;  %v8524_v12 = vld [vmem:[#allocation4 + $0x60] sm:$0xff]  ;;  %v4530_v33 = vld [vmem:[%s8968_s6 + $0x250] sm:$0xff] }
 0x316   : > { %2816 = vrot.lane.b32.xlu1 %v2793_v61, %s6465_s10  ;;  %5851 = vmatpush3.bf16.msra.mxu0 %v5848_v0  ;;  %v8572_v0 = vld [vmem:[#allocation4 + $0x32] sm:$0xff]  ;;  %v4513_v61 = vld [vmem:[%s8968_s6 + $0x1c8] sm:$0xff]  ;;  %v4516_v5 = vld [vmem:[%s8968_s6 + $0x1e0] sm:$0xff]  ;;  %v5936_v17 = vpack.c.bf16 %v4531_v3, %v4530_v33  ;;  %s8911_s10 = scalar_lea.hbm %s8970_s8, %s6318_s24 }
 0x317   : > { %5853 = vmatprep.subr.bf16.mxu0 %v5852_v58  ;;  %v4549_v33 = vld [vmem:[%s8968_s6 + $0x2e8] sm:$0xff]  ;;  %v4551_v3 = vld [vmem:[%s8968_s6 + $0x2f8] sm:$0xff] }
 0x318   : > { %v8488_v38 = vld [vmem:[#allocation4 + $0x72] sm:$0xff] }
 0x319   : > { %5335 = vmatmul.mubr.f32.vlgmr.msra.gmra.mrb[40].mxu1 %v8488_v38  ;;  %5021 = vmatmul.mubr.f32.vlgmr.msra.gmra.mrb[16].mxu0 %v8490_v1  ;;  %v8527_v18 = vld [vmem:[#allocation4 + $0x70] sm:$0xff] }
 0x31a   : > { %5023 = vmatprep.mubr.f32.mxu0 %v8497_v14  ;;  %5855 = vmatpush3.bf16.msra.mxu0 %v5852_v58  ;;  %v4512_v58 = vld [vmem:[%s8968_s6 + $0x1c0] sm:$0xff] }
 0x31b   : > { %5857 = vmatprep.subr.bf16.mxu0 %v5856_v10  ;;  %v5900_v62 = vpack.c.bf16 %v4513_v61, %v4512_v58  ;;  %v4535_v58 = vld [vmem:[%s8968_s6 + $0x278] sm:$0xff] }
 0x31c   : > { %v8503_v7 = vld [vmem:[#allocation4 + $0x82] sm:$0xff]  ;;  %v3947_v61 = vld [vmem:[#allocation4 + $0x92] sm:$0xff] }
 0x31d   : > { %5337 = vmatprep.mubr.f32.mxu1 %v8503_v7  ;;  %5024 = vmatmul.mubr.f32.gmra.mrb[18].mxu0 %v8505_v8 }
 0x31e   : > { %5026 = vmatprep.mubr.f32.mxu0 %v8512_v4  ;;  %5859 = vmatpush3.bf16.msra.mxu0 %v5856_v10  ;;  %v4515_v10 = vld [vmem:[%s8968_s6 + $0x1d8] sm:$0xff] }
 0x31f   : > { %5861 = vmatprep.subr.bf16.mxu0 %v5860_v45  ;;  %v5904_v27 = vpack.c.bf16 %v4515_v10, %v4514_v63  ;;  %5338 = vmatmul.mubr.f32.gmra.mrb[42].mxu1 %v3947_v61  ;;  %v4536_v10 = vld [vmem:[%s8968_s6 + $0x280] sm:$0xff]  ;;  %v4557_v61 = vld [vmem:[%s8968_s6 + $0x328] sm:$0xff] }
 0x321   : > { %5027 = vmatmul.mubr.f32.gmra.mrb[20].mxu0 %v8515_v11 }
 0x322   : > { %5029 = vmatprep.mubr.f32.mxu0 %v8524_v12  ;;  %5863 = vmatpush3.bf16.msra.mxu0 %v5860_v45  ;;  %v4517_v45 = vld [vmem:[%s8968_s6 + $0x1e8] sm:$0xff] }
 0x323   : > { %5865 = vmatprep.subr.bf16.mxu0 %v5864_v9  ;;  %v5908_v6 = vpack.c.bf16 %v4517_v45, %v4516_v5 }
 0x325   : > { %5030 = vmatmul.mubr.f32.gmra.mrb[22].mxu0 %v8527_v18 }
 0x326   : > { %5867 = vmatpush3.bf16.msra.mxu0 %v5864_v9  ;;  %5064 = vmatprep.mubr.f32.mxu0 %v3111_v16  ;;  %v4522_v16 = vld [vmem:[%s8968_s6 + $0x210] sm:$0xff] }
 0x327   : > { %5869 = vmatprep.subr.bf16.mxu0 %v5868_v15  ;;  %v5920_v13 = vpack.c.bf16 %v4523_v24, %v4522_v16  ;;  %v8708_v16 = vld [vmem:[#allocation4 + $0x31] sm:$0xff] }
 0x32a   : > { %5871 = vmatpush3.bf16.msra.mxu0 %v5868_v15  ;;  %v5916_v15 = vpack.c.bf16 %v4521_v2, %v4520_v59  ;;  %v8695_v59 = vld [vmem:[#allocation4 + $0x21] sm:$0xff] }
 0x32b   : > { %5873 = vmatprep.subr.bf16.mxu0 %v5872_v19  ;;  %v4540_v2 = vld [vmem:[%s8968_s6 + $0x2a0] sm:$0xff] }
 0x32e   : > { %5875 = vmatpush3.bf16.msra.mxu0 %v5872_v19  ;;  %v4524_v19 = vld [vmem:[%s8968_s6 + $0x220] sm:$0xff] }
 0x32f   : > { %5877 = vmatprep.subr.bf16.mxu0 %v5876_v25  ;;  %v5924_v22 = vpack.c.bf16 %v4525_v20, %v4524_v19  ;;  %v4542_v19 = vld [vmem:[%s8968_s6 + $0x2b0] sm:$0xff]  ;;  %v4543_v20 = vld [vmem:[%s8968_s6 + $0x2b8] sm:$0xff] }
 0x332   : > { %5879 = vmatpush3.bf16.msra.mxu0 %v5876_v25  ;;  %v4526_v25 = vld [vmem:[%s8968_s6 + $0x230] sm:$0xff] }
 0x333   : > { %5881 = vmatprep.subr.bf16.mxu0 %v5880_v29  ;;  %v5928_v54 = vpack.c.bf16 %v4527_v21, %v4526_v25  ;;  %v4544_v21 = vld [vmem:[%s8968_s6 + $0x2c0] sm:$0xff] }
 0x336   : > { %5883 = vmatpush3.bf16.msra.mxu0 %v5880_v29  ;;  %v4528_v29 = vld [vmem:[%s8968_s6 + $0x240] sm:$0xff] }
 0x337   : > { %5885 = vmatprep.subr.bf16.mxu0 %v5884_v32  ;;  %v5932_v30 = vpack.c.bf16 %v4529_v37, %v4528_v29  ;;  %v4546_v29 = vld [vmem:[%s8968_s6 + $0x2d0] sm:$0xff]  ;;  %v4547_v37 = vld [vmem:[%s8968_s6 + $0x2d8] sm:$0xff] }
 0x339   : > { %5065 = vmatmul.mubr.f32.vlgmr.msra.gmra.mrb[16].mxu0 %v8560_v46 }
 0x33a   : > { %5067 = vmatprep.mubr.f32.mxu0 %v8569_v42  ;;  %5887 = vmatpush3.bf16.msra.mxu0 %v5884_v32  ;;  %v8650_v32 = vld [vmem:[#allocation4 + $0x80] sm:$0xff] }
 0x33b   : > { %5889 = vmatprep.subr.bf16.mxu0 %v5888_v36 }
 0x33d   : > { %5068 = vmatmul.mubr.f32.gmra.mrb[18].mxu0 %v8572_v0 }
 0x33e   : > { %5070 = vmatprep.mubr.f32.mxu0 %v8581_v56  ;;  %5891 = vmatpush3.bf16.msra.mxu0 %v5888_v36  ;;  %v3387_v36 = vld [vmem:[#allocation4 + $0x11] sm:$0xff] }
 0x33f   : > { %5893 = vmatprep.subr.bf16.mxu0 %v5892_v40 }
 0x341   : > { %5071 = vmatmul.mubr.f32.gmra.mrb[20].mxu0 %v8584_v44 }
 0x342   : > { %5073 = vmatprep.mubr.f32.mxu0 %v8474_v60  ;;  %5895 = vmatpush3.bf16.msra.mxu0 %v5892_v40  ;;  %v4533_v40 = vld [vmem:[%s8968_s6 + $0x268] sm:$0xff] }
 0x343   : > { %5897 = vmatprep.subr.bf16.mxu0 %v5896_v57  ;;  %v5940_v52 = vpack.c.bf16 %v4533_v40, %v4532_v47  ;;  %v4553_v47 = vld [vmem:[%s8968_s6 + $0x308] sm:$0xff] }
 0x345   : > { %5074 = vmatmul.mubr.f32.gmra.mrb[22].mxu0 %v8488_v38 }
 0x346   : > { %5899 = vmatpush3.bf16.msra.mxu0 %v5896_v57  ;;  %5108 = vmatprep.mubr.f32.mxu0 %v8490_v1  ;;  %v4519_v1 = vld [vmem:[%s8968_s6 + $0x1f8] sm:$0xff]  ;;  %v4534_v57 = vld [vmem:[%s8968_s6 + $0x270] sm:$0xff] }
 0x347   : > { %5901 = vmatprep.subr.bf16.mxu0 %v5900_v62  ;;  %v5912_v9 = vpack.c.bf16 %v4519_v1, %v4518_v28  ;;  %v4539_v28 = vld [vmem:[%s8968_s6 + $0x298] sm:$0xff] }
 0x34a   : > { %5903 = vmatpush3.bf16.msra.mxu0 %v5900_v62  ;;  %v5944_v62 = vpack.c.bf16 %v4535_v58, %v4534_v57  ;;  %v4556_v58 = vld [vmem:[%s8968_s6 + $0x320] sm:$0xff] }
 0x34b   : > { %5905 = vmatprep.subr.bf16.mxu0 %v5904_v27 }
 0x34e   : > { %5907 = vmatpush3.bf16.msra.mxu0 %v5904_v27  ;;  %v4537_v27 = vld [vmem:[%s8968_s6 + $0x288] sm:$0xff] }
 0x34f   : > { %5909 = vmatprep.subr.bf16.mxu0 %v5908_v6  ;;  %v5948_v5 = vpack.c.bf16 %v4537_v27, %v4536_v10  ;;  %v4559_v10 = vld [vmem:[%s8968_s6 + $0x338] sm:$0xff]  ;;  %v4561_v27 = vld [vmem:[%s8968_s6 + $0x348] sm:$0xff] }
 0x352   : > { %5911 = vmatpush3.bf16.msra.mxu0 %v5908_v6  ;;  %v4538_v6 = vld [vmem:[%s8968_s6 + $0x290] sm:$0xff] }
 0x353   : > { %5913 = vmatprep.subr.bf16.mxu0 %v5912_v9  ;;  %v5952_v1 = vpack.c.bf16 %v4539_v28, %v4538_v6 }
 0x356   : > { %5915 = vmatpush3.bf16.msra.mxu0 %v5912_v9 }
 0x357   : > { %5917 = vmatprep.subr.bf16.mxu0 %v5916_v15 }
 0x359   : > { %5109 = vmatmul.mubr.f32.vlgmr.msra.gmra.mrb[16].mxu0 %v8497_v14 }
 0x35a   : > { %5111 = vmatprep.mubr.f32.mxu0 %v8505_v8  ;;  %5919 = vmatpush3.bf16.msra.mxu0 %v5916_v15  ;;  %v4541_v15 = vld [vmem:[%s8968_s6 + $0x2a8] sm:$0xff] }
 0x35b   : > { %5921 = vmatprep.subr.bf16.mxu0 %v5920_v13  ;;  %v5956_v24 = vpack.c.bf16 %v4541_v15, %v4540_v2  ;;  %v4570_v15 = vld [vmem:[%s8968_s6 + $0x390] sm:$0xff] }
 0x35d   : > { %5112 = vmatmul.mubr.f32.gmra.mrb[18].mxu0 %v8512_v4 }
 0x35e   : > { %5114 = vmatprep.mubr.f32.mxu0 %v8515_v11  ;;  %5923 = vmatpush3.bf16.msra.mxu0 %v5920_v13 }
 0x35f   : > { %5925 = vmatprep.subr.bf16.mxu0 %v5924_v22 }
 0x361   : > { %5115 = vmatmul.mubr.f32.gmra.mrb[20].mxu0 %v8524_v12 }
 0x362   : > { %5117 = vmatprep.mubr.f32.mxu0 %v8527_v18  ;;  %5927 = vmatpush3.bf16.msra.mxu0 %v5924_v22  ;;  %v5960_v22 = vpack.c.bf16 %v4543_v20, %v4542_v19  ;;  %v4572_v19 = vld [vmem:[%s8968_s6 + $0x3a0] sm:$0xff]  ;;  %v4573_v20 = vld [vmem:[%s8968_s6 + $0x3a8] sm:$0xff] }
 0x363   : > { %5929 = vmatprep.subr.bf16.mxu0 %v5928_v54 }
 0x365   : > { %5118 = vmatmul.mubr.f32.gmra.mrb[22].mxu0 %v8650_v32 }
 0x366   : > { %5931 = vmatpush3.bf16.msra.mxu0 %v5928_v54  ;;  %5152 = vmatprep.mubr.f32.mxu0 %v3387_v36  ;;  %v4545_v54 = vld [vmem:[%s8968_s6 + $0x2c8] sm:$0xff] }
 0x367   : > { %5933 = vmatprep.subr.bf16.mxu0 %v5932_v30 }
 0x36a   : > { %5935 = vmatpush3.bf16.msra.mxu0 %v5932_v30  ;;  %v4548_v30 = vld [vmem:[%s8968_s6 + $0x2e0] sm:$0xff] }
 0x36b   : > { %5937 = vmatprep.subr.bf16.mxu0 %v5936_v17 }
 0x36c   : > { %v2803_v55 = vpop.permute.xlu0 %2802 }
 0x36d   : > { %2827 = vst.msk [vmem:[%s8292_s13 + $0x8] sm:$0xff] %vm2826_vm5, %v2803_v55 }
 0x36e   : > { %2829 = vst.msk [vmem:[%s8292_s13 + $0x10] sm:$0xff] %vm2828_vm6, %v2803_v55  ;;  %5939 = vmatpush3.bf16.msra.mxu0 %v5936_v17  ;;  %v4552_v17 = vld [vmem:[%s8968_s6 + $0x300] sm:$0xff]  ;;  %v4555_v55 = vld [vmem:[%s8968_s6 + $0x318] sm:$0xff] }
 0x36f   : > { %5941 = vmatprep.subr.bf16.mxu0 %v5940_v52  ;;  %v5980_v40 = vpack.c.bf16 %v4553_v47, %v4552_v17  ;;  %v3943_v17 = vld [vmem:[#allocation4 + $0x52] sm:$0xff] }
 0x370   : > { %v2805_v63 = vpop.permute.xlu1 %2804 }
 0x371   : > { %2830 = vst.msk [vmem:[%s8292_s13 + $0x20] sm:$0xff] %vm2826_vm5, %v2805_v63 }
 0x372   : > { %2831 = vst.msk [vmem:[%s8292_s13 + $0x28] sm:$0xff] %vm2828_vm6, %v2805_v63  ;;  %5943 = vmatpush3.bf16.msra.mxu0 %v5940_v52  ;;  %v4554_v52 = vld [vmem:[%s8968_s6 + $0x310] sm:$0xff] }
 0x373   : > { %5945 = vmatprep.subr.bf16.mxu0 %v5944_v62  ;;  %v5984_v57 = vpack.c.bf16 %v4555_v55, %v4554_v52  ;;  %v4558_v63 = vld [vmem:[%s8968_s6 + $0x330] sm:$0xff] }
 0x374   : > { %v2807_v45 = vpop.permute.xlu0 %2806 }
 0x375   : > { %2832 = vst.msk [vmem:[%s8292_s13 + $0x38] sm:$0xff] %vm2826_vm5, %v2807_v45 }
 0x376   : > { %2833 = vst.msk [vmem:[%s8292_s13 + $0x40] sm:$0xff] %vm2828_vm6, %v2807_v45  ;;  %5947 = vmatpush3.bf16.msra.mxu0 %v5944_v62  ;;  %v5988_v62 = vpack.c.bf16 %v4557_v61, %v4556_v58  ;;  %v4565_v45 = vld [vmem:[%s8968_s6 + $0x368] sm:$0xff] }
 0x377   : > { %5949 = vmatprep.subr.bf16.mxu0 %v5948_v5 }
 0x378   : > { %v2809_v9 = vpop.permute.xlu1 %2808 }
 0x379   : > { %2834 = vst.msk [vmem:[%s8292_s13 + $0x50] sm:$0xff] %vm2826_vm5, %v2809_v9  ;;  %5153 = vmatmul.mubr.f32.vlgmr.msra.gmra.mrb[16].mxu0 %v8695_v59 }
 0x37a   : > { %2835 = vst.msk [vmem:[%s8292_s13 + $0x58] sm:$0xff] %vm2828_vm6, %v2809_v9  ;;  %5155 = vmatprep.mubr.f32.mxu0 %v8708_v16  ;;  %5951 = vmatpush3.bf16.msra.mxu0 %v5948_v5  ;;  %v4563_v5 = vld [vmem:[%s8968_s6 + $0x358] sm:$0xff]  ;;  %v4569_v9 = vld [vmem:[%s8968_s6 + $0x388] sm:$0xff] }
 0x37b   : > { %5953 = vmatprep.subr.bf16.mxu0 %v5952_v1 }
 0x37c   : > { %v2811_v13 = vpop.permute.xlu0 %2810 }
 0x37d   : > { %2836 = vst.msk [vmem:[%s8292_s13 + $0x68] sm:$0xff] %vm2826_vm5, %v2811_v13  ;;  %5156 = vmatmul.mubr.f32.gmra.mrb[18].mxu0 %v8418_v41  ;;  %v5964_v41 = vpack.c.bf16 %v4545_v54, %v4544_v21  ;;  %v4575_v21 = vld [vmem:[%s8968_s6 + $0x3b8] sm:$0xff]  ;;  %v4577_v54 = vld [vmem:[%s8968_s6 + $0x3c8] sm:$0xff] }
 0x37e   : > { %2837 = vst.msk [vmem:[%s8292_s13 + $0x70] sm:$0xff] %vm2828_vm6, %v2811_v13  ;;  %5158 = vmatprep.mubr.f32.mxu0 %v8431_v26  ;;  %5955 = vmatpush3.bf16.msra.mxu0 %v5952_v1  ;;  %v4568_v1 = vld [vmem:[%s8968_s6 + $0x380] sm:$0xff] }
 0x37f   : > { %5957 = vmatprep.subr.bf16.mxu0 %v5956_v24  ;;  %v6012_v2 = vpack.c.bf16 %v4569_v9, %v4568_v1 }
 0x380   : > { %v2813_v25 = vpop.permute.xlu1 %2812 }
 0x381   : > { %2838 = vst.msk [vmem:[%s8292_s13 + $0x80] sm:$0xff] %vm2826_vm5, %v2813_v25  ;;  %5159 = vmatmul.mubr.f32.gmra.mrb[20].mxu0 %v8444_v34  ;;  %v5968_v34 = vpack.c.bf16 %v4547_v37, %v4546_v29  ;;  %v4581_v29 = vld [vmem:[%s8968_s6 + $0x3e8] sm:$0xff] }
 0x382   : > { %2839 = vst.msk [vmem:[%s8292_s13 + $0x88] sm:$0xff] %vm2828_vm6, %v2813_v25  ;;  %5161 = vmatprep.mubr.f32.mxu0 %v8457_v50  ;;  %5959 = vmatpush3.bf16.msra.mxu0 %v5956_v24  ;;  %v4571_v24 = vld [vmem:[%s8968_s6 + $0x398] sm:$0xff]  ;;  %v4574_v25 = vld [vmem:[%s8968_s6 + $0x3b0] sm:$0xff] }
 0x383   : > { %5961 = vmatprep.subr.bf16.mxu0 %v5960_v22  ;;  %v6016_v13 = vpack.c.bf16 %v4571_v24, %v4570_v15 }
 0x384   : > { %v2815_v26 = vpop.permute.xlu0 %2814 }
 0x385   : > { %2840 = vst.msk [vmem:[%s8292_s13 + $0x98] sm:$0xff] %vm2826_vm5, %v2815_v26  ;;  %5162 = vmatmul.mubr.f32.gmra.mrb[22].mxu0 %v8470_v23  ;;  %v5972_v23 = vpack.c.bf16 %v4549_v33, %v4548_v30  ;;  %v3804_v30 = vld [vmem:[#allocation4 + $0x41] sm:$0xff]  ;;  %v3805_v33 = vld [vmem:[#allocation4 + $0x51] sm:$0xff] }
 0x386   : > { %2841 = vst.msk [vmem:[%s8292_s13 + $0xa0] sm:$0xff] %vm2828_vm6, %v2815_v26  ;;  %5963 = vmatpush3.bf16.msra.mxu0 %v5960_v22  ;;  %5196 = vmatprep.mubr.f32.mxu0 %v8560_v46  ;;  %v4550_v46 = vld [vmem:[%s8968_s6 + $0x2f0] sm:$0xff]  ;;  %v6020_v22 = vpack.c.bf16 %v4573_v20, %v4572_v19  ;;  %v6398_v26 = vld [vmem:[#allocation2] sm:$0xff] }
 0x387   : > { %5965 = vmatprep.subr.bf16.mxu0 %v5964_v41  ;;  %v5976_v36 = vpack.c.bf16 %v4551_v3, %v4550_v46  ;;  %v3807_v46 = vld [vmem:[#allocation4 + $0x71] sm:$0xff]  ;;  %v3808_v3 = vld [vmem:[#allocation4 + $0x81] sm:$0xff] }
 0x388   : > { %v2817_v50 = vpop.permute.xlu1 %2816 }
 0x389   : > { %2842 = vst.msk [vmem:[%s8292_s13 + $0xb0] sm:$0xff] %vm2826_vm5, %v2817_v50 }
 0x38a   : > { %2843 = vst.msk [vmem:[%s8292_s13 + $0xb8] sm:$0xff] %vm2828_vm6, %v2817_v50  ;;  %5967 = vmatpush3.bf16.msra.mxu0 %v5964_v41  ;;  %v4579_v41 = vld [vmem:[%s8968_s6 + $0x3d8] sm:$0xff] }
 0x38b   : > { %5969 = vmatprep.subr.bf16.mxu0 %v5968_v34 }
 0x38e   : > { %5971 = vmatpush3.bf16.msra.mxu0 %v5968_v34  ;;  %v4582_v34 = vld [vmem:[%s8968_s6 + $0x3f0] sm:$0xff] }
 0x38f   : > { %5973 = vmatprep.subr.bf16.mxu0 %v5972_v23 }
 0x392   : > { %5975 = vmatpush3.bf16.msra.mxu0 %v5972_v23  ;;  %v3806_v23 = vld [vmem:[#allocation4 + $0x61] sm:$0xff] }
 0x393   : > { %5977 = vmatprep.subr.bf16.mxu0 %v5976_v36 }
 0x396   : > { %5979 = vmatpush3.bf16.msra.mxu0 %v5976_v36 }
 0x397   : > { %5981 = vmatprep.subr.bf16.mxu0 %v5980_v40 }
 0x399   : > { %5197 = vmatmul.mubr.f32.vlgmr.msra.gmra.mrb[16].mxu0 %v8569_v42  ;;  %v5992_v42 = vpack.c.bf16 %v4559_v10, %v4558_v63 }
 0x39a   : > { %5199 = vmatprep.mubr.f32.mxu0 %v8572_v0  ;;  %5983 = vmatpush3.bf16.msra.mxu0 %v5980_v40  ;;  %v4560_v0 = vld [vmem:[%s8968_s6 + $0x340] sm:$0xff] }
 0x39b   : > { %5985 = vmatprep.subr.bf16.mxu0 %v5984_v57 }
 0x39d   : > { %5200 = vmatmul.mubr.f32.gmra.mrb[18].mxu0 %v8581_v56  ;;  %v5996_v56 = vpack.c.bf16 %v4561_v27, %v4560_v0 }
 0x39e   : > { %5202 = vmatprep.mubr.f32.mxu0 %v8584_v44  ;;  %5987 = vmatpush3.bf16.msra.mxu0 %v5984_v57  ;;  %v4562_v44 = vld [vmem:[%s8968_s6 + $0x350] sm:$0xff] }
 0x39f   : > { %5989 = vmatprep.subr.bf16.mxu0 %v5988_v62 }
 0x3a1   : > { %5203 = vmatmul.mubr.f32.gmra.mrb[20].mxu0 %v8474_v60  ;;  %v6000_v60 = vpack.c.bf16 %v4563_v5, %v4562_v44 }
 0x3a2   : > { %5205 = vmatprep.mubr.f32.mxu0 %v8488_v38  ;;  %5991 = vmatpush3.bf16.msra.mxu0 %v5988_v62  ;;  %v4564_v38 = vld [vmem:[%s8968_s6 + $0x360] sm:$0xff] }
 0x3a3   : > { %5993 = vmatprep.subr.bf16.mxu0 %v5992_v42  ;;  %v6004_v6 = vpack.c.bf16 %v4565_v45, %v4564_v38 }
 0x3a5   : > { %5206 = vmatmul.mubr.f32.gmra.mrb[22].mxu0 %v8503_v7  ;;  %v4566_v7 = vld [vmem:[%s8968_s6 + $0x370] sm:$0xff] }
 0x3a6   : > { %5995 = vmatpush3.bf16.msra.mxu0 %v5992_v42  ;;  %5240 = vmatprep.mubr.f32.mxu0 %v8497_v14  ;;  %v4567_v14 = vld [vmem:[%s8968_s6 + $0x378] sm:$0xff] }
 0x3a7   : > { %5997 = vmatprep.subr.bf16.mxu0 %v5996_v56  ;;  %v6008_v28 = vpack.c.bf16 %v4567_v14, %v4566_v7 }
 0x3aa   : > { %5999 = vmatpush3.bf16.msra.mxu0 %v5996_v56 }
 0x3ab   : > { %6001 = vmatprep.subr.bf16.mxu0 %v6000_v60 }
 0x3ae   : > { %6003 = vmatpush3.bf16.msra.mxu0 %v6000_v60 }
 0x3af   : > { %6005 = vmatprep.subr.bf16.mxu0 %v6004_v6 }
 0x3b2   : > { %6007 = vmatpush3.bf16.msra.mxu0 %v6004_v6 }
 0x3b3   : > { %6009 = vmatprep.subr.bf16.mxu0 %v6008_v28 }
 0x3b6   : > { %6011 = vmatpush3.bf16.msra.mxu0 %v6008_v28 }
 0x3b7   : > { %6013 = vmatprep.subr.bf16.mxu0 %v6012_v2 }
 0x3b9   : > { %5241 = vmatmul.mubr.f32.vlgmr.msra.gmra.mrb[16].mxu0 %v8505_v8  ;;  %v6024_v8 = vpack.c.bf16 %v4575_v21, %v4574_v25 }
 0x3ba   : > { %5243 = vmatprep.mubr.f32.mxu0 %v8512_v4  ;;  %6015 = vmatpush3.bf16.msra.mxu0 %v6012_v2  ;;  %v4576_v4 = vld [vmem:[%s8968_s6 + $0x3c0] sm:$0xff] }
 0x3bb   : > { %6017 = vmatprep.subr.bf16.mxu0 %v6016_v13 }
 0x3bd   : > { %5244 = vmatmul.mubr.f32.gmra.mrb[18].mxu0 %v8515_v11  ;;  %v6028_v11 = vpack.c.bf16 %v4577_v54, %v4576_v4 }
 0x3be   : > { %5246 = vmatprep.mubr.f32.mxu0 %v8524_v12  ;;  %6019 = vmatpush3.bf16.msra.mxu0 %v6016_v13  ;;  %v4578_v12 = vld [vmem:[%s8968_s6 + $0x3d0] sm:$0xff] }
 0x3bf   : > { %6021 = vmatprep.subr.bf16.mxu0 %v6020_v22 }
 0x3c1   : > { %5247 = vmatmul.mubr.f32.gmra.mrb[20].mxu0 %v8527_v18  ;;  %v6032_v18 = vpack.c.bf16 %v4579_v41, %v4578_v12 }
 0x3c2   : > { %5249 = vmatprep.mubr.f32.mxu0 %v8650_v32  ;;  %6023 = vmatpush3.bf16.msra.mxu0 %v6020_v22  ;;  %v4580_v32 = vld [vmem:[%s8968_s6 + $0x3e0] sm:$0xff] }
 0x3c3   : > { %6025 = vmatprep.subr.bf16.mxu0 %v6024_v8  ;;  %v6036_v37 = vpack.c.bf16 %v4581_v29, %v4580_v32 }
 0x3c5   : > { %5250 = vmatmul.mubr.f32.gmra.mrb[22].mxu0 %v6398_v26 }
 0x3c6   : > { %6027 = vmatpush3.bf16.msra.mxu0 %v6024_v8  ;;  %5284 = vmatprep.mubr.f32.mxu0 %v8695_v59  ;;  %v4583_v59 = vld [vmem:[%s8968_s6 + $0x3f8] sm:$0xff] }
 0x3c7   : > { %6029 = vmatprep.subr.bf16.mxu0 %v6028_v11  ;;  %v6040_v50 = vpack.c.bf16 %v4583_v59, %v4582_v34 }
 0x3ca   : > { %6031 = vmatpush3.bf16.msra.mxu0 %v6028_v11 }
 0x3cb   : > { %6033 = vmatprep.subr.bf16.mxu0 %v6032_v18 }
 0x3ce   : > { %6035 = vmatpush3.bf16.msra.mxu0 %v6032_v18 }
 0x3cf   : > { %6037 = vmatprep.subr.bf16.mxu0 %v6036_v37 }
 0x3d2   : > { %6039 = vmatpush3.bf16.msra.mxu0 %v6036_v37 }
 0x3d3   : > { %6041 = vmatprep.subr.bf16.mxu0 %v6040_v50 }
 0x3d6   : > { %6043 = vmatpush3.bf16.msra.mxu0 %v6040_v50 }
 0x3d7   : > { %6045 = vmatprep.subr.bf16.mxu0 %v8198_v31 }
 0x3d9   : > { %5285 = vmatmul.mubr.f32.vlgmr.msra.gmra.mrb[16].mxu0 %v8708_v16  ;;  %v3809_v16 = vld [vmem:[#allocation4 + $0x91] sm:$0xff] }
 0x3da   : > { %5287 = vmatprep.mubr.f32.mxu0 %v3804_v30  ;;  %6047 = vmatpush3.bf16.msra.mxu0 %v8198_v31  ;;  %v3940_v31 = vld [vmem:[#allocation4 + $0x22] sm:$0xff] }
 0x3db   : > { %6049 = vmatprep.subr.bf16.mxu0 %v8215_v49 }
 0x3dd   : > { %5288 = vmatmul.mubr.f32.gmra.mrb[18].mxu0 %v3805_v33 }
 0x3de   : > { %5290 = vmatprep.mubr.f32.mxu0 %v3806_v23  ;;  %6051 = vmatpush3.bf16.msra.mxu0 %v8215_v49 }
 0x3df   : > { %6053 = vmatprep.subr.bf16.mxu0 %v8233_v35 }
 0x3e1   : > { %5291 = vmatmul.mubr.f32.gmra.mrb[20].mxu0 %v3807_v46 }
 0x3e2   : > { %5293 = vmatprep.mubr.f32.mxu0 %v3808_v3  ;;  %6055 = vmatpush3.bf16.msra.mxu0 %v8233_v35  ;;  %v3941_v35 = vld [vmem:[#allocation4 + $0x32] sm:$0xff] }
 0x3e3   : > { %6057 = vmatprep.subr.bf16.mxu0 %v8244_v39 }
 0x3e5   : > { %5294 = vmatmul.mubr.f32.gmra.mrb[22].mxu0 %v3809_v16 }
 0x3e6   : > { %6059 = vmatpush3.bf16.msra.mxu0 %v8244_v39  ;;  %5328 = vmatprep.mubr.f32.mxu0 %v3940_v31  ;;  %v3942_v39 = vld [vmem:[#allocation4 + $0x42] sm:$0xff] }
 0x3e7   : > { %6061 = vmatprep.subr.bf16.mxu0 %v8254_v43 }
 0x3ea   : > { %6063 = vmatpush3.bf16.msra.mxu0 %v8254_v43 }
 0x3eb   : > { %6065 = vmatprep.subr.bf16.mxu0 %v8264_v48 }
 0x3ec   : > { %v5336_v49 = vpop.f32.mrb[40].mxu1 }
 0x3ed   : > { %v4051_v36 = vpop.f32.mrb[41].mxu1 }
 0x3ee   : > { %6067 = vmatpush3.bf16.msra.mxu0 %v8264_v48  ;;  %v4600_v48 = vld [vmem:[%s8969_s7] ss:$0 sm:$0xff] }
 0x3ef   : > { %6069 = vmatprep.subr.bf16.mxu0 %v8274_v51 }
 0x3f2   : > { %6071 = vmatpush3.bf16.msra.mxu0 %v8274_v51  ;;  %v5339_v43 = vpop.f32.mrb[42].mxu1 }
 0x3f3   : > { %6073 = vmatprep.subr.bf16.mxu0 %v8284_v53  ;;  %v4061_v47 = vpop.f32.mrb[43].mxu1 }
 0x3f6   : > { %6075 = vmatpush3.bf16.msra.mxu0 %v8284_v53 }
 0x3f9   : > { %5329 = vmatmul.mubr.f32.vlgmr.msra.gmra.mrb[16].mxu0 %v3941_v35 }
 0x3fa   : > { %5331 = vmatprep.mubr.f32.mxu0 %v3942_v39 }
 0x3fd   : > { %5332 = vmatmul.mubr.f32.gmra.mrb[18].mxu0 %v3943_v17 }
 0x4b4   : > { %v5292_v40 = vpop.f32.mrb[20].mxu0 }
 0x4b5   : > { %v6108_v52 = vadd.f32 %v5336_v49, %v5292_v40  ;;  %v3913_v55 = vpop.f32.mrb[21].mxu0 }
 0x4b6   : > { %v6109_v51 = vadd.f32 %v4051_v36, %v3913_v55 }
 0x4b7   : > { %v4090_v57 = vadd.f32 %v6108_v52, %v4600_v48 }
 0x4b8   : > { %v4089_v58 = vadd.f32 %v6109_v51, %v4600_v48  ;;  %v5295_v61 = vpop.f32.mrb[22].mxu0 }
 0x4b9   : > { %v6110_v53 = vadd.f32 %v5339_v43, %v5295_v61  ;;  %v3923_v62 = vpop.f32.mrb[23].mxu0  ;;  %4111 = vrot.lane.b32.xlu1 %v4090_v57, %s6466_s21 }
 0x4ba   : > { %v6111_v63 = vadd.f32 %v4061_v47, %v3923_v62  ;;  %4109 = vrot.lane.b32.xlu0 %v4089_v58, %s6466_s21 }
 0x4bb   : > { %v4092_v38 = vadd.f32 %v6110_v53, %v4600_v48 }
 0x4bc   : > { %v4091_v45 = vadd.f32 %v6111_v63, %v4600_v48 }
 0x4cc   : > { %v5330_v10 = vpop.f32.mrb[16].mxu0 }
 0x4cd   : > { %v4086_v42 = vadd.f32 %v5330_v10, %v4600_v48  ;;  %v4031_v0 = vpop.f32.mrb[17].mxu0 }
 0x4ce   : > { %v4085_v27 = vadd.f32 %v4600_v48, %v4031_v0 }
 0x4cf   : > { %4103 = vrot.lane.b32.xlu1 %v4086_v42, %s6466_s21 }
 0x4d0   : > { %v5333_v56 = vpop.f32.mrb[18].mxu0  ;;  %4101 = vrot.lane.b32.xlu0 %v4085_v27, %s6466_s21 }
 0x4d1   : > { %v4088_v44 = vadd.f32 %v5333_v56, %v4600_v48  ;;  %v4041_v5 = vpop.f32.mrb[19].mxu0 }
 0x4d2   : > { %v4087_v60 = vadd.f32 %v4600_v48, %v4041_v5 }
 0x4d3   : > { %4107 = vrot.lane.b32.xlu1 %v4088_v44, %s6466_s21 }
 0x4d4   : > { %4105 = vrot.lane.b32.xlu0 %v4087_v60, %s6466_s21 }
 0x4d7   : > { %4115 = vrot.lane.b32.xlu1 %v4092_v38, %s6466_s21 }
 0x4d8   : > { %4113 = vrot.lane.b32.xlu0 %v4091_v45, %s6466_s21 }
 0x52b   : > { %v4112_v6 = vpop.permute.xlu1 %4111 }
 0x52c   : > { %4131 = vst.msk [vmem:[%s8292_s13 + $0x88] sm:$0xff] %vm4125_vm7, %v4112_v6  ;;  %v4110_v7 = vpop.permute.xlu0 %4109 }
 0x52d   : > { %4130 = vst.msk [vmem:[%s8292_s13 + $0x70] sm:$0xff] %vm4125_vm7, %v4110_v7 }
 0x541   : > { %v4104_v14 = vpop.permute.xlu1 %4103 }
 0x542   : > { %4127 = vst.msk [vmem:[%s8292_s13 + $0x28] sm:$0xff] %vm4125_vm7, %v4104_v14  ;;  %v4102_v28 = vpop.permute.xlu0 %4101 }
 0x543   : > { %4126 = vst.msk [vmem:[%s8292_s13 + $0x10] sm:$0xff] %vm4125_vm7, %v4102_v28 }
 0x545   : > { %v4108_v1 = vpop.permute.xlu1 %4107 }
 0x546   : > { %4129 = vst.msk [vmem:[%s8292_s13 + $0x58] sm:$0xff] %vm4125_vm7, %v4108_v1  ;;  %v4106_v9 = vpop.permute.xlu0 %4105 }
 0x547   : > { %4128 = vst.msk [vmem:[%s8292_s13 + $0x40] sm:$0xff] %vm4125_vm7, %v4106_v9 }
 0x549   : > { %v4116_v2 = vpop.permute.xlu1 %4115 }
 0x54a   : > { %4133 = vst.msk [vmem:[%s8292_s13 + $0xb8] sm:$0xff] %vm4125_vm7, %v4116_v2  ;;  %v4114_v15 = vpop.permute.xlu0 %4113 }
 0x54b   : > { %4132 = vst.msk [vmem:[%s8292_s13 + $0xa0] sm:$0xff] %vm4125_vm7, %v4114_v15 }
 0x54c   : > { %6412 = shalt.err (!%p6409_p3)
}
 0x54d   : > { %s6413_s22 = scalar_lea.hbm %s8911_s10, 3072  ;;  %s6417_s21 = scalar_lea.hbm %s8970_s8, 6144 }
 0x54e   : > { %p6414_p4 = scmp.ne.s32.totalorder %s8911_s10, %s6413_s22  ;;  %p6418_p9 = scmp.lt.u32.totalorder %s8911_s10, %s8970_s8 }
 0x54f   : > { %p6419_p10 = scmp.lt.u32.totalorder %s6417_s21, %s6413_s22  ;;  %p6421_p12 = scmp.lt.u32.totalorder %s6413_s22, %s8911_s10 }
 0x550   : > { %p6415_p7 = pnand %p6414_p4, %p6553_p5 }
 0x551   : > { %p6420_p11 = por %p6419_p10, %p6418_p9 }
 0x552   : > { %p6416_p8 = pneg %p6415_p7 }
 0x553   : > { %p6422_p13 = por %p6421_p12, %p6420_p11 }
 0x555   : > { %p6423_p0 = pnand %p6422_p13, %p6416_p8 }
 0x557   : > { %6426 = shalt.err (!%p6423_p0)
}
 0x558   : > { %s6468_s23 = smov 384   ;;  %s6469_s17 = smov 24  }
 0x559   : > { %6319 = dma.vmem_to_hbm [thread:$0]  (%p6553_p5), %s8913_s26, 3072, %s8911_s10, %s8921_s9, %s6468_s23, %s6468_s23, %s6469_s17  }
 0x55a PF: > { %p6325_p1 = scmp.ge.s32.totalorder %s6461_s30, 2  ;;  %s4163_s18 = sand.u32 1, %s6449_s27  }
 0x55b   : > { %s4164_s25 = scalar_lea.sflag [#allocation6], %s4163_s18 }
 0x55c   : > { %p6322_p2 = pnand %p6325_p1, %p6557_p6 }
 0x55e   : > { %6444 = dma.done.wait (!%p6322_p2), %s4164_s25, 3072  }
 0x55f   : > { %6446 = vsyncadd (!%p6322_p2), %s4164_s25, 4294964224  ;;  %p18_p3 = scmp.ge.s32.totalorder %s6540_s11, 4   ;;  %s8973_s27 = smov %s6453_s28 }
 0x560   : > { %s8974_s28 = smov %s6457_s29  ;;  %s8975_s29 = smov %s6551_s14 }
 0x561   : > { %s8976_s30 = smov %s6540_s11  ;;  %20 = sbr.rel (!%p18_p3) target bundleno = 3 (0x3), region = 112 }
 0x568   :  { %4169 = vsyncpa [#allocation6], 1 }
 0x569   :  { %4171 = vsyncpa [#allocation6 + $0x1], 1 }

</bundles_post_ra>
